<compile_context>
chip_gen: v7x
topology: tpu7x:2x2x1
jax: 0.10.0
libtpu: 0.0.40
codegen_flags: <defaults>
</compile_context>

<pallas_src>
import jax
import jax.numpy as jnp
from jax import lax
from jax.experimental import pallas as pl
from jax.experimental.pallas import tpu as pltpu


# ----------------------------- model config (small) -----------------------------
BATCH = 2
IN_CH = 3            # RGB, as CLIP expects
IMG = 16             # image resolution
PATCH = 4            # patch size -> grid = 4, seq = 17
GRID = IMG // PATCH
N_PATCH = GRID * GRID
SEQ = N_PATCH + 1            # 17 real tokens (CLS + patches)
SEQ_PAD = 24                 # padded to a sublane multiple; pad keys masked in attention
WIDTH = 32                   # transformer width
HEADS = 4
HEAD_DIM = WIDTH // HEADS
MLP_DIM = 4 * WIDTH          # 128 -> lane-dense MLP matmuls
LAYERS = 2
EMBED_DIM = 16               # CLIP visual projection output (mlp_head input)
OUT_CH = 2                   # mlp_head output
LN_EPS = 1e-5

CPP = IN_CH * PATCH * PATCH  # 48  im2col feature size
CPP_PAD = 64                 # padded K for the stem matmul (col 48 = class-token flag)
ATTN_SCALE = float(HEAD_DIM) ** -0.5
NEG_INF = -1e30


# ------------------------------ in-kernel helpers --------------------------------
def _ln(x, g, b):
    """LayerNorm over the last dim (biased variance, matches PyTorch). f32 math."""
    mu = jnp.mean(x, axis=-1, keepdims=True)
    xc = x - mu
    var = jnp.mean(xc * xc, axis=-1, keepdims=True)
    return xc * lax.rsqrt(var + LN_EPS) * g + b


# ----------------------------------- kernel ---------------------------------------
def _vit_kernel(p_ref,
                stem_w_ref, pos_ref, lnpre_g_ref, lnpre_b_ref,
                ln1_g_ref, ln1_b_ref, wqkv_ref, bqkv_ref, wo_ref, bo_ref,
                ln2_g_ref, ln2_b_ref, wfc_ref, bfc_ref, wpr_ref, bpr_ref,
                lnpost_g_ref, lnpost_b_ref, proj_ref, hw_ref, hb_ref,
                o_ref):
    """Full ViTCLIP_img forward for one batch element (one grid step).

    p_ref:  [1, SEQ_PAD, CPP_PAD]  row 0 = one-hot class-token flag; rows >= SEQ are zero pad
    stem_w: [CPP_PAD, WIDTH]       rows 0..CPP-1 = conv1 (im2col) weight, row CPP = class emb
    pos:    [SEQ_PAD, WIDTH]
    per-layer stacked weights carry a leading LAYERS axis
    o_ref:  [1, 1, OUT_CH]
    """
    # ---- stem: patch-embed (+ class token via flag column) + pos + ln_pre ----
    p = p_ref[0]                                                        # [SEQ_PAD, CPP_PAD]
    h = jnp.dot(p, stem_w_ref[...], preferred_element_type=jnp.float32) + pos_ref[...]
    h = _ln(h, lnpre_g_ref[...], lnpre_b_ref[...])                      # [SEQ_PAD, WIDTH]

    # additive key mask: padded key columns (>= SEQ) get -inf -> exactly 0 attention weight
    key_col = lax.broadcasted_iota(jnp.int32, (SEQ_PAD, SEQ_PAD), 1)
    kmask = jnp.where(key_col < SEQ, 0.0, NEG_INF).astype(jnp.float32)

    for l in range(LAYERS):
        # ---- attention: LN1 -> packed QKV -> per-head softmax(QK^T)V -> out-proj ----
        a = _ln(h, ln1_g_ref[l], ln1_b_ref[l])
        qkv = jnp.dot(a.astype(jnp.bfloat16), wqkv_ref[l],
                      preferred_element_type=jnp.float32) + bqkv_ref[l]  # [SEQ_PAD, 3W]
        ctx = []
        for hd in range(HEADS):
            lo = hd * HEAD_DIM
            qh = qkv[:, lo:lo + HEAD_DIM]
            kh = qkv[:, WIDTH + lo:WIDTH + lo + HEAD_DIM]
            vh = qkv[:, 2 * WIDTH + lo:2 * WIDTH + lo + HEAD_DIM]
            # q @ k^T without an explicit transpose: contract last dims.
            s = lax.dot_general(qh, kh, (((1,), (1,)), ((), ())),
                                preferred_element_type=jnp.float32) * ATTN_SCALE
            s = s + kmask
            s = s - jnp.max(s, axis=-1, keepdims=True)
            e = jnp.exp(s)
            pw = e * pl.reciprocal(jnp.sum(e, axis=-1, keepdims=True), approx=True)
            ctx.append(jnp.dot(pw, vh, preferred_element_type=jnp.float32))
        ctx = jnp.concatenate(ctx, axis=-1)                              # [SEQ_PAD, WIDTH]
        h = h + jnp.dot(ctx.astype(jnp.bfloat16), wo_ref[l],
                        preferred_element_type=jnp.float32) + bo_ref[l]

        # ---- MLP: LN2 -> c_fc -> QuickGELU -> c_proj -> residual ----
        m = _ln(h, ln2_g_ref[l], ln2_b_ref[l])
        m = jnp.dot(m.astype(jnp.bfloat16), wfc_ref[l],
                    preferred_element_type=jnp.float32) + bfc_ref[l]     # [SEQ_PAD, MLP_DIM]
        m = m * jax.nn.sigmoid(1.702 * m)                                # QuickGELU (f32)
        m = jnp.dot(m.astype(jnp.bfloat16), wpr_ref[l],
                    preferred_element_type=jnp.float32) + bpr_ref[l]
        h = h + m

    # ---- head: ln_post on CLS token, CLIP projection, mlp_head ----
    cls = _ln(h[0:1, :], lnpost_g_ref[...], lnpost_b_ref[...])           # [1, WIDTH]
    fea = jnp.dot(cls, proj_ref[...], preferred_element_type=jnp.float32)
    o_ref[0] = jnp.dot(fea, hw_ref[...], preferred_element_type=jnp.float32) + hb_ref[...]


# --------------------------------- wrapper -----------------------------------------
def _replicated_spec(arr):
    """Whole-array block, same block for every grid step (weights stay resident)."""
    zeros = (0,) * arr.ndim
    return pl.BlockSpec(arr.shape, lambda b: zeros)


@jax.jit
def vit_clip_img_forward(x, params):
    """x: [B, C, H, W] f32 (NCHW) -> logits [B, OUT_CH]."""
    # im2col for the stride=PATCH conv1 (pure layout glue, fused by XLA under jit)
    xp = x.reshape(BATCH, IN_CH, GRID, PATCH, GRID, PATCH)
    xp = jnp.transpose(xp, (0, 2, 4, 1, 3, 5))                  # [B, Gh, Gw, C, P, P]
    patches = xp.reshape(BATCH, N_PATCH, CPP)
    # [B, SEQ_PAD, CPP_PAD]: row 0 = class-token flag, rows 1..16 = patches, rest zero pad
    full = jnp.zeros((BATCH, SEQ_PAD, CPP_PAD), jnp.float32)
    full = full.at[:, 0, CPP].set(1.0)
    full = full.at[:, 1:1 + N_PATCH, :CPP].set(patches)

    w_args = (
        params["stem_w"], params["pos"], params["ln_pre_g"], params["ln_pre_b"],
        params["ln1_g"], params["ln1_b"], params["wqkv"], params["bqkv"],
        params["wo"], params["bo"], params["ln2_g"], params["ln2_b"],
        params["wfc"], params["bfc"], params["wpr"], params["bpr"],
        params["ln_post_g"], params["ln_post_b"], params["proj"],
        params["head_w"], params["head_b"],
    )

    in_specs = [pl.BlockSpec((1, SEQ_PAD, CPP_PAD), lambda b: (b, 0, 0))]
    in_specs += [_replicated_spec(a) for a in w_args]

    logits = pl.pallas_call(
        _vit_kernel,
        out_shape=jax.ShapeDtypeStruct((BATCH, 1, OUT_CH), jnp.float32),
        grid=(BATCH,),
        in_specs=in_specs,
        out_specs=pl.BlockSpec((1, 1, OUT_CH), lambda b: (b, 0, 0)),
        compiler_params=pltpu.CompilerParams(
            dimension_semantics=("parallel",)),   # batch elements -> separate TCs on v7x
    )(full, *w_args)
    return logits.reshape(BATCH, OUT_CH)


# ----------------------------- parameter synthesis --------------------------------
def init_params(key):
    keys = iter(jax.random.split(key, 64))

    def nrm(shape, scale=0.02):
        return scale * jax.random.normal(next(keys), shape, dtype=jnp.float32)

    ones2 = lambda n: jnp.ones((1, n), jnp.float32)
    zeros2 = lambda n: jnp.zeros((1, n), jnp.float32)

    # PyTorch-layout weights, re-arranged ONCE into kernel layouts.
    conv1_w = nrm((WIDTH, IN_CH, PATCH, PATCH))      # conv, stride=PATCH, no bias
    class_embedding = nrm((WIDTH,))
    pos = nrm((SEQ, WIDTH))
    proj = nrm((WIDTH, EMBED_DIM))                   # CLIP visual projection (no bias)
    head_w = nrm((OUT_CH, EMBED_DIM))                # nn.Linear(embed_dim, out_channels)
    head_b = nrm((OUT_CH,))

    # stem weight: im2col patch matmul weight + class-embedding row at index CPP
    stem_w = jnp.zeros((CPP_PAD, WIDTH), jnp.float32)
    stem_w = stem_w.at[:CPP].set(conv1_w.reshape(WIDTH, CPP).T)
    stem_w = stem_w.at[CPP].set(class_embedding)

    pos_pad = jnp.zeros((SEQ_PAD, WIDTH), jnp.float32).at[:SEQ].set(pos)

    wqkv, bqkv, wo, bo = [], [], [], []
    wfc, bfc, wpr, bpr = [], [], [], []
    ln1_g, ln1_b, ln2_g, ln2_b = [], [], [], []
    for _ in range(LAYERS):
        in_proj_w = nrm((3 * WIDTH, WIDTH))          # packed [q;k;v], PyTorch [out, in]
        in_proj_b = nrm((3 * WIDTH,))
        out_proj_w = nrm((WIDTH, WIDTH))
        out_proj_b = nrm((WIDTH,))
        c_fc_w = nrm((MLP_DIM, WIDTH))
        c_fc_b = nrm((MLP_DIM,))
        c_proj_w = nrm((WIDTH, MLP_DIM))
        c_proj_b = nrm((WIDTH,))

        wqkv.append(in_proj_w.T)                     # [W, 3W], columns = [q | k | v]
        bqkv.append(in_proj_b.reshape(1, 3 * WIDTH))
        wo.append(out_proj_w.T)                      # [W, W]
        bo.append(out_proj_b.reshape(1, WIDTH))
        wfc.append(c_fc_w.T)                         # [W, MLP]
        bfc.append(c_fc_b.reshape(1, MLP_DIM))
        wpr.append(c_proj_w.T)                       # [MLP, W]
        bpr.append(c_proj_b.reshape(1, WIDTH))
        ln1_g.append(ones2(WIDTH)); ln1_b.append(zeros2(WIDTH))
        ln2_g.append(ones2(WIDTH)); ln2_b.append(zeros2(WIDTH))

    stack = jnp.stack
    return {
        "stem_w": stem_w,
        "pos": pos_pad,
        "ln_pre_g": ones2(WIDTH), "ln_pre_b": zeros2(WIDTH),
        "ln1_g": stack(ln1_g), "ln1_b": stack(ln1_b),
        # bf16 only for the fat MXU matmul operands; biases / LN / softmax stay f32
        "wqkv": stack(wqkv).astype(jnp.bfloat16), "bqkv": stack(bqkv),
        "wo": stack(wo).astype(jnp.bfloat16), "bo": stack(bo),
        "ln2_g": stack(ln2_g), "ln2_b": stack(ln2_b),
        "wfc": stack(wfc).astype(jnp.bfloat16), "bfc": stack(bfc),
        "wpr": stack(wpr).astype(jnp.bfloat16), "bpr": stack(bpr),
        "ln_post_g": ones2(WIDTH), "ln_post_b": zeros2(WIDTH),
        "proj": proj,                                # [WIDTH, EMBED_DIM]
        "head_w": head_w.T,                          # pre-transposed: [EMBED_DIM, OUT_CH]
        "head_b": head_b.reshape(1, OUT_CH),
    }


# ----------------------------------- main ------------------------------------------
if __name__ == "__main__":
    key = jax.random.PRNGKey(0)
    k_param, k_x = jax.random.split(key)
    params = init_params(k_param)
    x = jax.random.normal(k_x, (BATCH, IN_CH, IMG, IMG), dtype=jnp.float32)

    out = vit_clip_img_forward(x, params)
    out = jax.block_until_ready(out)
    assert out.shape == (BATCH, OUT_CH), out.shape
    print("KERNEL_OK")
</pallas_src>

<mosaic_0001>
module attributes {stable_mosaic.version = 11 : i64} {
  func.func @_vit_kernel(%arg0: i32, %arg1: memref<1x24x64xf32, #tpu.memory_space<vmem>>, %arg2: memref<64x32xf32, #tpu.memory_space<vmem>>, %arg3: memref<24x32xf32, #tpu.memory_space<vmem>>, %arg4: memref<1x32xf32, #tpu.memory_space<vmem>>, %arg5: memref<1x32xf32, #tpu.memory_space<vmem>>, %arg6: memref<2x1x32xf32, #tpu.memory_space<vmem>>, %arg7: memref<2x1x32xf32, #tpu.memory_space<vmem>>, %arg8: memref<2x32x96xbf16, #tpu.memory_space<vmem>>, %arg9: memref<2x1x96xf32, #tpu.memory_space<vmem>>, %arg10: memref<2x32x32xbf16, #tpu.memory_space<vmem>>, %arg11: memref<2x1x32xf32, #tpu.memory_space<vmem>>, %arg12: memref<2x1x32xf32, #tpu.memory_space<vmem>>, %arg13: memref<2x1x32xf32, #tpu.memory_space<vmem>>, %arg14: memref<2x32x128xbf16, #tpu.memory_space<vmem>>, %arg15: memref<2x1x128xf32, #tpu.memory_space<vmem>>, %arg16: memref<2x128x32xbf16, #tpu.memory_space<vmem>>, %arg17: memref<2x1x32xf32, #tpu.memory_space<vmem>>, %arg18: memref<1x32xf32, #tpu.memory_space<vmem>>, %arg19: memref<1x32xf32, #tpu.memory_space<vmem>>, %arg20: memref<32x16xf32, #tpu.memory_space<vmem>>, %arg21: memref<16x2xf32, #tpu.memory_space<vmem>>, %arg22: memref<1x2xf32, #tpu.memory_space<vmem>>, %arg23: memref<1x1x2xf32, #tpu.memory_space<vmem>>) attributes {dimension_semantics = [#tpu.dimension_semantics<parallel>], iteration_bounds = array<i64: 2>, scalar_prefetch = 0 : i64, scratch_operands = 0 : i64, tpu.core_type = #tpu.core_type<tc>, window_params = [{transform_indices = @transform_0, window_bounds = array<i64: 1, 24, 64>}, {pipeline_mode = #tpu.pipeline_mode<synchronous>, transform_indices = @transform_1, window_bounds = array<i64: 64, 32>}, {pipeline_mode = #tpu.pipeline_mode<synchronous>, transform_indices = @transform_2, window_bounds = array<i64: 24, 32>}, {pipeline_mode = #tpu.pipeline_mode<synchronous>, transform_indices = @transform_3, window_bounds = array<i64: 1, 32>}, {pipeline_mode = #tpu.pipeline_mode<synchronous>, transform_indices = @transform_4, window_bounds = array<i64: 1, 32>}, {pipeline_mode = #tpu.pipeline_mode<synchronous>, transform_indices = @transform_5, window_bounds = array<i64: 2, 1, 32>}, {pipeline_mode = #tpu.pipeline_mode<synchronous>, transform_indices = @transform_6, window_bounds = array<i64: 2, 1, 32>}, {pipeline_mode = #tpu.pipeline_mode<synchronous>, transform_indices = @transform_7, window_bounds = array<i64: 2, 32, 96>}, {pipeline_mode = #tpu.pipeline_mode<synchronous>, transform_indices = @transform_8, window_bounds = array<i64: 2, 1, 96>}, {pipeline_mode = #tpu.pipeline_mode<synchronous>, transform_indices = @transform_9, window_bounds = array<i64: 2, 32, 32>}, {pipeline_mode = #tpu.pipeline_mode<synchronous>, transform_indices = @transform_10, window_bounds = array<i64: 2, 1, 32>}, {pipeline_mode = #tpu.pipeline_mode<synchronous>, transform_indices = @transform_11, window_bounds = array<i64: 2, 1, 32>}, {pipeline_mode = #tpu.pipeline_mode<synchronous>, transform_indices = @transform_12, window_bounds = array<i64: 2, 1, 32>}, {pipeline_mode = #tpu.pipeline_mode<synchronous>, transform_indices = @transform_13, window_bounds = array<i64: 2, 32, 128>}, {pipeline_mode = #tpu.pipeline_mode<synchronous>, transform_indices = @transform_14, window_bounds = array<i64: 2, 1, 128>}, {pipeline_mode = #tpu.pipeline_mode<synchronous>, transform_indices = @transform_15, window_bounds = array<i64: 2, 128, 32>}, {pipeline_mode = #tpu.pipeline_mode<synchronous>, transform_indices = @transform_16, window_bounds = array<i64: 2, 1, 32>}, {pipeline_mode = #tpu.pipeline_mode<synchronous>, transform_indices = @transform_17, window_bounds = array<i64: 1, 32>}, {pipeline_mode = #tpu.pipeline_mode<synchronous>, transform_indices = @transform_18, window_bounds = array<i64: 1, 32>}, {pipeline_mode = #tpu.pipeline_mode<synchronous>, transform_indices = @transform_19, window_bounds = array<i64: 32, 16>}, {pipeline_mode = #tpu.pipeline_mode<synchronous>, transform_indices = @transform_20, window_bounds = array<i64: 16, 2>}, {pipeline_mode = #tpu.pipeline_mode<synchronous>, transform_indices = @transform_21, window_bounds = array<i64: 1, 2>}, {transform_indices = @transform_22, window_bounds = array<i64: 1, 1, 2>}]} {
    %c0 = arith.constant 0 : index
    %c0_0 = arith.constant 0 : index
    %c0_1 = arith.constant 0 : index
    %0 = vector.load %arg1[%c0, %c0_0, %c0_1] : memref<1x24x64xf32, #tpu.memory_space<vmem>>, vector<1x24x64xf32>
    %1 = vector.shape_cast %0 : vector<1x24x64xf32> to vector<24x64xf32>
    %c0_2 = arith.constant 0 : index
    %c0_3 = arith.constant 0 : index
    %2 = vector.load %arg2[%c0_2, %c0_3] : memref<64x32xf32, #tpu.memory_space<vmem>>, vector<64x32xf32>
    %cst = arith.constant dense<0.000000e+00> : vector<24x32xf32>
    %3 = tpu.matmul %1, %2, %cst {dimension_numbers = #tpu.dot_dimension_numbers<[1], [0], [0], [1], [0, 0, 1, 1], [], []>} : vector<24x64xf32>, vector<64x32xf32>, vector<24x32xf32> -> vector<24x32xf32>
    %c0_4 = arith.constant 0 : index
    %c0_5 = arith.constant 0 : index
    %4 = vector.load %arg3[%c0_4, %c0_5] : memref<24x32xf32, #tpu.memory_space<vmem>>, vector<24x32xf32>
    %5 = arith.addf %3, %4 : vector<24x32xf32>
    %c0_6 = arith.constant 0 : index
    %c0_7 = arith.constant 0 : index
    %6 = vector.load %arg4[%c0_6, %c0_7] : memref<1x32xf32, #tpu.memory_space<vmem>>, vector<1x32xf32>
    %c0_8 = arith.constant 0 : index
    %c0_9 = arith.constant 0 : index
    %7 = vector.load %arg5[%c0_8, %c0_9] : memref<1x32xf32, #tpu.memory_space<vmem>>, vector<1x32xf32>
    %cst_10 = arith.constant dense<0.000000e+00> : vector<24xf32>
    %8 = vector.multi_reduction <add>, %5, %cst_10 [1] : vector<24x32xf32> to vector<24xf32>
    %9 = vector.shape_cast %8 : vector<24xf32> to vector<24x1xf32>
    %cst_11 = arith.constant 3.200000e+01 : f32
    %10 = vector.broadcast %cst_11 : f32 to vector<24x1xf32>
    %11 = arith.divf %9, %10 : vector<24x1xf32>
    %12 = vector.broadcast %11 : vector<24x1xf32> to vector<24x32xf32>
    %13 = arith.subf %5, %12 : vector<24x32xf32>
    %14 = arith.mulf %13, %13 : vector<24x32xf32>
    %cst_12 = arith.constant dense<0.000000e+00> : vector<24xf32>
    %15 = vector.multi_reduction <add>, %14, %cst_12 [1] : vector<24x32xf32> to vector<24xf32>
    %16 = vector.shape_cast %15 : vector<24xf32> to vector<24x1xf32>
    %cst_13 = arith.constant 3.200000e+01 : f32
    %17 = vector.broadcast %cst_13 : f32 to vector<24x1xf32>
    %18 = arith.divf %16, %17 : vector<24x1xf32>
    %cst_14 = arith.constant 9.99999974E-6 : f32
    %19 = vector.broadcast %cst_14 : f32 to vector<24x1xf32>
    %20 = arith.addf %18, %19 : vector<24x1xf32>
    %21 = math.rsqrt %20 : vector<24x1xf32>
    %22 = vector.broadcast %21 : vector<24x1xf32> to vector<24x32xf32>
    %23 = arith.mulf %13, %22 : vector<24x32xf32>
    %24 = vector.broadcast %6 : vector<1x32xf32> to vector<24x32xf32>
    %25 = arith.mulf %23, %24 : vector<24x32xf32>
    %26 = vector.broadcast %7 : vector<1x32xf32> to vector<24x32xf32>
    %27 = arith.addf %25, %26 : vector<24x32xf32>
    %28 = tpu.iota {dimensions = array<i32: 1>} : vector<24x24xi32>
    %c17_i32 = arith.constant 17 : i32
    %29 = vector.broadcast %c17_i32 : i32 to vector<24x24xi32>
    %30 = arith.cmpi slt, %28, %29 : vector<24x24xi32>
    %cst_15 = arith.constant 0.000000e+00 : f32
    %cst_16 = arith.constant -1.000000e+30 : f32
    %31 = vector.broadcast %cst_15 : f32 to vector<24x24xf32>
    %32 = vector.broadcast %cst_16 : f32 to vector<24x24xf32>
    %33 = arith.select %30, %31, %32 : vector<24x24xi1>, vector<24x24xf32>
    %c0_17 = arith.constant 0 : index
    %c0_18 = arith.constant 0 : index
    %c0_19 = arith.constant 0 : index
    %34 = vector.load %arg6[%c0_17, %c0_18, %c0_19] : memref<2x1x32xf32, #tpu.memory_space<vmem>>, vector<1x1x32xf32>
    %35 = vector.shape_cast %34 : vector<1x1x32xf32> to vector<1x32xf32>
    %c0_20 = arith.constant 0 : index
    %c0_21 = arith.constant 0 : index
    %c0_22 = arith.constant 0 : index
    %36 = vector.load %arg7[%c0_20, %c0_21, %c0_22] : memref<2x1x32xf32, #tpu.memory_space<vmem>>, vector<1x1x32xf32>
    %37 = vector.shape_cast %36 : vector<1x1x32xf32> to vector<1x32xf32>
    %cst_23 = arith.constant dense<0.000000e+00> : vector<24xf32>
    %38 = vector.multi_reduction <add>, %27, %cst_23 [1] : vector<24x32xf32> to vector<24xf32>
    %39 = vector.shape_cast %38 : vector<24xf32> to vector<24x1xf32>
    %cst_24 = arith.constant 3.200000e+01 : f32
    %40 = vector.broadcast %cst_24 : f32 to vector<24x1xf32>
    %41 = arith.divf %39, %40 : vector<24x1xf32>
    %42 = vector.broadcast %41 : vector<24x1xf32> to vector<24x32xf32>
    %43 = arith.subf %27, %42 : vector<24x32xf32>
    %44 = arith.mulf %43, %43 : vector<24x32xf32>
    %cst_25 = arith.constant dense<0.000000e+00> : vector<24xf32>
    %45 = vector.multi_reduction <add>, %44, %cst_25 [1] : vector<24x32xf32> to vector<24xf32>
    %46 = vector.shape_cast %45 : vector<24xf32> to vector<24x1xf32>
    %cst_26 = arith.constant 3.200000e+01 : f32
    %47 = vector.broadcast %cst_26 : f32 to vector<24x1xf32>
    %48 = arith.divf %46, %47 : vector<24x1xf32>
    %cst_27 = arith.constant 9.99999974E-6 : f32
    %49 = vector.broadcast %cst_27 : f32 to vector<24x1xf32>
    %50 = arith.addf %48, %49 : vector<24x1xf32>
    %51 = math.rsqrt %50 : vector<24x1xf32>
    %52 = vector.broadcast %51 : vector<24x1xf32> to vector<24x32xf32>
    %53 = arith.mulf %43, %52 : vector<24x32xf32>
    %54 = vector.broadcast %35 : vector<1x32xf32> to vector<24x32xf32>
    %55 = arith.mulf %53, %54 : vector<24x32xf32>
    %56 = vector.broadcast %37 : vector<1x32xf32> to vector<24x32xf32>
    %57 = arith.addf %55, %56 : vector<24x32xf32>
    %58 = arith.truncf %57 : vector<24x32xf32> to vector<24x32xbf16>
    %c0_28 = arith.constant 0 : index
    %c0_29 = arith.constant 0 : index
    %c0_30 = arith.constant 0 : index
    %59 = vector.load %arg8[%c0_28, %c0_29, %c0_30] : memref<2x32x96xbf16, #tpu.memory_space<vmem>>, vector<1x32x96xbf16>
    %60 = vector.shape_cast %59 : vector<1x32x96xbf16> to vector<32x96xbf16>
    %cst_31 = arith.constant dense<0.000000e+00> : vector<24x96xf32>
    %61 = tpu.matmul %58, %60, %cst_31 {dimension_numbers = #tpu.dot_dimension_numbers<[1], [0], [0], [1], [0, 0, 1, 1], [], []>} : vector<24x32xbf16>, vector<32x96xbf16>, vector<24x96xf32> -> vector<24x96xf32>
    %c0_32 = arith.constant 0 : index
    %c0_33 = arith.constant 0 : index
    %c0_34 = arith.constant 0 : index
    %62 = vector.load %arg9[%c0_32, %c0_33, %c0_34] : memref<2x1x96xf32, #tpu.memory_space<vmem>>, vector<1x1x96xf32>
    %63 = vector.shape_cast %62 : vector<1x1x96xf32> to vector<1x96xf32>
    %64 = vector.broadcast %63 : vector<1x96xf32> to vector<24x96xf32>
    %65 = arith.addf %61, %64 : vector<24x96xf32>
    %66 = vector.extract_strided_slice %65 {offsets = [0, 0], sizes = [24, 8], strides = [1, 1]} : vector<24x96xf32> to vector<24x8xf32>
    %67 = vector.extract_strided_slice %65 {offsets = [0, 32], sizes = [24, 8], strides = [1, 1]} : vector<24x96xf32> to vector<24x8xf32>
    %68 = vector.extract_strided_slice %65 {offsets = [0, 64], sizes = [24, 8], strides = [1, 1]} : vector<24x96xf32> to vector<24x8xf32>
    %cst_35 = arith.constant dense<0.000000e+00> : vector<24x24xf32>
    %69 = tpu.matmul %66, %67, %cst_35 {dimension_numbers = #tpu.dot_dimension_numbers<[1], [1], [0], [0], [0, 0, 1, 0], [], []>} : vector<24x8xf32>, vector<24x8xf32>, vector<24x24xf32> -> vector<24x24xf32>
    %cst_36 = arith.constant 0.353553385 : f32
    %70 = vector.broadcast %cst_36 : f32 to vector<24x24xf32>
    %71 = arith.mulf %69, %70 : vector<24x24xf32>
    %72 = arith.addf %71, %33 : vector<24x24xf32>
    %cst_37 = arith.constant dense<0xFF800000> : vector<24xf32>
    %73 = vector.multi_reduction <maximumf>, %72, %cst_37 [1] : vector<24x24xf32> to vector<24xf32>
    %74 = vector.shape_cast %73 : vector<24xf32> to vector<24x1xf32>
    %75 = vector.broadcast %74 : vector<24x1xf32> to vector<24x24xf32>
    %76 = arith.subf %72, %75 : vector<24x24xf32>
    %77 = math.exp %76 : vector<24x24xf32>
    %cst_38 = arith.constant dense<0.000000e+00> : vector<24xf32>
    %78 = vector.multi_reduction <add>, %77, %cst_38 [1] : vector<24x24xf32> to vector<24xf32>
    %79 = vector.shape_cast %78 : vector<24xf32> to vector<24x1xf32>
    %80 = tpu.reciprocal %79 {approx = true} : vector<24x1xf32> -> vector<24x1xf32>
    %81 = vector.broadcast %80 : vector<24x1xf32> to vector<24x24xf32>
    %82 = arith.mulf %77, %81 : vector<24x24xf32>
    %cst_39 = arith.constant dense<0.000000e+00> : vector<24x8xf32>
    %83 = tpu.matmul %82, %68, %cst_39 {dimension_numbers = #tpu.dot_dimension_numbers<[1], [0], [0], [1], [0, 0, 1, 1], [], []>} : vector<24x24xf32>, vector<24x8xf32>, vector<24x8xf32> -> vector<24x8xf32>
    %84 = vector.extract_strided_slice %65 {offsets = [0, 8], sizes = [24, 8], strides = [1, 1]} : vector<24x96xf32> to vector<24x8xf32>
    %85 = vector.extract_strided_slice %65 {offsets = [0, 40], sizes = [24, 8], strides = [1, 1]} : vector<24x96xf32> to vector<24x8xf32>
    %86 = vector.extract_strided_slice %65 {offsets = [0, 72], sizes = [24, 8], strides = [1, 1]} : vector<24x96xf32> to vector<24x8xf32>
    %cst_40 = arith.constant dense<0.000000e+00> : vector<24x24xf32>
    %87 = tpu.matmul %84, %85, %cst_40 {dimension_numbers = #tpu.dot_dimension_numbers<[1], [1], [0], [0], [0, 0, 1, 0], [], []>} : vector<24x8xf32>, vector<24x8xf32>, vector<24x24xf32> -> vector<24x24xf32>
    %cst_41 = arith.constant 0.353553385 : f32
    %88 = vector.broadcast %cst_41 : f32 to vector<24x24xf32>
    %89 = arith.mulf %87, %88 : vector<24x24xf32>
    %90 = arith.addf %89, %33 : vector<24x24xf32>
    %cst_42 = arith.constant dense<0xFF800000> : vector<24xf32>
    %91 = vector.multi_reduction <maximumf>, %90, %cst_42 [1] : vector<24x24xf32> to vector<24xf32>
    %92 = vector.shape_cast %91 : vector<24xf32> to vector<24x1xf32>
    %93 = vector.broadcast %92 : vector<24x1xf32> to vector<24x24xf32>
    %94 = arith.subf %90, %93 : vector<24x24xf32>
    %95 = math.exp %94 : vector<24x24xf32>
    %cst_43 = arith.constant dense<0.000000e+00> : vector<24xf32>
    %96 = vector.multi_reduction <add>, %95, %cst_43 [1] : vector<24x24xf32> to vector<24xf32>
    %97 = vector.shape_cast %96 : vector<24xf32> to vector<24x1xf32>
    %98 = tpu.reciprocal %97 {approx = true} : vector<24x1xf32> -> vector<24x1xf32>
    %99 = vector.broadcast %98 : vector<24x1xf32> to vector<24x24xf32>
    %100 = arith.mulf %95, %99 : vector<24x24xf32>
    %cst_44 = arith.constant dense<0.000000e+00> : vector<24x8xf32>
    %101 = tpu.matmul %100, %86, %cst_44 {dimension_numbers = #tpu.dot_dimension_numbers<[1], [0], [0], [1], [0, 0, 1, 1], [], []>} : vector<24x24xf32>, vector<24x8xf32>, vector<24x8xf32> -> vector<24x8xf32>
    %102 = vector.extract_strided_slice %65 {offsets = [0, 16], sizes = [24, 8], strides = [1, 1]} : vector<24x96xf32> to vector<24x8xf32>
    %103 = vector.extract_strided_slice %65 {offsets = [0, 48], sizes = [24, 8], strides = [1, 1]} : vector<24x96xf32> to vector<24x8xf32>
    %104 = vector.extract_strided_slice %65 {offsets = [0, 80], sizes = [24, 8], strides = [1, 1]} : vector<24x96xf32> to vector<24x8xf32>
    %cst_45 = arith.constant dense<0.000000e+00> : vector<24x24xf32>
    %105 = tpu.matmul %102, %103, %cst_45 {dimension_numbers = #tpu.dot_dimension_numbers<[1], [1], [0], [0], [0, 0, 1, 0], [], []>} : vector<24x8xf32>, vector<24x8xf32>, vector<24x24xf32> -> vector<24x24xf32>
    %cst_46 = arith.constant 0.353553385 : f32
    %106 = vector.broadcast %cst_46 : f32 to vector<24x24xf32>
    %107 = arith.mulf %105, %106 : vector<24x24xf32>
    %108 = arith.addf %107, %33 : vector<24x24xf32>
    %cst_47 = arith.constant dense<0xFF800000> : vector<24xf32>
    %109 = vector.multi_reduction <maximumf>, %108, %cst_47 [1] : vector<24x24xf32> to vector<24xf32>
    %110 = vector.shape_cast %109 : vector<24xf32> to vector<24x1xf32>
    %111 = vector.broadcast %110 : vector<24x1xf32> to vector<24x24xf32>
    %112 = arith.subf %108, %111 : vector<24x24xf32>
    %113 = math.exp %112 : vector<24x24xf32>
    %cst_48 = arith.constant dense<0.000000e+00> : vector<24xf32>
    %114 = vector.multi_reduction <add>, %113, %cst_48 [1] : vector<24x24xf32> to vector<24xf32>
    %115 = vector.shape_cast %114 : vector<24xf32> to vector<24x1xf32>
    %116 = tpu.reciprocal %115 {approx = true} : vector<24x1xf32> -> vector<24x1xf32>
    %117 = vector.broadcast %116 : vector<24x1xf32> to vector<24x24xf32>
    %118 = arith.mulf %113, %117 : vector<24x24xf32>
    %cst_49 = arith.constant dense<0.000000e+00> : vector<24x8xf32>
    %119 = tpu.matmul %118, %104, %cst_49 {dimension_numbers = #tpu.dot_dimension_numbers<[1], [0], [0], [1], [0, 0, 1, 1], [], []>} : vector<24x24xf32>, vector<24x8xf32>, vector<24x8xf32> -> vector<24x8xf32>
    %120 = vector.extract_strided_slice %65 {offsets = [0, 24], sizes = [24, 8], strides = [1, 1]} : vector<24x96xf32> to vector<24x8xf32>
    %121 = vector.extract_strided_slice %65 {offsets = [0, 56], sizes = [24, 8], strides = [1, 1]} : vector<24x96xf32> to vector<24x8xf32>
    %122 = vector.extract_strided_slice %65 {offsets = [0, 88], sizes = [24, 8], strides = [1, 1]} : vector<24x96xf32> to vector<24x8xf32>
    %cst_50 = arith.constant dense<0.000000e+00> : vector<24x24xf32>
    %123 = tpu.matmul %120, %121, %cst_50 {dimension_numbers = #tpu.dot_dimension_numbers<[1], [1], [0], [0], [0, 0, 1, 0], [], []>} : vector<24x8xf32>, vector<24x8xf32>, vector<24x24xf32> -> vector<24x24xf32>
    %cst_51 = arith.constant 0.353553385 : f32
    %124 = vector.broadcast %cst_51 : f32 to vector<24x24xf32>
    %125 = arith.mulf %123, %124 : vector<24x24xf32>
    %126 = arith.addf %125, %33 : vector<24x24xf32>
    %cst_52 = arith.constant dense<0xFF800000> : vector<24xf32>
    %127 = vector.multi_reduction <maximumf>, %126, %cst_52 [1] : vector<24x24xf32> to vector<24xf32>
    %128 = vector.shape_cast %127 : vector<24xf32> to vector<24x1xf32>
    %129 = vector.broadcast %128 : vector<24x1xf32> to vector<24x24xf32>
    %130 = arith.subf %126, %129 : vector<24x24xf32>
    %131 = math.exp %130 : vector<24x24xf32>
    %cst_53 = arith.constant dense<0.000000e+00> : vector<24xf32>
    %132 = vector.multi_reduction <add>, %131, %cst_53 [1] : vector<24x24xf32> to vector<24xf32>
    %133 = vector.shape_cast %132 : vector<24xf32> to vector<24x1xf32>
    %134 = tpu.reciprocal %133 {approx = true} : vector<24x1xf32> -> vector<24x1xf32>
    %135 = vector.broadcast %134 : vector<24x1xf32> to vector<24x24xf32>
    %136 = arith.mulf %131, %135 : vector<24x24xf32>
    %cst_54 = arith.constant dense<0.000000e+00> : vector<24x8xf32>
    %137 = tpu.matmul %136, %122, %cst_54 {dimension_numbers = #tpu.dot_dimension_numbers<[1], [0], [0], [1], [0, 0, 1, 1], [], []>} : vector<24x24xf32>, vector<24x8xf32>, vector<24x8xf32> -> vector<24x8xf32>
    %138 = tpu.concatenate %83, %101, %119, %137 in 1 : vector<24x8xf32>, vector<24x8xf32>, vector<24x8xf32>, vector<24x8xf32> -> vector<24x32xf32>
    %139 = arith.truncf %138 : vector<24x32xf32> to vector<24x32xbf16>
    %c0_55 = arith.constant 0 : index
    %c0_56 = arith.constant 0 : index
    %c0_57 = arith.constant 0 : index
    %140 = vector.load %arg10[%c0_55, %c0_56, %c0_57] : memref<2x32x32xbf16, #tpu.memory_space<vmem>>, vector<1x32x32xbf16>
    %141 = vector.shape_cast %140 : vector<1x32x32xbf16> to vector<32x32xbf16>
    %cst_58 = arith.constant dense<0.000000e+00> : vector<24x32xf32>
    %142 = tpu.matmul %139, %141, %cst_58 {dimension_numbers = #tpu.dot_dimension_numbers<[1], [0], [0], [1], [0, 0, 1, 1], [], []>} : vector<24x32xbf16>, vector<32x32xbf16>, vector<24x32xf32> -> vector<24x32xf32>
    %143 = arith.addf %27, %142 : vector<24x32xf32>
    %c0_59 = arith.constant 0 : index
    %c0_60 = arith.constant 0 : index
    %c0_61 = arith.constant 0 : index
    %144 = vector.load %arg11[%c0_59, %c0_60, %c0_61] : memref<2x1x32xf32, #tpu.memory_space<vmem>>, vector<1x1x32xf32>
    %145 = vector.shape_cast %144 : vector<1x1x32xf32> to vector<1x32xf32>
    %146 = vector.broadcast %145 : vector<1x32xf32> to vector<24x32xf32>
    %147 = arith.addf %143, %146 : vector<24x32xf32>
    %c0_62 = arith.constant 0 : index
    %c0_63 = arith.constant 0 : index
    %c0_64 = arith.constant 0 : index
    %148 = vector.load %arg12[%c0_62, %c0_63, %c0_64] : memref<2x1x32xf32, #tpu.memory_space<vmem>>, vector<1x1x32xf32>
    %149 = vector.shape_cast %148 : vector<1x1x32xf32> to vector<1x32xf32>
    %c0_65 = arith.constant 0 : index
    %c0_66 = arith.constant 0 : index
    %c0_67 = arith.constant 0 : index
    %150 = vector.load %arg13[%c0_65, %c0_66, %c0_67] : memref<2x1x32xf32, #tpu.memory_space<vmem>>, vector<1x1x32xf32>
    %151 = vector.shape_cast %150 : vector<1x1x32xf32> to vector<1x32xf32>
    %cst_68 = arith.constant dense<0.000000e+00> : vector<24xf32>
    %152 = vector.multi_reduction <add>, %147, %cst_68 [1] : vector<24x32xf32> to vector<24xf32>
    %153 = vector.shape_cast %152 : vector<24xf32> to vector<24x1xf32>
    %cst_69 = arith.constant 3.200000e+01 : f32
    %154 = vector.broadcast %cst_69 : f32 to vector<24x1xf32>
    %155 = arith.divf %153, %154 : vector<24x1xf32>
    %156 = vector.broadcast %155 : vector<24x1xf32> to vector<24x32xf32>
    %157 = arith.subf %147, %156 : vector<24x32xf32>
    %158 = arith.mulf %157, %157 : vector<24x32xf32>
    %cst_70 = arith.constant dense<0.000000e+00> : vector<24xf32>
    %159 = vector.multi_reduction <add>, %158, %cst_70 [1] : vector<24x32xf32> to vector<24xf32>
    %160 = vector.shape_cast %159 : vector<24xf32> to vector<24x1xf32>
    %cst_71 = arith.constant 3.200000e+01 : f32
    %161 = vector.broadcast %cst_71 : f32 to vector<24x1xf32>
    %162 = arith.divf %160, %161 : vector<24x1xf32>
    %cst_72 = arith.constant 9.99999974E-6 : f32
    %163 = vector.broadcast %cst_72 : f32 to vector<24x1xf32>
    %164 = arith.addf %162, %163 : vector<24x1xf32>
    %165 = math.rsqrt %164 : vector<24x1xf32>
    %166 = vector.broadcast %165 : vector<24x1xf32> to vector<24x32xf32>
    %167 = arith.mulf %157, %166 : vector<24x32xf32>
    %168 = vector.broadcast %149 : vector<1x32xf32> to vector<24x32xf32>
    %169 = arith.mulf %167, %168 : vector<24x32xf32>
    %170 = vector.broadcast %151 : vector<1x32xf32> to vector<24x32xf32>
    %171 = arith.addf %169, %170 : vector<24x32xf32>
    %172 = arith.truncf %171 : vector<24x32xf32> to vector<24x32xbf16>
    %c0_73 = arith.constant 0 : index
    %c0_74 = arith.constant 0 : index
    %c0_75 = arith.constant 0 : index
    %173 = vector.load %arg14[%c0_73, %c0_74, %c0_75] : memref<2x32x128xbf16, #tpu.memory_space<vmem>>, vector<1x32x128xbf16>
    %174 = vector.shape_cast %173 : vector<1x32x128xbf16> to vector<32x128xbf16>
    %cst_76 = arith.constant dense<0.000000e+00> : vector<24x128xf32>
    %175 = tpu.matmul %172, %174, %cst_76 {dimension_numbers = #tpu.dot_dimension_numbers<[1], [0], [0], [1], [0, 0, 1, 1], [], []>} : vector<24x32xbf16>, vector<32x128xbf16>, vector<24x128xf32> -> vector<24x128xf32>
    %c0_77 = arith.constant 0 : index
    %c0_78 = arith.constant 0 : index
    %c0_79 = arith.constant 0 : index
    %176 = vector.load %arg15[%c0_77, %c0_78, %c0_79] : memref<2x1x128xf32, #tpu.memory_space<vmem>>, vector<1x1x128xf32>
    %177 = vector.shape_cast %176 : vector<1x1x128xf32> to vector<1x128xf32>
    %178 = vector.broadcast %177 : vector<1x128xf32> to vector<24x128xf32>
    %179 = arith.addf %175, %178 : vector<24x128xf32>
    %cst_80 = arith.constant 1.702000e+00 : f32
    %180 = vector.broadcast %cst_80 : f32 to vector<24x128xf32>
    %181 = arith.mulf %180, %179 : vector<24x128xf32>
    %182 = arith.negf %181 : vector<24x128xf32>
    %183 = math.exp %182 : vector<24x128xf32>
    %cst_81 = arith.constant 1.000000e+00 : f32
    %184 = vector.broadcast %cst_81 : f32 to vector<24x128xf32>
    %185 = arith.addf %184, %183 : vector<24x128xf32>
    %186 = arith.divf %184, %185 : vector<24x128xf32>
    %187 = arith.mulf %179, %186 : vector<24x128xf32>
    %188 = arith.truncf %187 : vector<24x128xf32> to vector<24x128xbf16>
    %c0_82 = arith.constant 0 : index
    %c0_83 = arith.constant 0 : index
    %c0_84 = arith.constant 0 : index
    %189 = vector.load %arg16[%c0_82, %c0_83, %c0_84] : memref<2x128x32xbf16, #tpu.memory_space<vmem>>, vector<1x128x32xbf16>
    %190 = vector.shape_cast %189 : vector<1x128x32xbf16> to vector<128x32xbf16>
    %cst_85 = arith.constant dense<0.000000e+00> : vector<24x32xf32>
    %191 = tpu.matmul %188, %190, %cst_85 {dimension_numbers = #tpu.dot_dimension_numbers<[1], [0], [0], [1], [0, 0, 1, 1], [], []>} : vector<24x128xbf16>, vector<128x32xbf16>, vector<24x32xf32> -> vector<24x32xf32>
    %c0_86 = arith.constant 0 : index
    %c0_87 = arith.constant 0 : index
    %c0_88 = arith.constant 0 : index
    %192 = vector.load %arg17[%c0_86, %c0_87, %c0_88] : memref<2x1x32xf32, #tpu.memory_space<vmem>>, vector<1x1x32xf32>
    %193 = vector.shape_cast %192 : vector<1x1x32xf32> to vector<1x32xf32>
    %194 = vector.broadcast %193 : vector<1x32xf32> to vector<24x32xf32>
    %195 = arith.addf %191, %194 : vector<24x32xf32>
    %196 = arith.addf %147, %195 : vector<24x32xf32>
    %c1 = arith.constant 1 : index
    %c0_89 = arith.constant 0 : index
    %c0_90 = arith.constant 0 : index
    %197 = vector.load %arg6[%c1, %c0_89, %c0_90] : memref<2x1x32xf32, #tpu.memory_space<vmem>>, vector<1x1x32xf32>
    %198 = vector.shape_cast %197 : vector<1x1x32xf32> to vector<1x32xf32>
    %c1_91 = arith.constant 1 : index
    %c0_92 = arith.constant 0 : index
    %c0_93 = arith.constant 0 : index
    %199 = vector.load %arg7[%c1_91, %c0_92, %c0_93] : memref<2x1x32xf32, #tpu.memory_space<vmem>>, vector<1x1x32xf32>
    %200 = vector.shape_cast %199 : vector<1x1x32xf32> to vector<1x32xf32>
    %cst_94 = arith.constant dense<0.000000e+00> : vector<24xf32>
    %201 = vector.multi_reduction <add>, %196, %cst_94 [1] : vector<24x32xf32> to vector<24xf32>
    %202 = vector.shape_cast %201 : vector<24xf32> to vector<24x1xf32>
    %cst_95 = arith.constant 3.200000e+01 : f32
    %203 = vector.broadcast %cst_95 : f32 to vector<24x1xf32>
    %204 = arith.divf %202, %203 : vector<24x1xf32>
    %205 = vector.broadcast %204 : vector<24x1xf32> to vector<24x32xf32>
    %206 = arith.subf %196, %205 : vector<24x32xf32>
    %207 = arith.mulf %206, %206 : vector<24x32xf32>
    %cst_96 = arith.constant dense<0.000000e+00> : vector<24xf32>
    %208 = vector.multi_reduction <add>, %207, %cst_96 [1] : vector<24x32xf32> to vector<24xf32>
    %209 = vector.shape_cast %208 : vector<24xf32> to vector<24x1xf32>
    %cst_97 = arith.constant 3.200000e+01 : f32
    %210 = vector.broadcast %cst_97 : f32 to vector<24x1xf32>
    %211 = arith.divf %209, %210 : vector<24x1xf32>
    %cst_98 = arith.constant 9.99999974E-6 : f32
    %212 = vector.broadcast %cst_98 : f32 to vector<24x1xf32>
    %213 = arith.addf %211, %212 : vector<24x1xf32>
    %214 = math.rsqrt %213 : vector<24x1xf32>
    %215 = vector.broadcast %214 : vector<24x1xf32> to vector<24x32xf32>
    %216 = arith.mulf %206, %215 : vector<24x32xf32>
    %217 = vector.broadcast %198 : vector<1x32xf32> to vector<24x32xf32>
    %218 = arith.mulf %216, %217 : vector<24x32xf32>
    %219 = vector.broadcast %200 : vector<1x32xf32> to vector<24x32xf32>
    %220 = arith.addf %218, %219 : vector<24x32xf32>
    %221 = arith.truncf %220 : vector<24x32xf32> to vector<24x32xbf16>
    %c1_99 = arith.constant 1 : index
    %c0_100 = arith.constant 0 : index
    %c0_101 = arith.constant 0 : index
    %222 = vector.load %arg8[%c1_99, %c0_100, %c0_101] : memref<2x32x96xbf16, #tpu.memory_space<vmem>>, vector<1x32x96xbf16>
    %223 = vector.shape_cast %222 : vector<1x32x96xbf16> to vector<32x96xbf16>
    %cst_102 = arith.constant dense<0.000000e+00> : vector<24x96xf32>
    %224 = tpu.matmul %221, %223, %cst_102 {dimension_numbers = #tpu.dot_dimension_numbers<[1], [0], [0], [1], [0, 0, 1, 1], [], []>} : vector<24x32xbf16>, vector<32x96xbf16>, vector<24x96xf32> -> vector<24x96xf32>
    %c1_103 = arith.constant 1 : index
    %c0_104 = arith.constant 0 : index
    %c0_105 = arith.constant 0 : index
    %225 = vector.load %arg9[%c1_103, %c0_104, %c0_105] : memref<2x1x96xf32, #tpu.memory_space<vmem>>, vector<1x1x96xf32>
    %226 = vector.shape_cast %225 : vector<1x1x96xf32> to vector<1x96xf32>
    %227 = vector.broadcast %226 : vector<1x96xf32> to vector<24x96xf32>
    %228 = arith.addf %224, %227 : vector<24x96xf32>
    %229 = vector.extract_strided_slice %228 {offsets = [0, 0], sizes = [24, 8], strides = [1, 1]} : vector<24x96xf32> to vector<24x8xf32>
    %230 = vector.extract_strided_slice %228 {offsets = [0, 32], sizes = [24, 8], strides = [1, 1]} : vector<24x96xf32> to vector<24x8xf32>
    %231 = vector.extract_strided_slice %228 {offsets = [0, 64], sizes = [24, 8], strides = [1, 1]} : vector<24x96xf32> to vector<24x8xf32>
    %cst_106 = arith.constant dense<0.000000e+00> : vector<24x24xf32>
    %232 = tpu.matmul %229, %230, %cst_106 {dimension_numbers = #tpu.dot_dimension_numbers<[1], [1], [0], [0], [0, 0, 1, 0], [], []>} : vector<24x8xf32>, vector<24x8xf32>, vector<24x24xf32> -> vector<24x24xf32>
    %cst_107 = arith.constant 0.353553385 : f32
    %233 = vector.broadcast %cst_107 : f32 to vector<24x24xf32>
    %234 = arith.mulf %232, %233 : vector<24x24xf32>
    %235 = arith.addf %234, %33 : vector<24x24xf32>
    %cst_108 = arith.constant dense<0xFF800000> : vector<24xf32>
    %236 = vector.multi_reduction <maximumf>, %235, %cst_108 [1] : vector<24x24xf32> to vector<24xf32>
    %237 = vector.shape_cast %236 : vector<24xf32> to vector<24x1xf32>
    %238 = vector.broadcast %237 : vector<24x1xf32> to vector<24x24xf32>
    %239 = arith.subf %235, %238 : vector<24x24xf32>
    %240 = math.exp %239 : vector<24x24xf32>
    %cst_109 = arith.constant dense<0.000000e+00> : vector<24xf32>
    %241 = vector.multi_reduction <add>, %240, %cst_109 [1] : vector<24x24xf32> to vector<24xf32>
    %242 = vector.shape_cast %241 : vector<24xf32> to vector<24x1xf32>
    %243 = tpu.reciprocal %242 {approx = true} : vector<24x1xf32> -> vector<24x1xf32>
    %244 = vector.broadcast %243 : vector<24x1xf32> to vector<24x24xf32>
    %245 = arith.mulf %240, %244 : vector<24x24xf32>
    %cst_110 = arith.constant dense<0.000000e+00> : vector<24x8xf32>
    %246 = tpu.matmul %245, %231, %cst_110 {dimension_numbers = #tpu.dot_dimension_numbers<[1], [0], [0], [1], [0, 0, 1, 1], [], []>} : vector<24x24xf32>, vector<24x8xf32>, vector<24x8xf32> -> vector<24x8xf32>
    %247 = vector.extract_strided_slice %228 {offsets = [0, 8], sizes = [24, 8], strides = [1, 1]} : vector<24x96xf32> to vector<24x8xf32>
    %248 = vector.extract_strided_slice %228 {offsets = [0, 40], sizes = [24, 8], strides = [1, 1]} : vector<24x96xf32> to vector<24x8xf32>
    %249 = vector.extract_strided_slice %228 {offsets = [0, 72], sizes = [24, 8], strides = [1, 1]} : vector<24x96xf32> to vector<24x8xf32>
    %cst_111 = arith.constant dense<0.000000e+00> : vector<24x24xf32>
    %250 = tpu.matmul %247, %248, %cst_111 {dimension_numbers = #tpu.dot_dimension_numbers<[1], [1], [0], [0], [0, 0, 1, 0], [], []>} : vector<24x8xf32>, vector<24x8xf32>, vector<24x24xf32> -> vector<24x24xf32>
    %cst_112 = arith.constant 0.353553385 : f32
    %251 = vector.broadcast %cst_112 : f32 to vector<24x24xf32>
    %252 = arith.mulf %250, %251 : vector<24x24xf32>
    %253 = arith.addf %252, %33 : vector<24x24xf32>
    %cst_113 = arith.constant dense<0xFF800000> : vector<24xf32>
    %254 = vector.multi_reduction <maximumf>, %253, %cst_113 [1] : vector<24x24xf32> to vector<24xf32>
    %255 = vector.shape_cast %254 : vector<24xf32> to vector<24x1xf32>
    %256 = vector.broadcast %255 : vector<24x1xf32> to vector<24x24xf32>
    %257 = arith.subf %253, %256 : vector<24x24xf32>
    %258 = math.exp %257 : vector<24x24xf32>
    %cst_114 = arith.constant dense<0.000000e+00> : vector<24xf32>
    %259 = vector.multi_reduction <add>, %258, %cst_114 [1] : vector<24x24xf32> to vector<24xf32>
    %260 = vector.shape_cast %259 : vector<24xf32> to vector<24x1xf32>
    %261 = tpu.reciprocal %260 {approx = true} : vector<24x1xf32> -> vector<24x1xf32>
    %262 = vector.broadcast %261 : vector<24x1xf32> to vector<24x24xf32>
    %263 = arith.mulf %258, %262 : vector<24x24xf32>
    %cst_115 = arith.constant dense<0.000000e+00> : vector<24x8xf32>
    %264 = tpu.matmul %263, %249, %cst_115 {dimension_numbers = #tpu.dot_dimension_numbers<[1], [0], [0], [1], [0, 0, 1, 1], [], []>} : vector<24x24xf32>, vector<24x8xf32>, vector<24x8xf32> -> vector<24x8xf32>
    %265 = vector.extract_strided_slice %228 {offsets = [0, 16], sizes = [24, 8], strides = [1, 1]} : vector<24x96xf32> to vector<24x8xf32>
    %266 = vector.extract_strided_slice %228 {offsets = [0, 48], sizes = [24, 8], strides = [1, 1]} : vector<24x96xf32> to vector<24x8xf32>
    %267 = vector.extract_strided_slice %228 {offsets = [0, 80], sizes = [24, 8], strides = [1, 1]} : vector<24x96xf32> to vector<24x8xf32>
    %cst_116 = arith.constant dense<0.000000e+00> : vector<24x24xf32>
    %268 = tpu.matmul %265, %266, %cst_116 {dimension_numbers = #tpu.dot_dimension_numbers<[1], [1], [0], [0], [0, 0, 1, 0], [], []>} : vector<24x8xf32>, vector<24x8xf32>, vector<24x24xf32> -> vector<24x24xf32>
    %cst_117 = arith.constant 0.353553385 : f32
    %269 = vector.broadcast %cst_117 : f32 to vector<24x24xf32>
    %270 = arith.mulf %268, %269 : vector<24x24xf32>
    %271 = arith.addf %270, %33 : vector<24x24xf32>
    %cst_118 = arith.constant dense<0xFF800000> : vector<24xf32>
    %272 = vector.multi_reduction <maximumf>, %271, %cst_118 [1] : vector<24x24xf32> to vector<24xf32>
    %273 = vector.shape_cast %272 : vector<24xf32> to vector<24x1xf32>
    %274 = vector.broadcast %273 : vector<24x1xf32> to vector<24x24xf32>
    %275 = arith.subf %271, %274 : vector<24x24xf32>
    %276 = math.exp %275 : vector<24x24xf32>
    %cst_119 = arith.constant dense<0.000000e+00> : vector<24xf32>
    %277 = vector.multi_reduction <add>, %276, %cst_119 [1] : vector<24x24xf32> to vector<24xf32>
    %278 = vector.shape_cast %277 : vector<24xf32> to vector<24x1xf32>
    %279 = tpu.reciprocal %278 {approx = true} : vector<24x1xf32> -> vector<24x1xf32>
    %280 = vector.broadcast %279 : vector<24x1xf32> to vector<24x24xf32>
    %281 = arith.mulf %276, %280 : vector<24x24xf32>
    %cst_120 = arith.constant dense<0.000000e+00> : vector<24x8xf32>
    %282 = tpu.matmul %281, %267, %cst_120 {dimension_numbers = #tpu.dot_dimension_numbers<[1], [0], [0], [1], [0, 0, 1, 1], [], []>} : vector<24x24xf32>, vector<24x8xf32>, vector<24x8xf32> -> vector<24x8xf32>
    %283 = vector.extract_strided_slice %228 {offsets = [0, 24], sizes = [24, 8], strides = [1, 1]} : vector<24x96xf32> to vector<24x8xf32>
    %284 = vector.extract_strided_slice %228 {offsets = [0, 56], sizes = [24, 8], strides = [1, 1]} : vector<24x96xf32> to vector<24x8xf32>
    %285 = vector.extract_strided_slice %228 {offsets = [0, 88], sizes = [24, 8], strides = [1, 1]} : vector<24x96xf32> to vector<24x8xf32>
    %cst_121 = arith.constant dense<0.000000e+00> : vector<24x24xf32>
    %286 = tpu.matmul %283, %284, %cst_121 {dimension_numbers = #tpu.dot_dimension_numbers<[1], [1], [0], [0], [0, 0, 1, 0], [], []>} : vector<24x8xf32>, vector<24x8xf32>, vector<24x24xf32> -> vector<24x24xf32>
    %cst_122 = arith.constant 0.353553385 : f32
    %287 = vector.broadcast %cst_122 : f32 to vector<24x24xf32>
    %288 = arith.mulf %286, %287 : vector<24x24xf32>
    %289 = arith.addf %288, %33 : vector<24x24xf32>
    %cst_123 = arith.constant dense<0xFF800000> : vector<24xf32>
    %290 = vector.multi_reduction <maximumf>, %289, %cst_123 [1] : vector<24x24xf32> to vector<24xf32>
    %291 = vector.shape_cast %290 : vector<24xf32> to vector<24x1xf32>
    %292 = vector.broadcast %291 : vector<24x1xf32> to vector<24x24xf32>
    %293 = arith.subf %289, %292 : vector<24x24xf32>
    %294 = math.exp %293 : vector<24x24xf32>
    %cst_124 = arith.constant dense<0.000000e+00> : vector<24xf32>
    %295 = vector.multi_reduction <add>, %294, %cst_124 [1] : vector<24x24xf32> to vector<24xf32>
    %296 = vector.shape_cast %295 : vector<24xf32> to vector<24x1xf32>
    %297 = tpu.reciprocal %296 {approx = true} : vector<24x1xf32> -> vector<24x1xf32>
    %298 = vector.broadcast %297 : vector<24x1xf32> to vector<24x24xf32>
    %299 = arith.mulf %294, %298 : vector<24x24xf32>
    %cst_125 = arith.constant dense<0.000000e+00> : vector<24x8xf32>
    %300 = tpu.matmul %299, %285, %cst_125 {dimension_numbers = #tpu.dot_dimension_numbers<[1], [0], [0], [1], [0, 0, 1, 1], [], []>} : vector<24x24xf32>, vector<24x8xf32>, vector<24x8xf32> -> vector<24x8xf32>
    %301 = tpu.concatenate %246, %264, %282, %300 in 1 : vector<24x8xf32>, vector<24x8xf32>, vector<24x8xf32>, vector<24x8xf32> -> vector<24x32xf32>
    %302 = arith.truncf %301 : vector<24x32xf32> to vector<24x32xbf16>
    %c1_126 = arith.constant 1 : index
    %c0_127 = arith.constant 0 : index
    %c0_128 = arith.constant 0 : index
    %303 = vector.load %arg10[%c1_126, %c0_127, %c0_128] : memref<2x32x32xbf16, #tpu.memory_space<vmem>>, vector<1x32x32xbf16>
    %304 = vector.shape_cast %303 : vector<1x32x32xbf16> to vector<32x32xbf16>
    %cst_129 = arith.constant dense<0.000000e+00> : vector<24x32xf32>
    %305 = tpu.matmul %302, %304, %cst_129 {dimension_numbers = #tpu.dot_dimension_numbers<[1], [0], [0], [1], [0, 0, 1, 1], [], []>} : vector<24x32xbf16>, vector<32x32xbf16>, vector<24x32xf32> -> vector<24x32xf32>
    %306 = arith.addf %196, %305 : vector<24x32xf32>
    %c1_130 = arith.constant 1 : index
    %c0_131 = arith.constant 0 : index
    %c0_132 = arith.constant 0 : index
    %307 = vector.load %arg11[%c1_130, %c0_131, %c0_132] : memref<2x1x32xf32, #tpu.memory_space<vmem>>, vector<1x1x32xf32>
    %308 = vector.shape_cast %307 : vector<1x1x32xf32> to vector<1x32xf32>
    %309 = vector.broadcast %308 : vector<1x32xf32> to vector<24x32xf32>
    %310 = arith.addf %306, %309 : vector<24x32xf32>
    %c1_133 = arith.constant 1 : index
    %c0_134 = arith.constant 0 : index
    %c0_135 = arith.constant 0 : index
    %311 = vector.load %arg12[%c1_133, %c0_134, %c0_135] : memref<2x1x32xf32, #tpu.memory_space<vmem>>, vector<1x1x32xf32>
    %312 = vector.shape_cast %311 : vector<1x1x32xf32> to vector<1x32xf32>
    %c1_136 = arith.constant 1 : index
    %c0_137 = arith.constant 0 : index
    %c0_138 = arith.constant 0 : index
    %313 = vector.load %arg13[%c1_136, %c0_137, %c0_138] : memref<2x1x32xf32, #tpu.memory_space<vmem>>, vector<1x1x32xf32>
    %314 = vector.shape_cast %313 : vector<1x1x32xf32> to vector<1x32xf32>
    %cst_139 = arith.constant dense<0.000000e+00> : vector<24xf32>
    %315 = vector.multi_reduction <add>, %310, %cst_139 [1] : vector<24x32xf32> to vector<24xf32>
    %316 = vector.shape_cast %315 : vector<24xf32> to vector<24x1xf32>
    %cst_140 = arith.constant 3.200000e+01 : f32
    %317 = vector.broadcast %cst_140 : f32 to vector<24x1xf32>
    %318 = arith.divf %316, %317 : vector<24x1xf32>
    %319 = vector.broadcast %318 : vector<24x1xf32> to vector<24x32xf32>
    %320 = arith.subf %310, %319 : vector<24x32xf32>
    %321 = arith.mulf %320, %320 : vector<24x32xf32>
    %cst_141 = arith.constant dense<0.000000e+00> : vector<24xf32>
    %322 = vector.multi_reduction <add>, %321, %cst_141 [1] : vector<24x32xf32> to vector<24xf32>
    %323 = vector.shape_cast %322 : vector<24xf32> to vector<24x1xf32>
    %cst_142 = arith.constant 3.200000e+01 : f32
    %324 = vector.broadcast %cst_142 : f32 to vector<24x1xf32>
    %325 = arith.divf %323, %324 : vector<24x1xf32>
    %cst_143 = arith.constant 9.99999974E-6 : f32
    %326 = vector.broadcast %cst_143 : f32 to vector<24x1xf32>
    %327 = arith.addf %325, %326 : vector<24x1xf32>
    %328 = math.rsqrt %327 : vector<24x1xf32>
    %329 = vector.broadcast %328 : vector<24x1xf32> to vector<24x32xf32>
    %330 = arith.mulf %320, %329 : vector<24x32xf32>
    %331 = vector.broadcast %312 : vector<1x32xf32> to vector<24x32xf32>
    %332 = arith.mulf %330, %331 : vector<24x32xf32>
    %333 = vector.broadcast %314 : vector<1x32xf32> to vector<24x32xf32>
    %334 = arith.addf %332, %333 : vector<24x32xf32>
    %335 = arith.truncf %334 : vector<24x32xf32> to vector<24x32xbf16>
    %c1_144 = arith.constant 1 : index
    %c0_145 = arith.constant 0 : index
    %c0_146 = arith.constant 0 : index
    %336 = vector.load %arg14[%c1_144, %c0_145, %c0_146] : memref<2x32x128xbf16, #tpu.memory_space<vmem>>, vector<1x32x128xbf16>
    %337 = vector.shape_cast %336 : vector<1x32x128xbf16> to vector<32x128xbf16>
    %cst_147 = arith.constant dense<0.000000e+00> : vector<24x128xf32>
    %338 = tpu.matmul %335, %337, %cst_147 {dimension_numbers = #tpu.dot_dimension_numbers<[1], [0], [0], [1], [0, 0, 1, 1], [], []>} : vector<24x32xbf16>, vector<32x128xbf16>, vector<24x128xf32> -> vector<24x128xf32>
    %c1_148 = arith.constant 1 : index
    %c0_149 = arith.constant 0 : index
    %c0_150 = arith.constant 0 : index
    %339 = vector.load %arg15[%c1_148, %c0_149, %c0_150] : memref<2x1x128xf32, #tpu.memory_space<vmem>>, vector<1x1x128xf32>
    %340 = vector.shape_cast %339 : vector<1x1x128xf32> to vector<1x128xf32>
    %341 = vector.broadcast %340 : vector<1x128xf32> to vector<24x128xf32>
    %342 = arith.addf %338, %341 : vector<24x128xf32>
    %cst_151 = arith.constant 1.702000e+00 : f32
    %343 = vector.broadcast %cst_151 : f32 to vector<24x128xf32>
    %344 = arith.mulf %343, %342 : vector<24x128xf32>
    %345 = arith.negf %344 : vector<24x128xf32>
    %346 = math.exp %345 : vector<24x128xf32>
    %cst_152 = arith.constant 1.000000e+00 : f32
    %347 = vector.broadcast %cst_152 : f32 to vector<24x128xf32>
    %348 = arith.addf %347, %346 : vector<24x128xf32>
    %349 = arith.divf %347, %348 : vector<24x128xf32>
    %350 = arith.mulf %342, %349 : vector<24x128xf32>
    %351 = arith.truncf %350 : vector<24x128xf32> to vector<24x128xbf16>
    %c1_153 = arith.constant 1 : index
    %c0_154 = arith.constant 0 : index
    %c0_155 = arith.constant 0 : index
    %352 = vector.load %arg16[%c1_153, %c0_154, %c0_155] : memref<2x128x32xbf16, #tpu.memory_space<vmem>>, vector<1x128x32xbf16>
    %353 = vector.shape_cast %352 : vector<1x128x32xbf16> to vector<128x32xbf16>
    %cst_156 = arith.constant dense<0.000000e+00> : vector<24x32xf32>
    %354 = tpu.matmul %351, %353, %cst_156 {dimension_numbers = #tpu.dot_dimension_numbers<[1], [0], [0], [1], [0, 0, 1, 1], [], []>} : vector<24x128xbf16>, vector<128x32xbf16>, vector<24x32xf32> -> vector<24x32xf32>
    %c1_157 = arith.constant 1 : index
    %c0_158 = arith.constant 0 : index
    %c0_159 = arith.constant 0 : index
    %355 = vector.load %arg17[%c1_157, %c0_158, %c0_159] : memref<2x1x32xf32, #tpu.memory_space<vmem>>, vector<1x1x32xf32>
    %356 = vector.shape_cast %355 : vector<1x1x32xf32> to vector<1x32xf32>
    %357 = vector.broadcast %356 : vector<1x32xf32> to vector<24x32xf32>
    %358 = arith.addf %354, %357 : vector<24x32xf32>
    %359 = arith.addf %310, %358 : vector<24x32xf32>
    %360 = vector.extract_strided_slice %359 {offsets = [0, 0], sizes = [1, 32], strides = [1, 1]} : vector<24x32xf32> to vector<1x32xf32>
    %c0_160 = arith.constant 0 : index
    %c0_161 = arith.constant 0 : index
    %361 = vector.load %arg18[%c0_160, %c0_161] : memref<1x32xf32, #tpu.memory_space<vmem>>, vector<1x32xf32>
    %c0_162 = arith.constant 0 : index
    %c0_163 = arith.constant 0 : index
    %362 = vector.load %arg19[%c0_162, %c0_163] : memref<1x32xf32, #tpu.memory_space<vmem>>, vector<1x32xf32>
    %cst_164 = arith.constant dense<0.000000e+00> : vector<1xf32>
    %363 = vector.multi_reduction <add>, %360, %cst_164 [1] : vector<1x32xf32> to vector<1xf32>
    %364 = vector.shape_cast %363 : vector<1xf32> to vector<1x1xf32>
    %cst_165 = arith.constant 3.200000e+01 : f32
    %365 = vector.broadcast %cst_165 : f32 to vector<1x1xf32>
    %366 = arith.divf %364, %365 : vector<1x1xf32>
    %367 = vector.broadcast %366 : vector<1x1xf32> to vector<1x32xf32>
    %368 = arith.subf %360, %367 : vector<1x32xf32>
    %369 = arith.mulf %368, %368 : vector<1x32xf32>
    %cst_166 = arith.constant dense<0.000000e+00> : vector<1xf32>
    %370 = vector.multi_reduction <add>, %369, %cst_166 [1] : vector<1x32xf32> to vector<1xf32>
    %371 = vector.shape_cast %370 : vector<1xf32> to vector<1x1xf32>
    %cst_167 = arith.constant 3.200000e+01 : f32
    %372 = vector.broadcast %cst_167 : f32 to vector<1x1xf32>
    %373 = arith.divf %371, %372 : vector<1x1xf32>
    %cst_168 = arith.constant 9.99999974E-6 : f32
    %374 = vector.broadcast %cst_168 : f32 to vector<1x1xf32>
    %375 = arith.addf %373, %374 : vector<1x1xf32>
    %376 = math.rsqrt %375 : vector<1x1xf32>
    %377 = vector.broadcast %376 : vector<1x1xf32> to vector<1x32xf32>
    %378 = arith.mulf %368, %377 : vector<1x32xf32>
    %379 = arith.mulf %378, %361 : vector<1x32xf32>
    %380 = arith.addf %379, %362 : vector<1x32xf32>
    %c0_169 = arith.constant 0 : index
    %c0_170 = arith.constant 0 : index
    %381 = vector.load %arg20[%c0_169, %c0_170] : memref<32x16xf32, #tpu.memory_space<vmem>>, vector<32x16xf32>
    %cst_171 = arith.constant dense<0.000000e+00> : vector<1x16xf32>
    %382 = tpu.matmul %380, %381, %cst_171 {dimension_numbers = #tpu.dot_dimension_numbers<[1], [0], [0], [1], [0, 0, 1, 1], [], []>} : vector<1x32xf32>, vector<32x16xf32>, vector<1x16xf32> -> vector<1x16xf32>
    %c0_172 = arith.constant 0 : index
    %c0_173 = arith.constant 0 : index
    %383 = vector.load %arg21[%c0_172, %c0_173] : memref<16x2xf32, #tpu.memory_space<vmem>>, vector<16x2xf32>
    %cst_174 = arith.constant dense<0.000000e+00> : vector<1x2xf32>
    %384 = tpu.matmul %382, %383, %cst_174 {dimension_numbers = #tpu.dot_dimension_numbers<[1], [0], [0], [1], [0, 0, 1, 1], [], []>} : vector<1x16xf32>, vector<16x2xf32>, vector<1x2xf32> -> vector<1x2xf32>
    %c0_175 = arith.constant 0 : index
    %c0_176 = arith.constant 0 : index
    %385 = vector.load %arg22[%c0_175, %c0_176] : memref<1x2xf32, #tpu.memory_space<vmem>>, vector<1x2xf32>
    %386 = arith.addf %384, %385 : vector<1x2xf32>
    %c0_177 = arith.constant 0 : index
    %c0_178 = arith.constant 0 : index
    %c0_179 = arith.constant 0 : index
    %387 = vector.load %arg23[%c0_177, %c0_178, %c0_179] : memref<1x1x2xf32, #tpu.memory_space<vmem>>, vector<1x1x2xf32>
    %388 = vector.shape_cast %387 : vector<1x1x2xf32> to vector<1x2xf32>
    %389 = vector.shape_cast %386 : vector<1x2xf32> to vector<1x1x2xf32>
    tpu.vector_store %arg23[%c0_177, %c0_178, %c0_179], %389 {strides = array<i32>} : memref<1x1x2xf32, #tpu.memory_space<vmem>>, vector<1x1x2xf32>,
    return
  }
  func.func @transform_0(%arg0: i32) -> (i32, i32, i32) {
    %c0_i32 = arith.constant 0 : i32
    %c0_i32_0 = arith.constant 0 : i32
    %c0_i32_1 = arith.constant 0 : i32
    return %arg0, %c0_i32, %c0_i32_0 : i32, i32, i32
  }
  func.func @transform_1(%arg0: i32) -> (i32, i32) {
    %c0_i32 = arith.constant 0 : i32
    %c0_i32_0 = arith.constant 0 : i32
    %c0_i32_1 = arith.constant 0 : i32
    return %c0_i32, %c0_i32_0 : i32, i32
  }
  func.func @transform_2(%arg0: i32) -> (i32, i32) {
    %c0_i32 = arith.constant 0 : i32
    %c0_i32_0 = arith.constant 0 : i32
    %c0_i32_1 = arith.constant 0 : i32
    return %c0_i32, %c0_i32_0 : i32, i32
  }
  func.func @transform_3(%arg0: i32) -> (i32, i32) {
    %c0_i32 = arith.constant 0 : i32
    %c0_i32_0 = arith.constant 0 : i32
    %c0_i32_1 = arith.constant 0 : i32
    return %c0_i32, %c0_i32_0 : i32, i32
  }
  func.func @transform_4(%arg0: i32) -> (i32, i32) {
    %c0_i32 = arith.constant 0 : i32
    %c0_i32_0 = arith.constant 0 : i32
    %c0_i32_1 = arith.constant 0 : i32
    return %c0_i32, %c0_i32_0 : i32, i32
  }
  func.func @transform_5(%arg0: i32) -> (i32, i32, i32) {
    %c0_i32 = arith.constant 0 : i32
    %c0_i32_0 = arith.constant 0 : i32
    %c0_i32_1 = arith.constant 0 : i32
    %c0_i32_2 = arith.constant 0 : i32
    return %c0_i32, %c0_i32_0, %c0_i32_1 : i32, i32, i32
  }
  func.func @transform_6(%arg0: i32) -> (i32, i32, i32) {
    %c0_i32 = arith.constant 0 : i32
    %c0_i32_0 = arith.constant 0 : i32
    %c0_i32_1 = arith.constant 0 : i32
    %c0_i32_2 = arith.constant 0 : i32
    return %c0_i32, %c0_i32_0, %c0_i32_1 : i32, i32, i32
  }
  func.func @transform_7(%arg0: i32) -> (i32, i32, i32) {
    %c0_i32 = arith.constant 0 : i32
    %c0_i32_0 = arith.constant 0 : i32
    %c0_i32_1 = arith.constant 0 : i32
    %c0_i32_2 = arith.constant 0 : i32
    return %c0_i32, %c0_i32_0, %c0_i32_1 : i32, i32, i32
  }
  func.func @transform_8(%arg0: i32) -> (i32, i32, i32) {
    %c0_i32 = arith.constant 0 : i32
    %c0_i32_0 = arith.constant 0 : i32
    %c0_i32_1 = arith.constant 0 : i32
    %c0_i32_2 = arith.constant 0 : i32
    return %c0_i32, %c0_i32_0, %c0_i32_1 : i32, i32, i32
  }
  func.func @transform_9(%arg0: i32) -> (i32, i32, i32) {
    %c0_i32 = arith.constant 0 : i32
    %c0_i32_0 = arith.constant 0 : i32
    %c0_i32_1 = arith.constant 0 : i32
    %c0_i32_2 = arith.constant 0 : i32
    return %c0_i32, %c0_i32_0, %c0_i32_1 : i32, i32, i32
  }
  func.func @transform_10(%arg0: i32) -> (i32, i32, i32) {
    %c0_i32 = arith.constant 0 : i32
    %c0_i32_0 = arith.constant 0 : i32
    %c0_i32_1 = arith.constant 0 : i32
    %c0_i32_2 = arith.constant 0 : i32
    return %c0_i32, %c0_i32_0, %c0_i32_1 : i32, i32, i32
  }
  func.func @transform_11(%arg0: i32) -> (i32, i32, i32) {
    %c0_i32 = arith.constant 0 : i32
    %c0_i32_0 = arith.constant 0 : i32
    %c0_i32_1 = arith.constant 0 : i32
    %c0_i32_2 = arith.constant 0 : i32
    return %c0_i32, %c0_i32_0, %c0_i32_1 : i32, i32, i32
  }
  func.func @transform_12(%arg0: i32) -> (i32, i32, i32) {
    %c0_i32 = arith.constant 0 : i32
    %c0_i32_0 = arith.constant 0 : i32
    %c0_i32_1 = arith.constant 0 : i32
    %c0_i32_2 = arith.constant 0 : i32
    return %c0_i32, %c0_i32_0, %c0_i32_1 : i32, i32, i32
  }
  func.func @transform_13(%arg0: i32) -> (i32, i32, i32) {
    %c0_i32 = arith.constant 0 : i32
    %c0_i32_0 = arith.constant 0 : i32
    %c0_i32_1 = arith.constant 0 : i32
    %c0_i32_2 = arith.constant 0 : i32
    return %c0_i32, %c0_i32_0, %c0_i32_1 : i32, i32, i32
  }
  func.func @transform_14(%arg0: i32) -> (i32, i32, i32) {
    %c0_i32 = arith.constant 0 : i32
    %c0_i32_0 = arith.constant 0 : i32
    %c0_i32_1 = arith.constant 0 : i32
    %c0_i32_2 = arith.constant 0 : i32
    return %c0_i32, %c0_i32_0, %c0_i32_1 : i32, i32, i32
  }
  func.func @transform_15(%arg0: i32) -> (i32, i32, i32) {
    %c0_i32 = arith.constant 0 : i32
    %c0_i32_0 = arith.constant 0 : i32
    %c0_i32_1 = arith.constant 0 : i32
    %c0_i32_2 = arith.constant 0 : i32
    return %c0_i32, %c0_i32_0, %c0_i32_1 : i32, i32, i32
  }
  func.func @transform_16(%arg0: i32) -> (i32, i32, i32) {
    %c0_i32 = arith.constant 0 : i32
    %c0_i32_0 = arith.constant 0 : i32
    %c0_i32_1 = arith.constant 0 : i32
    %c0_i32_2 = arith.constant 0 : i32
    return %c0_i32, %c0_i32_0, %c0_i32_1 : i32, i32, i32
  }
  func.func @transform_17(%arg0: i32) -> (i32, i32) {
    %c0_i32 = arith.constant 0 : i32
    %c0_i32_0 = arith.constant 0 : i32
    %c0_i32_1 = arith.constant 0 : i32
    return %c0_i32, %c0_i32_0 : i32, i32
  }
  func.func @transform_18(%arg0: i32) -> (i32, i32) {
    %c0_i32 = arith.constant 0 : i32
    %c0_i32_0 = arith.constant 0 : i32
    %c0_i32_1 = arith.constant 0 : i32
    return %c0_i32, %c0_i32_0 : i32, i32
  }
  func.func @transform_19(%arg0: i32) -> (i32, i32) {
    %c0_i32 = arith.constant 0 : i32
    %c0_i32_0 = arith.constant 0 : i32
    %c0_i32_1 = arith.constant 0 : i32
    return %c0_i32, %c0_i32_0 : i32, i32
  }
  func.func @transform_20(%arg0: i32) -> (i32, i32) {
    %c0_i32 = arith.constant 0 : i32
    %c0_i32_0 = arith.constant 0 : i32
    %c0_i32_1 = arith.constant 0 : i32
    return %c0_i32, %c0_i32_0 : i32, i32
  }
  func.func @transform_21(%arg0: i32) -> (i32, i32) {
    %c0_i32 = arith.constant 0 : i32
    %c0_i32_0 = arith.constant 0 : i32
    %c0_i32_1 = arith.constant 0 : i32
    return %c0_i32, %c0_i32_0 : i32, i32
  }
  func.func @transform_22(%arg0: i32) -> (i32, i32, i32) {
    %c0_i32 = arith.constant 0 : i32
    %c0_i32_0 = arith.constant 0 : i32
    %c0_i32_1 = arith.constant 0 : i32
    return %arg0, %c0_i32, %c0_i32_0 : i32, i32, i32
  }
}

</mosaic_0001>

<bundles_post_ra>
// kernel: vit_clip_img_forward.1
= control target key start
LH: loop header
LB: loop body
LE: loop exit
PB: predicated region body
PF: predicated region fallthrough
CT: control target
= control target key end

     0   :  { %s6480_s0 = inlined_call_operand.vmem [shape: f32[2,24,64], index: 0, kind: input, shape index: {}]   ;;  %s6481_s1 = inlined_call_operand.vmem [shape: f32[64,32], index: 1, kind: input, shape index: {}]   ;;  %s6482_s2 = inlined_call_operand.vmem [shape: f32[24,32], index: 2, kind: input, shape index: {}]   ;;  %s6483_s3 = inlined_call_operand.vmem [shape: f32[1,32], index: 3, kind: input, shape index: {}]   ;;  %s6484_s4 = inlined_call_operand.vmem [shape: f32[1,32], index: 4, kind: input, shape index: {}]   ;;  %s6485_s5 = inlined_call_operand.vmem [shape: f32[2,1,32], index: 5, kind: input, shape index: {}]   ;;  %s6486_s6 = inlined_call_operand.vmem [shape: f32[2,1,32], index: 6, kind: input, shape index: {}]   ;;  %s6487_s7 = inlined_call_operand.vmem [shape: bf16[2,32,96], index: 7, kind: input, shape index: {}]   ;;  %s6488_s8 = inlined_call_operand.vmem [shape: f32[2,1,96], index: 8, kind: input, shape index: {}]   ;;  %s6489_s9 = inlined_call_operand.vmem [shape: bf16[2,32,32], index: 9, kind: input, shape index: {}]   ;;  %s6490_s10 = inlined_call_operand.vmem [shape: f32[2,1,32], index: 10, kind: input, shape index: {}]   ;;  %s6491_s11 = inlined_call_operand.vmem [shape: f32[2,1,32], index: 11, kind: input, shape index: {}]   ;;  %s6492_s12 = inlined_call_operand.vmem [shape: f32[2,1,32], index: 12, kind: input, shape index: {}]   ;;  %s6493_s13 = inlined_call_operand.vmem [shape: bf16[2,32,128], index: 13, kind: input, shape index: {}]   ;;  %s6494_s14 = inlined_call_operand.vmem [shape: f32[2,1,128], index: 14, kind: input, shape index: {}]   ;;  %s6495_s15 = inlined_call_operand.vmem [shape: bf16[2,128,32], index: 15, kind: input, shape index: {}]   ;;  %s6496_s16 = inlined_call_operand.vmem [shape: f32[2,1,32], index: 16, kind: input, shape index: {}]   ;;  %s6497_s17 = inlined_call_operand.vmem [shape: f32[1,32], index: 17, kind: input, shape index: {}]   ;;  %s6498_s18 = inlined_call_operand.vmem [shape: f32[1,32], index: 18, kind: input, shape index: {}]   ;;  %s6499_s19 = inlined_call_operand.vmem [shape: f32[32,16], index: 19, kind: input, shape index: {}]   ;;  %s6500_s20 = inlined_call_operand.vmem [shape: f32[16,2], index: 20, kind: input, shape index: {}]   ;;  %s6501_s21 = inlined_call_operand.vmem [shape: f32[1,2], index: 21, kind: input, shape index: {}]   ;;  %s6502_s22 = inlined_call_operand.hbm [shape: f32[2,1,2], index: 22, kind: output, shape index: {}]  }
   0x1   :  { %6542 = sst [smem:[#allocation10_spill]] %s6480_s0 }
   0x2   :  { %6543 = sst [smem:[#allocation11_spill]] %s6481_s1 }
   0x3   :  { %6544 = sst [smem:[#allocation12_spill]] %s6482_s2 }
   0x4   :  { %6545 = sst [smem:[#allocation13_spill]] %s6483_s3 }
   0x5   :  { %6546 = sst [smem:[#allocation14_spill]] %s6484_s4 }
   0x6   :  { %6547 = sst [smem:[#allocation15_spill]] %s6485_s5 }
   0x7   :  { %6548 = sst [smem:[#allocation16_spill]] %s6486_s6 }
   0x8   :  { %6549 = sst [smem:[#allocation17_spill]] %s6487_s7 }
   0x9   :  { %6550 = sst [smem:[#allocation18_spill]] %s6488_s8 }
   0xa   :  { %27 = vsyncpa [#allocation3], 0 }
   0xb   :  { %29 = vsyncpa [#allocation3 + $0x1], 0  ;;  %s5471_s3 = smov 0   ;;  %s5473_s28 = smov 0  }
   0xc   :  { %s5475_s29 = smov 0   ;;  %s5477_s30 = smov 0  }
   0xd LB: > { %6551 = sst [smem:[#allocation5_spill]] %s5323_s3  ;;  %s5492_s4 = sadd.s32 4294967295, %s5335_s30   ;;  %s5335_s30 = sphi %s5477_s30, %s6585_s30   ;;  %s5331_s29 = sphi %s5475_s29, %s6587_s29   ;;  %s5327_s28 = sphi %s5473_s28, %s6589_s28   ;;  %s5323_s3 = sphi %s5471_s3, %s6588_s3  }
   0xe   : > { %6552 = sst [smem:[#allocation6_spill]] %s5331_s29  ;;  %s4133_s0 = sadd.s32 4294967294, %s5335_s30  }
   0xf   : > { %s5496_s23 = sadd.s32 1, %s5335_s30   ;;  %s509_s1 = sadd.s32 1, %s5331_s29 }
  0x10   : > { %6553 = sst [smem:[#allocation7_spill]] %s5496_s23  ;;  %s506_s5 = ssub.s32 %s5335_s30, %s5496_s23 }
  0x11   : > { %p519_p0 = scmp.ne.s32.totalorder %s5331_s29, %s5327_s28  ;;  %p507_p1 = scmp.eq.s32.totalorder %s506_s5, 0 }
  0x12   : > { %p520_p2 = scmp.eq.s32.totalorder %s5492_s4, 1  ;;  %p525_p3 = scmp.ne.s32.totalorder %s5327_s28, %s5323_s3 }
  0x13   : > { %p526_p4 = scmp.eq.s32.totalorder %s4133_s0, 1  ;;  %p4136_p7 = scmp.ge.s32.totalorder %s5335_s30, 1 }
  0x14   : > { %s5507_s24 = scalar_select %p507_p1, %s5331_s29, %s509_s1  }
  0x15   : > { %p5509_p5 = por %p520_p2, %p519_p0  ;;  %p5513_p6 = por %p526_p4, %p525_p3 }
  0x16   : > { %6554 = sst [smem:[#allocation8_spill]] %s5507_s24  ;;  %p615_p8 = scmp.lt.s32.totalorder %s5335_s30, 3 }
  0x17   : > { %s6556_s25 = scalar_select %p5513_p6, 1, 0 }
  0x18   : > { %p616_p9 = pnand %p4136_p7, %p615_p8 }
  0x19   : > { %6557 = sst [smem:[#allocation9_spill]] %s6556_s25  ;;  %s6558_s27 = sld [smem:[#allocation11_spill]] (!%p616_p9)  ;;  %v5337_v3 = vmov (!%p616_p9), 0.0|0.0   ;;  %vm5338_vm0 = vmmov (!%p616_p9), 0   ;;  %v5339_v6 = vmov (!%p616_p9), 0.0   ;;  %vm696_vm1 = vcmask (!%p616_p9), 523264  }
  0x1a   : > { %619 = sbr.rel (%p616_p9) target bundleno = 6588 (0x19bc), region = 108  ;;  %4848 = vmatprep.subr.bf16.mxu0 (!%p616_p9), %v5337_v3  ;;  %4493 = vmatprep.mubr.msk.f32.mxu0 (!%p616_p9), %vm5338_vm0, %v5339_v6  ;;  %p676_p10 = scmp.lt.s32.totalorder (!%p616_p9), %s5492_s4, 1  ;;  %vm788_vm2 = vcmask (!%p616_p9), 261120   ;;  %vm998_vm3 = vcmask (!%p616_p9), 64512   ;;  %vm1097_vm6 = vcmask (!%p616_p9), 195584   ;;  %vm1991_vm7 = vcmask (!%p616_p9), 130048  }
  0x1b   : > { %4860 = vmatprep.subr.bf16.mxu1 (!%p616_p9), %v5337_v3  ;;  %4516 = vmatprep.mubr.msk.f32.mxu1 (!%p616_p9), %vm5338_vm0, %v5339_v6  ;;  %s6559_s29 = sld [smem:[#allocation10_spill]] (!%p616_p9)  ;;  %s6562_s1 = sld [smem:[#allocation14_spill]] (!%p616_p9)  ;;  %vm5654_vm4 = vmpackc.low (!%p616_p9), %vm998_vm3, %vm998_vm3  ;;  %vm3894_vm8 = vcmask (!%p616_p9), 253952   ;;  %vm4063_vm9 = vcmask (!%p616_p9), 8192  }
  0x1c   : > { %s6563_s7 = sld [smem:[#allocation17_spill]] (!%p616_p9)  ;;  %s6565_s5 = sld [smem:[#allocation16_spill]] (!%p616_p9) }
  0x1d   : > { %s6566_s8 = sld [smem:[#allocation18_spill]] (!%p616_p9)  ;;  %s6538_s2 = smov (!%p616_p9), 96  }
  0x1e   : > { %s6526_s24 = smov (!%p616_p9), 88   ;;  %s6528_s25 = smov (!%p616_p9), 120  }
  0x1f   : > { %v685_v0 = vld [vmem:[%s6558_s27] sm:$0xff] (!%p616_p9)  ;;  %v686_v1 = vld [vmem:[%s6558_s27 + $0x8] sm:$0xff] (!%p616_p9)  ;;  %v687_v2 = vld [vmem:[%s6558_s27 + $0x10] sm:$0xff] (!%p616_p9)  ;;  %s6514_s26 = smov (!%p616_p9), 104  }
  0x20   : > { %v4849_v4 = vpack.c.bf16 (!%p616_p9), %v686_v1, %v685_v0  ;;  %v688_v5 = vld [vmem:[%s6558_s27 + $0x18] sm:$0xff] (!%p616_p9)  ;;  %v689_v7 = vld [vmem:[%s6558_s27 + $0x20] sm:$0xff] (!%p616_p9)  ;;  %v690_v9 = vld [vmem:[%s6558_s27 + $0x28] sm:$0xff] (!%p616_p9) }
  0x21   : > { %v4852_v8 = vpack.c.bf16 %v688_v5, %v687_v2  ;;  %s677_s23 = scalar_select %p676_p10, %s5492_s4, 1  ;;  %v4855_v10 = vpack.c.bf16 %v690_v9, %v689_v7  ;;  %v691_v11 = vld [vmem:[%s6558_s27 + $0x30] sm:$0xff]  ;;  %v692_v12 = vld [vmem:[%s6558_s27 + $0x38] sm:$0xff]  ;;  %v4142_v59 = vld [vmem:[%s6562_s1] ss:$0 sm:$0xff] }
  0x22   : > { %4850 = vmatpush3.bf16.msra.mxu0 %v4849_v4  ;;  %v4858_v13 = vpack.c.bf16 %v692_v12, %v691_v11  ;;  %s6512_s1 = smov 72  }
  0x23   : > { %4851 = vmatprep.subr.bf16.mxu0 %v5337_v3  ;;  %s4925_s0 = smul.u32 24, %s677_s23  ;;  %s6564_s23 = sld [smem:[#allocation15_spill]] }
  0x25   : > { %s680_s3 = scalar_lea.vmem %s6559_s29, %s4925_s0  ;;  %s6560_s0 = sld [smem:[#allocation12_spill]] }
  0x26   : > { %4853 = vmatpush3.bf16.msra.mxu0 %v4852_v8  ;;  %v682_v14 = vld [vmem:[%s680_s3] sm:$0xff]  ;;  %v683_v15 = vld [vmem:[%s680_s3 + $0x8] sm:$0xff]  ;;  %v684_v16 = vld [vmem:[%s680_s3 + $0x10] sm:$0xff]  ;;  %s6561_s29 = sld [smem:[#allocation13_spill]]  ;;  %s6524_s3 = smov 112  }
  0x27   : > { %4854 = vmatprep.subr.bf16.mxu0 %v5337_v3 }
  0x2a   : > { %4856 = vmatpush3.bf16.msra.mxu0 %v4855_v10 }
  0x2b   : > { %4857 = vmatprep.subr.bf16.mxu0 %v5337_v3  ;;  %v693_v17 = vld [vmem:[%s6560_s0] sm:$0xff]  ;;  %v694_v21 = vld [vmem:[%s6560_s0 + $0x8] sm:$0xff]  ;;  %v695_v26 = vld [vmem:[%s6560_s0 + $0x10] sm:$0xff]  ;;  %s6569_s0 = smov 96  }
  0x2c   : > { %v4141_v57 = vld [vmem:[%s6561_s29] ss:$0 sm:$0xff]  ;;  %s6530_s29 = smov 80  }
  0x2e   : > { %4859 = vmatpush3.bf16.msra.mxu0 %v4858_v13 }
  0x31   : > { %4494 = vmatmul.mubr.msk.f32.vlgmr.msra.gmra.mrb[0].mxu0 %vm696_vm1, %v682_v14 }
  0x32   : > { %4496 = vmatprep.mubr.msk.f32.mxu0 %vm5338_vm0, %v5339_v6 }
  0x35   : > { %4497 = vmatmul.mubr.msk.f32.gmra.mrb[2].mxu0 %vm696_vm1, %v683_v15 }
  0x36   : > { %4499 = vmatprep.mubr.msk.f32.mxu0 %vm5338_vm0, %v5339_v6 }
  0x39   : > { %4500 = vmatmul.mubr.msk.f32.gmra.mrb[4].mxu0 %vm696_vm1, %v684_v16 }
 0x104   : > { %v772_v18 = vpop.f32.mrb[0].mxu0 }
 0x105   : > { %v773_v19 = vadd.f32 %v772_v18, %v693_v17  ;;  %v4495_v20 = vpop.f32.mrb[1].mxu0 }
 0x107   : > { %v789_v22 = vsel %vm788_vm2, %v773_v19, 0.0 }
 0x108   : > { %790 = vadd.xlane.f32.xlu0 %v789_v22  ;;  %v777_v23 = vpop.f32.mrb[2].mxu0 }
 0x109   : > { %v778_v24 = vadd.f32 %v777_v23, %v694_v21  ;;  %v4498_v25 = vpop.f32.mrb[3].mxu0 }
 0x10b   : > { %v792_v27 = vsel %vm788_vm2, %v778_v24, 0.0 }
 0x10c   : > { %793 = vadd.xlane.f32.xlu0 %v792_v27  ;;  %v782_v28 = vpop.f32.mrb[4].mxu0  ;;  %v5094_v27 = vld [vmem:[%s6563_s7 + $0x8] sm:$0xff]  }
 0x10d   : > { %v783_v29 = vadd.f32 %v782_v28, %v695_v26  ;;  %v4501_v30 = vpop.f32.mrb[5].mxu0  ;;  %v5093_v26 = vld [vmem:[%s6563_s7] sm:$0xff]  }
 0x10e   : > { %4502 = vmatprep.subr.bf16.mxu0 %v5093_v26 }
 0x10f   : > { %v795_v31 = vsel %vm788_vm2, %v783_v29, 0.0  ;;  %4503 = vmatpush3.bf16.msra.mxu0 %v5093_v26 }
 0x110   : > { %796 = vadd.xlane.f32.xlu1 %v795_v31  ;;  %4504 = vmatprep.subr.bf16.mxu0 %v5094_v27 }
 0x113   : > { %4505 = vmatpush3.bf16.msra.mxu0 %v5094_v27 }
 0x114   : > { %4864 = vmatprep.subr.bf16.mxu0 %v5337_v3 }
 0x195   : > { %v791_v32 = vpop.xlane.xlu0 %790 }
 0x196   : > { %v799_v33 = vmul.f32 0.03125, %v791_v32 }
 0x198   : > { %v802_v34 = vsub.f32 %v773_v19, %v799_v33 }
 0x199   : > { %v794_v35 = vpop.xlane.xlu0 %793 }
 0x19a   : > { %v800_v36 = vmul.f32 0.03125, %v794_v35  ;;  %v805_v37 = vmul.f32 %v802_v34, %v802_v34 }
 0x19c   : > { %v803_v38 = vsub.f32 %v778_v24, %v800_v36  ;;  %v808_v39 = vsel %vm788_vm2, %v805_v37, 0.0 }
 0x19d   : > { %809 = vadd.xlane.f32.xlu1 %v808_v39  ;;  %v797_v40 = vpop.xlane.xlu1 %796  ;;  %v4143_v39 = vld [vmem:[%s6564_s23] ss:$0 sm:$0xff] }
 0x19e   : > { %v801_v41 = vmul.f32 0.03125, %v797_v40  ;;  %v806_v42 = vmul.f32 %v803_v38, %v803_v38 }
 0x1a0   : > { %v804_v43 = vsub.f32 %v783_v29, %v801_v41  ;;  %v811_v44 = vsel %vm788_vm2, %v806_v42, 0.0 }
 0x1a1   : > { %812 = vadd.xlane.f32.xlu0 %v811_v44 }
 0x1a2   : > { %v807_v45 = vmul.f32 %v804_v43, %v804_v43 }
 0x1a4   : > { %v814_v46 = vsel %vm788_vm2, %v807_v45, 0.0 }
 0x1a5   : > { %815 = vadd.xlane.f32.xlu1 %v814_v46 }
 0x22a   : > { %v810_v47 = vpop.xlane.xlu1 %809 }
 0x22b   : > { %v817_v48 = vmul.f32 0.03125, %v810_v47 }
 0x22d   : > { %v820_v49 = vadd.f32 1e-05, %v817_v48 }
 0x22e   : > { %v813_v50 = vpop.xlane.xlu0 %812 }
 0x22f   : > { %5121 = vrsqrt.f32 %v820_v49  ;;  %v818_v51 = vmul.f32 0.03125, %v813_v50 }
 0x231   : > { %v821_v52 = vadd.f32 1e-05, %v818_v51 }
 0x232   : > { %v816_v53 = vpop.xlane.xlu1 %815 }
 0x233   : > { %5123 = vrsqrt.f32 %v821_v52  ;;  %v819_v54 = vmul.f32 0.03125, %v816_v53  ;;  %v4145_v53 = vld [vmem:[%s6566_s8] ss:$0 sm:$0xff] }
 0x235   : > { %v822_v55 = vadd.f32 1e-05, %v819_v54 }
 0x237   : > { %5125 = vrsqrt.f32 %v822_v55 }
 0x239   : > { %v5122_v56 = vpop.eup %5121 }
 0x23a   : > { %v826_v58 = vmul.f32 %v5122_v56, %v802_v34 }
 0x23c   : > { %v835_v60 = vmul.f32 %v4141_v57, %v826_v58 }
 0x23d   : > { %v5124_v61 = vpop.eup %5123 }
 0x23e   : > { %v5582_v62 = vadd.f32 %v4142_v59, %v835_v60  ;;  %v827_v63 = vmul.f32 %v5124_v61, %v803_v38 }
 0x240   : > { %v853_v0 = vsel %vm788_vm2, %v5582_v62, 0.0  ;;  %v836_v1 = vmul.f32 %v4141_v57, %v827_v63 }
 0x241   : > { %v5126_v2 = vpop.eup %5125  ;;  %854 = vadd.xlane.f32.xlu0 %v853_v0 }
 0x242   : > { %v5586_v4 = vadd.f32 %v4142_v59, %v836_v1  ;;  %v828_v5 = vmul.f32 %v5126_v2, %v804_v43  ;;  %v4144_v43 = vld [vmem:[%s6565_s5] ss:$0 sm:$0xff] }
 0x244   : > { %v856_v7 = vsel %vm788_vm2, %v5586_v4, 0.0  ;;  %v837_v8 = vmul.f32 %v4141_v57, %v828_v5 }
 0x245   : > { %857 = vadd.xlane.f32.xlu1 %v856_v7 }
 0x246   : > { %v5590_v9 = vadd.f32 %v4142_v59, %v837_v8 }
 0x248   : > { %v859_v10 = vsel %vm788_vm2, %v5590_v9, 0.0 }
 0x249   : > { %860 = vadd.xlane.f32.xlu0 %v859_v10 }
 0x2ce   : > { %v855_v11 = vpop.xlane.xlu0 %854 }
 0x2cf   : > { %v862_v12 = vmul.f32 0.03125, %v855_v11 }
 0x2d1   : > { %v865_v13 = vsub.f32 %v5582_v62, %v862_v12 }
 0x2d2   : > { %v858_v14 = vpop.xlane.xlu1 %857 }
 0x2d3   : > { %v863_v15 = vmul.f32 0.03125, %v858_v14  ;;  %v868_v16 = vmul.f32 %v865_v13, %v865_v13 }
 0x2d5   : > { %v866_v17 = vsub.f32 %v5586_v4, %v863_v15  ;;  %v871_v18 = vsel %vm788_vm2, %v868_v16, 0.0 }
 0x2d6   : > { %872 = vadd.xlane.f32.xlu1 %v871_v18  ;;  %v861_v19 = vpop.xlane.xlu0 %860 }
 0x2d7   : > { %v864_v20 = vmul.f32 0.03125, %v861_v19  ;;  %v869_v21 = vmul.f32 %v866_v17, %v866_v17 }
 0x2d9   : > { %v867_v22 = vsub.f32 %v5590_v9, %v864_v20  ;;  %v874_v23 = vsel %vm788_vm2, %v869_v21, 0.0 }
 0x2da   : > { %875 = vadd.xlane.f32.xlu0 %v874_v23 }
 0x2db   : > { %v870_v24 = vmul.f32 %v867_v22, %v867_v22 }
 0x2dd   : > { %v877_v25 = vsel %vm788_vm2, %v870_v24, 0.0 }
 0x2de   : > { %878 = vadd.xlane.f32.xlu1 %v877_v25 }
 0x363   : > { %v873_v28 = vpop.xlane.xlu1 %872 }
 0x364   : > { %v880_v29 = vmul.f32 0.03125, %v873_v28 }
 0x366   : > { %v883_v30 = vadd.f32 1e-05, %v880_v29 }
 0x367   : > { %v876_v31 = vpop.xlane.xlu0 %875 }
 0x368   : > { %5127 = vrsqrt.f32 %v883_v30  ;;  %v881_v32 = vmul.f32 0.03125, %v876_v31 }
 0x36a   : > { %v884_v33 = vadd.f32 1e-05, %v881_v32 }
 0x36b   : > { %v879_v34 = vpop.xlane.xlu1 %878 }
 0x36c   : > { %5129 = vrsqrt.f32 %v884_v33  ;;  %v882_v35 = vmul.f32 0.03125, %v879_v34  ;;  %v847_v33 = vlaneseq }
 0x36e   : > { %v885_v36 = vadd.f32 1e-05, %v882_v35  ;;  %v848_v34 = vand.u32 127, %v847_v33 }
 0x370   : > { %5131 = vrsqrt.f32 %v885_v36  ;;  %vm849_vm5 = vcmp.lt.s32.totalorder %v848_v34, 17  ;;  %v5347_v36 = vmov -1e+30  }
 0x372   : > { %v5128_v37 = vpop.eup %5127 }
 0x373   : > { %v889_v38 = vmul.f32 %v5128_v37, %v865_v13  ;;  %v5712_v37 = vsel %vm849_vm5, 0.0, %v5347_v36 }
 0x375   : > { %v898_v42 = vmul.f32 %v4143_v39, %v889_v38 }
 0x376   : > { %v5130_v40 = vpop.eup %5129 }
 0x377   : > { %v890_v41 = vmul.f32 %v5130_v40, %v866_v17  ;;  %v907_v47 = vadd.f32 %v4144_v43, %v898_v42 }
 0x379   : > { %v899_v44 = vmul.f32 %v4143_v39, %v890_v41 }
 0x37a   : > { %v5132_v45 = vpop.eup %5131 }
 0x37b   : > { %v891_v46 = vmul.f32 %v5132_v45, %v867_v22  ;;  %v908_v48 = vadd.f32 %v4144_v43, %v899_v44 }
 0x37d   : > { %v900_v49 = vmul.f32 %v4143_v39, %v891_v46  ;;  %v910_v50 = vpack.c.bf16 %v908_v48, %v907_v47 }
 0x37f   : > { %v909_v51 = vadd.f32 %v4144_v43, %v900_v49  ;;  %4506 = vmatprep.mubr.msk.bf16.mxu0 %vm788_vm2, %v910_v50 }
 0x381   : > { %v911_v52 = vpack.c.bf16 %v909_v51, %v909_v51 }
 0x383   : > { %4507 = vmatmul.mubr.msk.bf16.vlgmr.msra.gmra.mrb[8].mxu0 %vm788_vm2, %v911_v52 }
 0x384   : > { %4531 = vmatprep.mubr.msk.f32.mxu0 %vm5338_vm0, %v5339_v6 }
 0x456   : > { %v4508_v54 = vpop.f32.mrb[8].mxu0 }
 0x457   : > { %v5620_v55 = vadd.f32 %v4508_v54, %v4145_v53  ;;  %v975_v56 = vpop.f32.mrb[9].mxu0 }
 0x458   : > { %v4509_v57 = vpop.f32.mrb[10].mxu0  ;;  %v976_v59 = vadd.f32 %v4145_v53, %v975_v56 }
 0x459   : > { %996 = vrot.lane.b32.xlu1 %v5620_v55, %s6538_s2  ;;  %v978_v58 = vpop.f32.mrb[11].mxu0 }
 0x45a   : > { %v979_v60 = vadd.f32 %v4145_v53, %v978_v58 }
 0x45c   : > { %v5624_v61 = vpack.i.bf16 %v979_v60, %v976_v59 }
 0x45e   : > { %4989 = vrot.lane.b32.xlu1 %v5624_v61, %s6526_s24  ;;  %4984 = vrot.lane.b32.xlu0 %v5624_v61, %s6538_s2  ;;  %s6570_s2 = smov 80  }
 0x462   : > { %1239 = vrot.lane.b32.xlu1 %v5620_v55, %s6526_s24  ;;  %4994 = vrot.lane.b32.xlu0 %v5624_v61, %s6530_s29  ;;  %s6534_s24 = smov 16  }
 0x466   : > { %1229 = vrot.lane.b32.xlu1 %v976_v59, %s6528_s25  ;;  %1231 = vrot.lane.b32.xlu0 %v979_v60, %s6528_s25 }
 0x46a   : > { %1233 = vrot.lane.b32.xlu1 %v5620_v55, %s6528_s25  ;;  %1480 = vrot.lane.b32.xlu0 %v5620_v55, %s6530_s29  ;;  %s6574_s29 = smov 104   ;;  %s6576_s25 = smov 64  }
 0x46e   : > { %4999 = vrot.lane.b32.xlu1 %v5624_v61, %s6512_s1  ;;  %1470 = vrot.lane.b32.xlu0 %v976_v59, %s6524_s3 }
 0x472   : > { %1472 = vrot.lane.b32.xlu1 %v979_v60, %s6524_s3  ;;  %1474 = vrot.lane.b32.xlu0 %v5620_v55, %s6524_s3  ;;  %s6572_s3 = smov 88  }
 0x476   : > { %1721 = vrot.lane.b32.xlu1 %v5620_v55, %s6512_s1  ;;  %1711 = vrot.lane.b32.xlu0 %v976_v59, %s6514_s26  ;;  %s6516_s1 = smov 64  }
 0x47a   : > { %1713 = vrot.lane.b32.xlu1 %v979_v60, %s6514_s26  ;;  %1715 = vrot.lane.b32.xlu0 %v5620_v55, %s6514_s26  ;;  %s6518_s26 = smov 56  }
 0x4cb   : > { %v997_v2 = vpop.permute.xlu1 %996 }
 0x4d0   : > { %v4985_v63 = vpop.permute.xlu0 %4984  ;;  %v4990_v8 = vpop.permute.xlu1 %4989 }
 0x4d1   : > { %v4987_v0 = vunpack.i.h.bf16 %v4985_v63  ;;  %v4986_v1 = vunpack.i.l.bf16 %v4985_v63  ;;  %v4992_v10 = vunpack.i.h.bf16 %v4990_v8  ;;  %v4991_v11 = vunpack.i.l.bf16 %v4990_v8 }
 0x4d3   : > { %v4861_v7 = vpack.c.bf16 %v4987_v0, %v4986_v1  ;;  %v4868_v13 = vpack.c.bf16 %v4992_v10, %v4991_v11 }
 0x4d4   : > { %v1240_v12 = vpop.permute.xlu1 %1239  ;;  %v4995_v14 = vpop.permute.xlu0 %4994 }
 0x4d5   : > { %4863 = vmatpush3.bf16.xpose.msk.msra.mxu1 %vm5654_vm4, %v4861_v7  ;;  %v4997_v16 = vunpack.i.h.bf16 %v4995_v14  ;;  %v4996_v17 = vunpack.i.l.bf16 %v4995_v14 }
 0x4d6   : > { %4514 = vmatprep.subr.mxu1 %v5339_v6 }
 0x4d7   : > { %v4875_v19 = vpack.c.bf16 %v4997_v16, %v4996_v17 }
 0x4d8   : > { %v1230_v15 = vpop.permute.xlu1 %1229  ;;  %v1232_v20 = vpop.permute.xlu0 %1231 }
 0x4dc   : > { %v1234_v18 = vpop.permute.xlu1 %1233  ;;  %v1481_v22 = vpop.permute.xlu0 %1480 }
 0x4dd   : > { %4515 = vmatpush3.xpose.msk.msra.mxu1 %vm998_vm3, %v997_v2 }
 0x4de   : > { %4867 = vmatprep.subr.bf16.mxu1 %v5337_v3 }
 0x4e0   : > { %4517 = vmatmul.mubr.msk.f32.vlgmr.msra.gmra.mrb[0].mxu1 %vm998_vm3, %v976_v59  ;;  %v5000_v21 = vpop.permute.xlu1 %4999  ;;  %v1471_v26 = vpop.permute.xlu0 %1470 }
 0x4e1   : > { %4870 = vmatpush3.bf16.xpose.msk.msra.mxu1 %vm5654_vm4, %v4868_v13  ;;  %4519 = vmatprep.mubr.msk.f32.mxu1 %vm5338_vm0, %v5339_v6  ;;  %v5002_v23 = vunpack.i.h.bf16 %v5000_v21  ;;  %v5001_v24 = vunpack.i.l.bf16 %v5000_v21 }
 0x4e2   : > { %4544 = vmatprep.subr.mxu1 %v5339_v6 }
 0x4e3   : > { %v4882_v25 = vpack.c.bf16 %v5002_v23, %v5001_v24 }
 0x4e4   : > { %4520 = vmatmul.mubr.msk.f32.gmra.mrb[2].mxu1 %vm998_vm3, %v979_v60  ;;  %v1473_v27 = vpop.permute.xlu1 %1472  ;;  %v1475_v28 = vpop.permute.xlu0 %1474 }
 0x4e5   : > { %4522 = vmatprep.mubr.msk.f32.mxu1 %vm5338_vm0, %v5339_v6 }
 0x4e8   : > { %4523 = vmatmul.mubr.msk.f32.gmra.mrb[4].mxu1 %vm998_vm3, %v5620_v55  ;;  %v1722_v29 = vpop.permute.xlu1 %1721  ;;  %v1712_v30 = vpop.permute.xlu0 %1711 }
 0x4e9   : > { %4545 = vmatpush3.xpose.msk.msra.mxu1 %vm998_vm3, %v1240_v12  ;;  %4546 = vmatprep.mubr.msk.f32.mxu1 %vm5338_vm0, %v5339_v6 }
 0x4ea   : > { %4874 = vmatprep.subr.bf16.mxu1 %v5337_v3 }
 0x4ec   : > { %4547 = vmatmul.mubr.msk.f32.vlgmr.msra.gmra.mrb[6].mxu1 %vm998_vm3, %v1230_v15  ;;  %v1714_v31 = vpop.permute.xlu1 %1713  ;;  %v1716_v32 = vpop.permute.xlu0 %1715 }
 0x4ed   : > { %4877 = vmatpush3.bf16.xpose.msk.msra.mxu1 %vm5654_vm4, %v4875_v19  ;;  %4549 = vmatprep.mubr.msk.f32.mxu1 %vm5338_vm0, %v5339_v6 }
 0x4ee   : > { %4574 = vmatprep.subr.mxu1 %v5339_v6 }
 0x4f0   : > { %4550 = vmatmul.mubr.msk.f32.gmra.mrb[8].mxu1 %vm998_vm3, %v1232_v20 }
 0x4f1   : > { %4552 = vmatprep.mubr.msk.f32.mxu1 %vm5338_vm0, %v5339_v6 }
 0x4f4   : > { %4553 = vmatmul.mubr.msk.f32.gmra.mrb[10].mxu1 %vm998_vm3, %v1234_v18 }
 0x4f5   : > { %4575 = vmatpush3.xpose.msk.msra.mxu1 %vm998_vm3, %v1481_v22  ;;  %4576 = vmatprep.mubr.msk.f32.mxu1 %vm5338_vm0, %v5339_v6 }
 0x4f6   : > { %4881 = vmatprep.subr.bf16.mxu1 %v5337_v3 }
 0x4f8   : > { %4577 = vmatmul.mubr.msk.f32.vlgmr.msra.gmra.mrb[12].mxu1 %vm998_vm3, %v1471_v26 }
 0x4f9   : > { %4884 = vmatpush3.bf16.xpose.msk.msra.mxu1 %vm5654_vm4, %v4882_v25  ;;  %4579 = vmatprep.mubr.msk.f32.mxu1 %vm5338_vm0, %v5339_v6 }
 0x4fa   : > { %4604 = vmatprep.subr.mxu1 %v5339_v6 }
 0x4fc   : > { %4580 = vmatmul.mubr.msk.f32.gmra.mrb[14].mxu1 %vm998_vm3, %v1473_v27 }
 0x4fd   : > { %4582 = vmatprep.mubr.msk.f32.mxu1 %vm5338_vm0, %v5339_v6 }
 0x500   : > { %4583 = vmatmul.mubr.msk.f32.gmra.mrb[16].mxu1 %vm998_vm3, %v1475_v28 }
 0x501   : > { %4605 = vmatpush3.xpose.msk.msra.mxu1 %vm998_vm3, %v1722_v29  ;;  %4606 = vmatprep.mubr.msk.f32.mxu1 %vm5338_vm0, %v5339_v6 }
 0x504   : > { %4607 = vmatmul.mubr.msk.f32.vlgmr.msra.gmra.mrb[18].mxu1 %vm998_vm3, %v1712_v30 }
 0x505   : > { %4609 = vmatprep.mubr.msk.f32.mxu1 %vm5338_vm0, %v5339_v6 }
 0x508   : > { %4610 = vmatmul.mubr.msk.f32.gmra.mrb[20].mxu1 %vm998_vm3, %v1714_v31 }
 0x509   : > { %4612 = vmatprep.mubr.msk.f32.mxu1 %vm5338_vm0, %v5339_v6 }
 0x50c   : > { %4613 = vmatmul.mubr.msk.f32.gmra.mrb[22].mxu1 %vm998_vm3, %v1716_v32 }
 0x5b3   : > { %v1077_v35 = vpop.f32.mrb[0].mxu1 }
 0x5b4   : > { %v1091_v38 = vmul.f32 0.35355338, %v1077_v35  ;;  %v4518_v39 = vpop.f32.mrb[1].mxu1 }
 0x5b6   : > { %v5715_v40 = vadd.f32 %v1091_v38, %v5712_v37 }
 0x5b7   : > { %v1082_v41 = vpop.f32.mrb[2].mxu1 }
 0x5b8   : > { %v1092_v42 = vmul.f32 0.35355338, %v1082_v41  ;;  %v4521_v43 = vpop.f32.mrb[3].mxu1  ;;  %v1098_v44 = vsel %vm1097_vm6, %v5715_v40, -inf }
 0x5b9   : > { %1099 = vmax.xlane.f32.xlu1 %v1098_v44 }
 0x5ba   : > { %v5720_v45 = vadd.f32 %v1092_v42, %v5712_v37 }
 0x5bb   : > { %v1087_v46 = vpop.f32.mrb[4].mxu1 }
 0x5bc   : > { %v1093_v47 = vmul.f32 0.35355338, %v1087_v46  ;;  %v4524_v48 = vpop.f32.mrb[5].mxu1  ;;  %v1101_v49 = vsel %vm1097_vm6, %v5720_v45, -inf }
 0x5bd   : > { %1102 = vmax.xlane.f32.xlu0 %v1101_v49 }
 0x5be   : > { %v5725_v50 = vadd.f32 %v1093_v47, %v5712_v37 }
 0x5bf   : > { %v1319_v51 = vpop.f32.mrb[6].mxu1 }
 0x5c0   : > { %v1333_v52 = vmul.f32 0.35355338, %v1319_v51  ;;  %v4548_v53 = vpop.f32.mrb[7].mxu1  ;;  %v1104_v54 = vsel %vm1097_vm6, %v5725_v50, -inf }
 0x5c1   : > { %1105 = vmax.xlane.f32.xlu0 %v1104_v54 }
 0x5c2   : > { %v5730_v56 = vadd.f32 %v1333_v52, %v5712_v37 }
 0x5c3   : > { %v1324_v57 = vpop.f32.mrb[8].mxu1 }
 0x5c4   : > { %v1334_v58 = vmul.f32 0.35355338, %v1324_v57  ;;  %v4551_v59 = vpop.f32.mrb[9].mxu1  ;;  %v1339_v60 = vsel %vm1097_vm6, %v5730_v56, -inf }
 0x5c5   : > { %1340 = vmax.xlane.f32.xlu0 %v1339_v60 }
 0x5c6   : > { %v5735_v63 = vadd.f32 %v1334_v58, %v5712_v37 }
 0x5c7   : > { %v1329_v0 = vpop.f32.mrb[10].mxu1 }
 0x5c8   : > { %v1335_v1 = vmul.f32 0.35355338, %v1329_v0  ;;  %v4554_v2 = vpop.f32.mrb[11].mxu1  ;;  %v1342_v7 = vsel %vm1097_vm6, %v5735_v63, -inf }
 0x5c9   : > { %1343 = vmax.xlane.f32.xlu1 %v1342_v7 }
 0x5ca   : > { %v5740_v8 = vadd.f32 %v1335_v1, %v5712_v37 }
 0x5cb   : > { %v1560_v10 = vpop.f32.mrb[12].mxu1 }
 0x5cc   : > { %v1574_v11 = vmul.f32 0.35355338, %v1560_v10  ;;  %v4578_v12 = vpop.f32.mrb[13].mxu1  ;;  %v1345_v13 = vsel %vm1097_vm6, %v5740_v8, -inf }
 0x5cd   : > { %1346 = vmax.xlane.f32.xlu0 %v1345_v13 }
 0x5ce   : > { %v5745_v14 = vadd.f32 %v1574_v11, %v5712_v37 }
 0x5cf   : > { %v1565_v15 = vpop.f32.mrb[14].mxu1 }
 0x5d0   : > { %v1575_v16 = vmul.f32 0.35355338, %v1565_v15  ;;  %v4581_v17 = vpop.f32.mrb[15].mxu1  ;;  %v1580_v18 = vsel %vm1097_vm6, %v5745_v14, -inf }
 0x5d1   : > { %1581 = vmax.xlane.f32.xlu1 %v1580_v18 }
 0x5d2   : > { %v5750_v19 = vadd.f32 %v1575_v16, %v5712_v37 }
 0x5d3   : > { %v1570_v20 = vpop.f32.mrb[16].mxu1 }
 0x5d4   : > { %v1576_v21 = vmul.f32 0.35355338, %v1570_v20  ;;  %v4584_v22 = vpop.f32.mrb[17].mxu1  ;;  %v1583_v23 = vsel %vm1097_vm6, %v5750_v19, -inf }
 0x5d5   : > { %1584 = vmax.xlane.f32.xlu0 %v1583_v23 }
 0x5d6   : > { %v5755_v24 = vadd.f32 %v1576_v21, %v5712_v37 }
 0x5d7   : > { %v1801_v25 = vpop.f32.mrb[18].mxu1 }
 0x5d8   : > { %v1815_v26 = vmul.f32 0.35355338, %v1801_v25  ;;  %v4608_v27 = vpop.f32.mrb[19].mxu1  ;;  %v1586_v28 = vsel %vm1097_vm6, %v5755_v24, -inf }
 0x5d9   : > { %1587 = vmax.xlane.f32.xlu1 %v1586_v28 }
 0x5da   : > { %v5760_v29 = vadd.f32 %v1815_v26, %v5712_v37 }
 0x5db   : > { %v1806_v30 = vpop.f32.mrb[20].mxu1 }
 0x5dc   : > { %v1816_v31 = vmul.f32 0.35355338, %v1806_v30  ;;  %v4611_v32 = vpop.f32.mrb[21].mxu1  ;;  %v1821_v33 = vsel %vm1097_vm6, %v5760_v29, -inf }
 0x5dd   : > { %1822 = vmax.xlane.f32.xlu0 %v1821_v33 }
 0x5de   : > { %v5765_v34 = vadd.f32 %v1816_v31, %v5712_v37 }
 0x5df   : > { %v1811_v35 = vpop.f32.mrb[22].mxu1 }
 0x5e0   : > { %v1817_v36 = vmul.f32 0.35355338, %v1811_v35  ;;  %v4614_v38 = vpop.f32.mrb[23].mxu1  ;;  %v1824_v39 = vsel %vm1097_vm6, %v5765_v34, -inf }
 0x5e1   : > { %1825 = vmax.xlane.f32.xlu1 %v1824_v39 }
 0x5e2   : > { %v5770_v41 = vadd.f32 %v1817_v36, %v5712_v37 }
 0x5e4   : > { %v1827_v42 = vsel %vm1097_vm6, %v5770_v41, -inf }
 0x5e5   : > { %1828 = vmax.xlane.f32.xlu0 %v1827_v42 }
 0x5f2   : > { %1135 = vrot.lane.b32.xlu1 %v5620_v55, %s6516_s1 }
 0x5f6   : > { %5009 = vrot.lane.b32.xlu1 %v5624_v61, %s6518_s26 }
 0x5fb   : > { %5004 = vrot.lane.b32.xlu0 %v5624_v61, %s6516_s1  ;;  %s6522_s1 = smov 48  }
 0x646   : > { %v1100_v43 = vpop.xlane.xlu1 %1099 }
 0x647   : > { %v1107_v44 = vsub.f32 %v5715_v40, %v1100_v43 }
 0x649   : > { %v1110_v46 = vmul.f32 1.442695, %v1107_v44 }
 0x64a   : > { %v1103_v47 = vpop.xlane.xlu0 %1102 }
 0x64b   : > { %5133 = vpow2.f32 %v1110_v46  ;;  %v1108_v48 = vsub.f32 %v5720_v45, %v1103_v47 }
 0x64d   : > { %v1112_v49 = vmul.f32 1.442695, %v1108_v48 }
 0x64e   : > { %v1106_v51 = vpop.xlane.xlu0 %1105 }
 0x64f   : > { %5135 = vpow2.f32 %v1112_v49  ;;  %v1109_v52 = vsub.f32 %v5725_v50, %v1106_v51 }
 0x651   : > { %v1114_v53 = vmul.f32 1.442695, %v1109_v52 }
 0x652   : > { %v1341_v54 = vpop.xlane.xlu0 %1340 }
 0x653   : > { %5137 = vpow2.f32 %v1114_v53  ;;  %v1348_v57 = vsub.f32 %v5730_v56, %v1341_v54 }
 0x655   : > { %v5784_v58 = vpop.eup %5133  ;;  %v1351_v59 = vmul.f32 1.442695, %v1348_v57 }
 0x656   : > { %v1344_v60 = vpop.xlane.xlu1 %1343  ;;  %v1116_v40 = vsel %vm1097_vm6, %v5784_v58, 0.0 }
 0x657   : > { %5139 = vpow2.f32 %v1351_v59  ;;  %v1349_v45 = vsub.f32 %v5735_v63, %v1344_v60  ;;  %1117 = vadd.xlane.f32.xlu1 %v1116_v40 }
 0x659   : > { %v5789_v0 = vpop.eup %5135  ;;  %v1353_v1 = vmul.f32 1.442695, %v1349_v45 }
 0x65a   : > { %v1347_v50 = vpop.xlane.xlu0 %1346  ;;  %v1119_v2 = vsel %vm1097_vm6, %v5789_v0, 0.0 }
 0x65b   : > { %5141 = vpow2.f32 %v1353_v1  ;;  %v1350_v56 = vsub.f32 %v5740_v8, %v1347_v50  ;;  %1120 = vadd.xlane.f32.xlu0 %v1119_v2 }
 0x65d   : > { %v5794_v7 = vpop.eup %5137  ;;  %v1355_v10 = vmul.f32 1.442695, %v1350_v56 }
 0x65e   : > { %v1582_v11 = vpop.xlane.xlu1 %1581  ;;  %v1122_v12 = vsel %vm1097_vm6, %v5794_v7, 0.0 }
 0x65f   : > { %5143 = vpow2.f32 %v1355_v10  ;;  %v1589_v63 = vsub.f32 %v5745_v14, %v1582_v11  ;;  %1123 = vadd.xlane.f32.xlu1 %v1122_v12 }
 0x661   : > { %v5799_v13 = vpop.eup %5139  ;;  %v1592_v15 = vmul.f32 1.442695, %v1589_v63 }
 0x662   : > { %v1585_v16 = vpop.xlane.xlu0 %1584  ;;  %v1357_v17 = vsel %vm1097_vm6, %v5799_v13, 0.0 }
 0x663   : > { %5145 = vpow2.f32 %v1592_v15  ;;  %v1590_v8 = vsub.f32 %v5750_v19, %v1585_v16  ;;  %1358 = vadd.xlane.f32.xlu0 %v1357_v17 }
 0x665   : > { %v5804_v18 = vpop.eup %5141  ;;  %v1594_v20 = vmul.f32 1.442695, %v1590_v8 }
 0x666   : > { %v1588_v21 = vpop.xlane.xlu1 %1587  ;;  %v1360_v22 = vsel %vm1097_vm6, %v5804_v18, 0.0 }
 0x667   : > { %5147 = vpow2.f32 %v1594_v20  ;;  %v1591_v14 = vsub.f32 %v5755_v24, %v1588_v21  ;;  %1361 = vadd.xlane.f32.xlu1 %v1360_v22 }
 0x669   : > { %v5809_v23 = vpop.eup %5143  ;;  %v1596_v25 = vmul.f32 1.442695, %v1591_v14 }
 0x66a   : > { %v1823_v26 = vpop.xlane.xlu0 %1822  ;;  %v1363_v27 = vsel %vm1097_vm6, %v5809_v23, 0.0 }
 0x66b   : > { %5149 = vpow2.f32 %v1596_v25  ;;  %v1830_v19 = vsub.f32 %v5760_v29, %v1823_v26  ;;  %1364 = vadd.xlane.f32.xlu1 %v1363_v27 }
 0x66d   : > { %v5814_v28 = vpop.eup %5145  ;;  %v1833_v30 = vmul.f32 1.442695, %v1830_v19 }
 0x66e   : > { %v1598_v31 = vsel %vm1097_vm6, %v5814_v28, 0.0  ;;  %v1826_v43 = vpop.xlane.xlu1 %1825 }
 0x66f   : > { %5151 = vpow2.f32 %v1833_v30  ;;  %1599 = vadd.xlane.f32.xlu1 %v1598_v31  ;;  %v1831_v48 = vsub.f32 %v5765_v34, %v1826_v43 }
 0x671   : > { %v5818_v24 = vpop.eup %5147  ;;  %v1835_v49 = vmul.f32 1.442695, %v1831_v48 }
 0x672   : > { %v1829_v32 = vpop.xlane.xlu0 %1828  ;;  %v1601_v33 = vsel %vm1097_vm6, %v5818_v24, 0.0  ;;  %v1136_v47 = vpop.permute.xlu1 %1135 }
 0x673   : > { %1602 = vadd.xlane.f32.xlu0 %v1601_v33  ;;  %v1832_v51 = vsub.f32 %v5770_v41, %v1829_v32  ;;  %5153 = vpow2.f32 %v1835_v49 }
 0x675   : > { %v5822_v35 = vpop.eup %5149  ;;  %v1837_v52 = vmul.f32 1.442695, %v1832_v51 }
 0x676   : > { %v5005_v36 = vpop.permute.xlu0 %5004  ;;  %v1604_v29 = vsel %vm1097_vm6, %v5822_v35, 0.0  ;;  %v5010_v34 = vpop.permute.xlu1 %5009 }
 0x677   : > { %v5007_v38 = vunpack.i.h.bf16 %v5005_v36  ;;  %1605 = vadd.xlane.f32.xlu1 %v1604_v29  ;;  %v5006_v39 = vunpack.i.l.bf16 %v5005_v36  ;;  %5155 = vpow2.f32 %v1837_v52  ;;  %v5012_v45 = vunpack.i.h.bf16 %v5010_v34 }
 0x678   : > { %v5011_v1 = vunpack.i.l.bf16 %v5010_v34 }
 0x679   : > { %v5826_v42 = vpop.eup %5151  ;;  %v4865_v44 = vpack.c.bf16 %v5007_v38, %v5006_v39 }
 0x67a   : > { %v1839_v46 = vsel %vm1097_vm6, %v5826_v42, 0.0  ;;  %v4872_v56 = vpack.c.bf16 %v5012_v45, %v5011_v1 }
 0x67b   : > { %1840 = vadd.xlane.f32.xlu0 %v1839_v46  ;;  %4866 = vmatpush3.bf16.msra.mxu0 %v4865_v44 }
 0x67c   : > { %4529 = vmatprep.subr.mxu0 %v5339_v6 }
 0x67d   : > { %v5838_v53 = vpop.eup %5153 }
 0x67e   : > { %v1842_v54 = vsel %vm1097_vm6, %v5838_v53, 0.0 }
 0x67f   : > { %4530 = vmatpush3.msra.mxu0 %v1136_v47 }
 0x680   : > { %4871 = vmatprep.subr.bf16.mxu0 %v5337_v3 }
 0x681   : > { %v5842_v57 = vpop.eup %5155 }
 0x682   : > { %v1845_v59 = vsel %vm1097_vm6, %v5842_v57, 0.0 }
 0x688   : > { %5014 = vrot.lane.b32.xlu1 %v5624_v61, %s6522_s1 }
 0x691   : > { %1376 = vrot.lane.b32.xlu0 %v5620_v55, %s6518_s26  ;;  %s6520_s26 = smov 40  }
 0x6ac   : > { %1843 = vadd.xlane.f32.xlu1 %v1842_v54 }
 0x6b0   : > { %1846 = vadd.xlane.f32.xlu0 %v1845_v59 }
 0x6bd   : > { %1617 = vrot.lane.b32.xlu1 %v5620_v55, %s6522_s1  ;;  %s6532_s1 = smov 24  }
 0x6c1   : > { %5019 = vrot.lane.b32.xlu1 %v5624_v61, %s6520_s26 }
 0x6c5   : > { %1858 = vrot.lane.b32.xlu1 %v5620_v55, %s6520_s26  ;;  %s6536_s26 = smov 8  }
 0x6e4   : > { %v1118_v41 = vpop.xlane.xlu1 %1117 }
 0x6e5   : > { %5157 = vrcp.f32 %v1118_v41 }
 0x6e8   : > { %v1121_v60 = vpop.xlane.xlu0 %1120 }
 0x6e9   : > { %5159 = vrcp.f32 %v1121_v60 }
 0x6ec   : > { %v1124_v40 = vpop.xlane.xlu1 %1123 }
 0x6ed   : > { %5161 = vrcp.f32 %v1124_v40 }
 0x6ef   : > { %v5158_v50 = vpop.eup %5157 }
 0x6f0   : > { %v1128_v2 = vmul.f32 %v5158_v50, %v5784_v58  ;;  %v1359_v63 = vpop.xlane.xlu0 %1358 }
 0x6f1   : > { %5163 = vrcp.f32 %v1359_v63 }
 0x6f2   : > { %4532 = vmatmul.mubr.msk.f32.vlgmr.msra.gmra.mrb[6].mxu0 %vm1097_vm6, %v1128_v2 }
 0x6f3   : > { %v5160_v10 = vpop.eup %5159  ;;  %4873 = vmatpush3.bf16.msra.mxu0 %v4872_v56  ;;  %4534 = vmatprep.mubr.msk.f32.mxu0 %vm5338_vm0, %v5339_v6 }
 0x6f4   : > { %v1362_v55 = vpop.xlane.xlu1 %1361  ;;  %v1129_v61 = vmul.f32 %v5160_v10, %v5789_v0  ;;  %4559 = vmatprep.subr.mxu0 %v5339_v6 }
 0x6f5   : > { %5165 = vrcp.f32 %v1362_v55 }
 0x6f6   : > { %4535 = vmatmul.mubr.msk.f32.gmra.mrb[12].mxu0 %vm1097_vm6, %v1129_v61 }
 0x6f7   : > { %v5162_v11 = vpop.eup %5161  ;;  %4537 = vmatprep.mubr.msk.f32.mxu0 %vm5338_vm0, %v5339_v6 }
 0x6f8   : > { %v1130_v58 = vmul.f32 %v5162_v11, %v5794_v7  ;;  %v1365_v12 = vpop.xlane.xlu1 %1364 }
 0x6f9   : > { %5167 = vrcp.f32 %v1365_v12  ;;  %v5096_v12 = vld [vmem:[%s6489_s9 + $0x8] sm:$0xff]  }
 0x6fa   : > { %4538 = vmatmul.mubr.msk.f32.gmra.mrb[14].mxu0 %vm1097_vm6, %v1130_v58 }
 0x6fb   : > { %4561 = vmatprep.mubr.msk.f32.mxu0 %vm5338_vm0, %v5339_v6  ;;  %v5164_v20 = vpop.eup %5163 }
 0x6fc   : > { %v1600_v15 = vpop.xlane.xlu1 %1599  ;;  %v1369_v7 = vmul.f32 %v5164_v20, %v5799_v13 }
 0x6fd   : > { %5169 = vrcp.f32 %v1600_v15 }
 0x6ff   : > { %v5166_v25 = vpop.eup %5165 }
 0x700   : > { %v1603_v0 = vpop.xlane.xlu0 %1602  ;;  %v1370_v27 = vmul.f32 %v5166_v25, %v5804_v18 }
 0x701   : > { %5171 = vrcp.f32 %v1603_v0 }
 0x703   : > { %v5168_v19 = vpop.eup %5167 }
 0x704   : > { %v1606_v16 = vpop.xlane.xlu1 %1605  ;;  %v1371_v13 = vmul.f32 %v5168_v19, %v5809_v23 }
 0x705   : > { %5173 = vrcp.f32 %v1606_v16 }
 0x707   : > { %v5170_v18 = vpop.eup %5169 }
 0x708   : > { %v5015_v17 = vpop.permute.xlu1 %5014  ;;  %v1841_v8 = vpop.xlane.xlu0 %1840  ;;  %v1610_v31 = vmul.f32 %v5170_v18, %v5814_v28 }
 0x709   : > { %v5017_v21 = vunpack.i.h.bf16 %v5015_v17  ;;  %v5016_v22 = vunpack.i.l.bf16 %v5015_v17  ;;  %5175 = vrcp.f32 %v1841_v8 }
 0x70b   : > { %v4879_v26 = vpack.c.bf16 %v5017_v21, %v5016_v22  ;;  %v5172_v33 = vpop.eup %5171 }
 0x70c   : > { %v1377_v14 = vpop.permute.xlu0 %1376  ;;  %v1611_v29 = vmul.f32 %v5172_v33, %v5818_v24 }
 0x70d   : > { %4560 = vmatpush3.msra.mxu0 %v1377_v14 }
 0x70e   : > { %4562 = vmatmul.mubr.msk.f32.vlgmr.msra.gmra.mrb[16].mxu0 %vm1097_vm6, %v1369_v7  ;;  %4878 = vmatprep.subr.bf16.mxu0 %v5337_v3 }
 0x70f   : > { %4880 = vmatpush3.bf16.msra.mxu0 %v4879_v26  ;;  %4564 = vmatprep.mubr.msk.f32.mxu0 %vm5338_vm0, %v5339_v6  ;;  %v5174_v38 = vpop.eup %5173 }
 0x710   : > { %4589 = vmatprep.subr.mxu0 %v5339_v6  ;;  %v1612_v44 = vmul.f32 %v5174_v38, %v5822_v35 }
 0x712   : > { %4565 = vmatmul.mubr.msk.f32.gmra.mrb[18].mxu0 %vm1097_vm6, %v1370_v27 }
 0x713   : > { %4567 = vmatprep.mubr.msk.f32.mxu0 %vm5338_vm0, %v5339_v6  ;;  %v5176_v46 = vpop.eup %5175 }
 0x714   : > { %v1851_v24 = vmul.f32 %v5176_v46, %v5826_v42 }
 0x716   : > { %4568 = vmatmul.mubr.msk.f32.gmra.mrb[20].mxu0 %vm1097_vm6, %v1371_v13 }
 0x717   : > { %4591 = vmatprep.mubr.msk.f32.mxu0 %vm5338_vm0, %v5339_v6 }
 0x739   : > { %v1844_v30 = vpop.xlane.xlu1 %1843 }
 0x73a   : > { %5177 = vrcp.f32 %v1844_v30 }
 0x73d   : > { %v1618_v32 = vpop.permute.xlu1 %1617  ;;  %v1847_v23 = vpop.xlane.xlu0 %1846 }
 0x73e   : > { %4590 = vmatpush3.msra.mxu0 %v1618_v32  ;;  %5179 = vrcp.f32 %v1847_v23 }
 0x73f   : > { %4592 = vmatmul.mubr.msk.f32.vlgmr.msra.gmra.mrb[22].mxu0 %vm1097_vm6, %v1610_v31  ;;  %4885 = vmatprep.subr.bf16.mxu0 %v5337_v3 }
 0x740   : > { %4594 = vmatprep.mubr.msk.f32.mxu0 %vm5338_vm0, %v5339_v6 }
 0x741   : > { %v5020_v36 = vpop.permute.xlu1 %5019 }
 0x742   : > { %v5022_v39 = vunpack.i.h.bf16 %v5020_v36  ;;  %v5021_v43 = vunpack.i.l.bf16 %v5020_v36 }
 0x743   : > { %4595 = vmatmul.mubr.msk.f32.gmra.mrb[24].mxu0 %vm1097_vm6, %v1611_v29 }
 0x744   : > { %v4886_v28 = vpack.c.bf16 %v5022_v39, %v5021_v43  ;;  %4597 = vmatprep.mubr.msk.f32.mxu0 %vm5338_vm0, %v5339_v6  ;;  %v5178_v48 = vpop.eup %5177 }
 0x745   : > { %v1859_v47 = vpop.permute.xlu1 %1858  ;;  %v1852_v35 = vmul.f32 %v5178_v48, %v5838_v53  ;;  %v4190_v48 = vld [vmem:[%s6490_s10] ss:$0 sm:$0xff] }
 0x746   : > { %4887 = vmatpush3.bf16.msra.mxu0 %v4886_v28 }
 0x747   : > { %4598 = vmatmul.mubr.msk.f32.gmra.mrb[26].mxu0 %vm1097_vm6, %v1612_v44  ;;  %4619 = vmatprep.subr.mxu0 %v5339_v6 }
 0x748   : > { %4621 = vmatprep.mubr.msk.f32.mxu0 %vm5338_vm0, %v5339_v6  ;;  %v5180_v49 = vpop.eup %5179 }
 0x749   : > { %v1853_v51 = vmul.f32 %v5180_v49, %v5842_v57  ;;  %v5095_v57 = vld [vmem:[%s6489_s9] sm:$0xff]  }
 0x74a   : > { %4620 = vmatpush3.msra.mxu0 %v1859_v47  ;;  %4630 = vmatprep.subr.bf16.mxu1 %v5095_v57 }
 0x74b   : > { %4622 = vmatmul.mubr.msk.f32.vlgmr.msra.gmra.mrb[28].mxu0 %vm1097_vm6, %v1851_v24  ;;  %4631 = vmatpush3.bf16.msra.mxu1 %v5095_v57 }
 0x74c   : > { %4624 = vmatprep.mubr.msk.f32.mxu0 %vm5338_vm0, %v5339_v6  ;;  %4632 = vmatprep.subr.bf16.mxu1 %v5096_v12 }
 0x74f   : > { %4625 = vmatmul.mubr.msk.f32.gmra.mrb[30].mxu0 %vm1097_vm6, %v1852_v35  ;;  %4633 = vmatpush3.bf16.msra.mxu1 %v5096_v12 }
 0x750   : > { %4627 = vmatprep.mubr.msk.f32.mxu0 %vm5338_vm0, %v5339_v6 }
 0x753   : > { %4628 = vmatmul.mubr.msk.f32.gmra.mrb[32].mxu0 %vm1097_vm6, %v1853_v51 }
 0x7c5   : > { %v1215_v42 = vpop.f32.mrb[6].mxu0 }
 0x7c6   : > { %v4533_v52 = vpop.f32.mrb[7].mxu0 }
 0x7c9   : > { %v1220_v54 = vpop.f32.mrb[12].mxu0 }
 0x7ca   : > { %v4536_v59 = vpop.f32.mrb[13].mxu0 }
 0x7cd   : > { %v1225_v34 = vpop.f32.mrb[14].mxu0 }
 0x7ce   : > { %v4539_v41 = vpop.f32.mrb[15].mxu0 }
 0x7e1   : > { %v1456_v60 = vpop.f32.mrb[16].mxu0 }
 0x7e2   : > { %v4563_v40 = vpop.f32.mrb[17].mxu0 }
 0x7e5   : > { %v1461_v45 = vpop.f32.mrb[18].mxu0 }
 0x7e6   : > { %v5023_v53 = vpack.i.bf16 %v1461_v45, %v1456_v60  ;;  %v4566_v1 = vpop.f32.mrb[19].mxu0 }
 0x7e8   : > { %5024 = vrot.lane.b32.xlu1 %v5023_v53, %s6536_s26 }
 0x7e9   : > { %v1466_v50 = vpop.f32.mrb[20].mxu0 }
 0x7ea   : > { %v4569_v2 = vpop.f32.mrb[21].mxu0 }
 0x7ec   : > { %1959 = vrot.lane.b32.xlu1 %v1466_v50, %s6536_s26  ;;  %s6575_s26 = smov 72  }
 0x812   : > { %v1697_v56 = vpop.f32.mrb[22].mxu0 }
 0x813   : > { %v4593_v10 = vpop.f32.mrb[23].mxu0 }
 0x816   : > { %v1702_v55 = vpop.f32.mrb[24].mxu0 }
 0x817   : > { %v5028_v61 = vpack.i.bf16 %v1702_v55, %v1697_v56  ;;  %v4596_v11 = vpop.f32.mrb[25].mxu0 }
 0x819   : > { %5029 = vrot.lane.b32.xlu1 %v5028_v61, %s6534_s24 }
 0x81a   : > { %v1707_v58 = vpop.f32.mrb[26].mxu0 }
 0x81b   : > { %1971 = vrot.lane.b32.xlu0 %v1707_v58, %s6534_s24  ;;  %v4599_v63 = vpop.f32.mrb[27].mxu0  ;;  %s6573_s24 = smov 112  }
 0x81c   : > { %v5097_v63 = vld [vmem:[%s6493_s13] sm:$0xff]  }
 0x81d   : > { %4638 = vmatprep.subr.bf16.mxu0 %v5097_v63 }
 0x81e   : > { %v1938_v15 = vpop.f32.mrb[28].mxu0  ;;  %4639 = vmatpush3.bf16.msra.mxu0 %v5097_v63 }
 0x81f   : > { %v4623_v0 = vpop.f32.mrb[29].mxu0 }
 0x822   : > { %v1943_v16 = vpop.f32.mrb[30].mxu0 }
 0x823   : > { %v5033_v17 = vpack.i.bf16 %v1943_v16, %v1938_v15  ;;  %v4626_v8 = vpop.f32.mrb[31].mxu0  ;;  %v5098_v15 = vld [vmem:[%s6493_s13 + $0x8] sm:$0xff]  }
 0x824   : > { %4640 = vmatprep.subr.bf16.mxu0 %v5098_v15 }
 0x825   : > { %5034 = vrot.lane.b32.xlu1 %v5033_v17, %s6532_s1  ;;  %4641 = vmatpush3.bf16.msra.mxu0 %v5098_v15 }
 0x826   : > { %v1948_v20 = vpop.f32.mrb[32].mxu0 }
 0x827   : > { %v4629_v21 = vpop.f32.mrb[33].mxu0 }
 0x829   : > { %1983 = vrot.lane.b32.xlu1 %v1948_v20, %s6532_s1  ;;  %s6571_s1 = smov 120  }
 0x85a   : > { %v5025_v22 = vpop.permute.xlu1 %5024 }
 0x85b   : > { %v5027_v25 = vunpack.i.h.bf16 %v5025_v22  ;;  %v5026_v26 = vunpack.i.l.bf16 %v5025_v22 }
 0x85d   : > { %v1989_v30 = vsel %vm998_vm3, %v1220_v54, %v5027_v25  ;;  %v1988_v18 = vsel %vm998_vm3, %v1215_v42, %v5026_v26 }
 0x85e   : > { %v1960_v7 = vpop.permute.xlu1 %1959 }
 0x85f   : > { %v1990_v29 = vsel %vm998_vm3, %v1225_v34, %v1960_v7 }
 0x88b   : > { %v5030_v14 = vpop.permute.xlu1 %5029 }
 0x88c   : > { %v5032_v27 = vunpack.i.h.bf16 %v5030_v14  ;;  %v5031_v19 = vunpack.i.l.bf16 %v5030_v14 }
 0x88d   : > { %v1972_v31 = vpop.permute.xlu0 %1971 }
 0x88e   : > { %v1993_v23 = vsel %vm1991_vm7, %v1989_v30, %v5032_v27  ;;  %v1992_v36 = vsel %vm1991_vm7, %v1988_v18, %v5031_v19  ;;  %v1994_v43 = vsel %vm1991_vm7, %v1990_v29, %v1972_v31  ;;  %v4191_v27 = vld [vmem:[%s6491_s11] ss:$0 sm:$0xff] }
 0x897   : > { %v5035_v13 = vpop.permute.xlu1 %5034 }
 0x898   : > { %v5037_v32 = vunpack.i.h.bf16 %v5035_v13  ;;  %v5036_v33 = vunpack.i.l.bf16 %v5035_v13 }
 0x89a   : > { %v1996_v38 = vsel %vm1097_vm6, %v1993_v23, %v5037_v32  ;;  %v1995_v39 = vsel %vm1097_vm6, %v1992_v36, %v5036_v33  ;;  %v4192_v32 = vld [vmem:[%s6492_s12] ss:$0 sm:$0xff] }
 0x89b   : > { %v1998_v28 = vpack.c.bf16 %v1996_v38, %v1995_v39  ;;  %v1984_v44 = vpop.permute.xlu1 %1983 }
 0x89c   : > { %v1997_v46 = vsel %vm1097_vm6, %v1994_v43, %v1984_v44  ;;  %v5100_v44 = vld [vmem:[%s6495_s15 + $0x8] sm:$0xff]  }
 0x89d   : > { %v1999_v24 = vpack.c.bf16 %v1997_v46, %v1997_v46  ;;  %4634 = vmatprep.mubr.msk.bf16.mxu1 %vm788_vm2, %v1998_v28  ;;  %v5099_v28 = vld [vmem:[%s6495_s15] sm:$0xff]   ;;  %v5101_v46 = vld [vmem:[%s6495_s15 + $0x10] sm:$0xff]  }
 0x89e   : > { %4646 = vmatprep.subr.bf16.mxu1 %v5099_v28 }
 0x89f   : > { %4635 = vmatmul.mubr.msk.bf16.vlgmr.msra.gmra.mrb[24].mxu1 %vm788_vm2, %v1999_v24  ;;  %v5102_v24 = vld [vmem:[%s6495_s15 + $0x18] sm:$0xff]  }
 0x8a0   : > { %4647 = vmatpush3.bf16.msra.mxu1 %v5099_v28 }
 0x8a1   : > { %4648 = vmatprep.subr.bf16.mxu1 %v5100_v44 }
 0x8a4   : > { %4649 = vmatpush3.bf16.msra.mxu1 %v5100_v44 }
 0x8a5   : > { %4650 = vmatprep.subr.bf16.mxu1 %v5101_v46 }
 0x8a8   : > { %4651 = vmatpush3.bf16.msra.mxu1 %v5101_v46 }
 0x8a9   : > { %4652 = vmatprep.subr.bf16.mxu1 %v5102_v24 }
 0x8ac   : > { %4653 = vmatpush3.bf16.msra.mxu1 %v5102_v24 }
 0x972   : > { %v4636_v47 = vpop.f32.mrb[24].mxu1 }
 0x973   : > { %v2056_v35 = vpop.f32.mrb[25].mxu1  ;;  %v2072_v49 = vadd.f32 %v4636_v47, %v5590_v9  ;;  %v5103_v47 = vld [vmem:[%s6495_s15 + $0x20] sm:$0xff]  }
 0x974   : > { %v2070_v51 = vadd.f32 %v2056_v35, %v5582_v62  ;;  %v4637_v42 = vpop.f32.mrb[26].mxu1  ;;  %4654 = vmatprep.subr.bf16.mxu1 %v5103_v47  ;;  %v5105_v35 = vld [vmem:[%s6495_s15 + $0x30] sm:$0xff]  }
 0x975   : > { %v2059_v52 = vpop.f32.mrb[27].mxu1  ;;  %v5934_v34 = vadd.f32 %v4190_v48, %v2072_v49  ;;  %4655 = vmatpush3.bf16.msra.mxu1 %v5103_v47  ;;  %v5106_v49 = vld [vmem:[%s6495_s15 + $0x38] sm:$0xff]  }
 0x976   : > { %v5931_v54 = vadd.f32 %v4190_v48, %v2070_v51  ;;  %v2071_v59 = vadd.f32 %v2059_v52, %v5586_v4  ;;  %v4193_v51 = vld [vmem:[%s6494_s14] ss:$0 sm:$0xff] }
 0x977   : > { %v2091_v62 = vsel %vm788_vm2, %v5934_v34, 0.0 }
 0x978   : > { %v5936_v41 = vadd.f32 %v4190_v48, %v2071_v59  ;;  %v2085_v60 = vsel %vm788_vm2, %v5931_v54, 0.0  ;;  %v5104_v48 = vld [vmem:[%s6495_s15 + $0x28] sm:$0xff]  }
 0x979   : > { %2086 = vadd.xlane.f32.xlu1 %v2085_v60  ;;  %4656 = vmatprep.subr.bf16.mxu1 %v5104_v48 }
 0x97a   : > { %v2088_v40 = vsel %vm788_vm2, %v5936_v41, 0.0  ;;  %4657 = vmatpush3.bf16.msra.mxu1 %v5104_v48  ;;  %v5107_v48 = vld [vmem:[%s6563_s7 + $0x10] sm:$0xff]  }
 0x97b   : > { %2089 = vadd.xlane.f32.xlu0 %v2088_v40  ;;  %4658 = vmatprep.subr.bf16.mxu1 %v5105_v35 }
 0x97c   : > { %4666 = vmatprep.subr.bf16.mxu0 %v5107_v48 }
 0x97d   : > { %2092 = vadd.xlane.f32.xlu1 %v2091_v62 }
 0x97e   : > { %4659 = vmatpush3.bf16.msra.mxu1 %v5105_v35  ;;  %v5108_v35 = vld [vmem:[%s6563_s7 + $0x18] sm:$0xff]  }
 0x97f   : > { %4660 = vmatprep.subr.bf16.mxu1 %v5106_v49 }
 0x982   : > { %4661 = vmatpush3.bf16.msra.mxu1 %v5106_v49 }
 0x983   : > { %4895 = vmatprep.subr.bf16.mxu1 %v5337_v3 }
 0xa06   : > { %v2087_v9 = vpop.xlane.xlu1 %2086 }
 0xa07   : > { %v2094_v45 = vmul.f32 0.03125, %v2087_v9 }
 0xa08   : > { %v2090_v53 = vpop.xlane.xlu0 %2089 }
 0xa09   : > { %v2097_v4 = vsub.f32 %v5931_v54, %v2094_v45  ;;  %v2095_v1 = vmul.f32 0.03125, %v2090_v53 }
 0xa0a   : > { %v2093_v50 = vpop.xlane.xlu1 %2092 }
 0xa0b   : > { %v2098_v2 = vsub.f32 %v5936_v41, %v2095_v1  ;;  %v2096_v57 = vmul.f32 0.03125, %v2093_v50  ;;  %v2100_v56 = vmul.f32 %v2097_v4, %v2097_v4 }
 0xa0d   : > { %v2099_v10 = vsub.f32 %v5934_v34, %v2096_v57  ;;  %v2103_v55 = vsel %vm788_vm2, %v2100_v56, 0.0  ;;  %v2101_v61 = vmul.f32 %v2098_v2, %v2098_v2 }
 0xa0e   : > { %2104 = vadd.xlane.f32.xlu1 %v2103_v55 }
 0xa0f   : > { %v2102_v11 = vmul.f32 %v2099_v10, %v2099_v10  ;;  %v2106_v12 = vsel %vm788_vm2, %v2101_v61, 0.0 }
 0xa11   : > { %v2109_v58 = vsel %vm788_vm2, %v2102_v11, 0.0 }
 0xa12   : > { %2110 = vadd.xlane.f32.xlu0 %v2109_v58  ;;  %2107 = vadd.xlane.f32.xlu1 %v2106_v12 }
 0xa9b   : > { %v2105_v0 = vpop.xlane.xlu1 %2104 }
 0xa9c   : > { %v2112_v16 = vmul.f32 0.03125, %v2105_v0 }
 0xa9e   : > { %v2115_v17 = vadd.f32 1e-05, %v2112_v16 }
 0xa9f   : > { %v2108_v8 = vpop.xlane.xlu1 %2107  ;;  %v2111_v20 = vpop.xlane.xlu0 %2110 }
 0xaa0   : > { %5181 = vrsqrt.f32 %v2115_v17  ;;  %v2113_v21 = vmul.f32 0.03125, %v2108_v8  ;;  %v2114_v22 = vmul.f32 0.03125, %v2111_v20  ;;  %v4201_v20 = vld [vmem:[%s6496_s16] ss:$0 sm:$0xff] }
 0xaa2   : > { %v2116_v7 = vadd.f32 1e-05, %v2113_v21  ;;  %v2117_v14 = vadd.f32 1e-05, %v2114_v22 }
 0xaa4   : > { %5183 = vrsqrt.f32 %v2116_v7 }
 0xaa5   : > { %5185 = vrsqrt.f32 %v2117_v14 }
 0xaaa   : > { %v5182_v25 = vpop.eup %5181 }
 0xaab   : > { %v2121_v26 = vmul.f32 %v5182_v25, %v2097_v4 }
 0xaad   : > { %v2130_v18 = vmul.f32 %v4191_v27, %v2121_v26 }
 0xaae   : > { %v5184_v19 = vpop.eup %5183 }
 0xaaf   : > { %v5186_v13 = vpop.eup %5185  ;;  %v2122_v30 = vmul.f32 %v5184_v19, %v2098_v2  ;;  %v2139_v36 = vadd.f32 %v4192_v32, %v2130_v18 }
 0xab0   : > { %v2123_v31 = vmul.f32 %v5186_v13, %v2099_v10 }
 0xab1   : > { %v2131_v33 = vmul.f32 %v4191_v27, %v2122_v30 }
 0xab2   : > { %v2132_v23 = vmul.f32 %v4191_v27, %v2123_v31 }
 0xab3   : > { %v2140_v29 = vadd.f32 %v4192_v32, %v2131_v33 }
 0xab4   : > { %v2141_v38 = vadd.f32 %v4192_v32, %v2132_v23 }
 0xab5   : > { %v2142_v39 = vpack.c.bf16 %v2140_v29, %v2139_v36 }
 0xab6   : > { %v2143_v43 = vpack.c.bf16 %v2141_v38, %v2141_v38 }
 0xab7   : > { %4642 = vmatprep.mubr.msk.bf16.mxu0 %vm788_vm2, %v2142_v39 }
 0xab8   : > { %4643 = vmatmul.mubr.msk.bf16.vlgmr.msra.gmra.mrb[36].mxu0 %vm788_vm2, %v2143_v43 }
 0xab9   : > { %4667 = vmatpush3.bf16.msra.mxu0 %v5107_v48 }
 0xaba   : > { %4668 = vmatprep.subr.bf16.mxu0 %v5108_v35 }
 0xabd   : > { %4669 = vmatpush3.bf16.msra.mxu0 %v5108_v35 }
 0xabe   : > { %4888 = vmatprep.subr.bf16.mxu0 %v5337_v3 }
 0xb8b   : > { %v4644_v42 = vpop.f32.mrb[36].mxu0 }
 0xb8c   : > { %v2216_v52 = vadd.f32 %v4644_v42, %v4193_v51  ;;  %v2207_v59 = vpop.f32.mrb[37].mxu0 }
 0xb8d   : > { %v2208_v60 = vadd.f32 %v4193_v51, %v2207_v59  ;;  %v4645_v40 = vpop.f32.mrb[38].mxu0 }
 0xb8e   : > { %v4200_v62 = vmul.f32 -1.702, %v2216_v52  ;;  %v2210_v9 = vpop.f32.mrb[39].mxu0 }
 0xb8f   : > { %v4198_v45 = vmul.f32 -1.702, %v2208_v60  ;;  %v2211_v53 = vadd.f32 %v4193_v51, %v2210_v9 }
 0xb90   : > { %v2231_v4 = vmul.f32 1.442695, %v4200_v62 }
 0xb91   : > { %v2227_v1 = vmul.f32 1.442695, %v4198_v45  ;;  %v4199_v50 = vmul.f32 -1.702, %v2211_v53 }
 0xb92   : > { %5187 = vpow2.f32 %v2231_v4 }
 0xb93   : > { %5189 = vpow2.f32 %v2227_v1  ;;  %v2229_v2 = vmul.f32 1.442695, %v4199_v50 }
 0xb95   : > { %5191 = vpow2.f32 %v2229_v2 }
 0xb9c   : > { %v5188_v57 = vpop.eup %5187 }
 0xb9d   : > { %v5190_v56 = vpop.eup %5189  ;;  %v2235_v10 = vadd.f32 1.0, %v5188_v57 }
 0xb9e   : > { %v2233_v55 = vadd.f32 1.0, %v5190_v56  ;;  %v4213_v56 = vld [vmem:[%s6565_s5 + $0x1] ss:$0 sm:$0xff] }
 0xb9f   : > { %v5192_v61 = vpop.eup %5191  ;;  %5193 = vrcp.f32 %v2235_v10 }
 0xba0   : > { %5195 = vrcp.f32 %v2233_v55  ;;  %v2234_v11 = vadd.f32 1.0, %v5192_v61 }
 0xba2   : > { %5197 = vrcp.f32 %v2234_v11 }
 0xba9   : > { %v5194_v58 = vpop.eup %5193 }
 0xbaa   : > { %v5196_v12 = vpop.eup %5195  ;;  %v2244_v15 = vmul.f32 %v5194_v58, %v2216_v52 }
 0xbab   : > { %v2242_v0 = vmul.f32 %v5196_v12, %v2208_v60 }
 0xbac   : > { %v5198_v63 = vpop.eup %5197  ;;  %v2246_v8 = vpack.c.bf16 %v2244_v15, %v2244_v15 }
 0xbad   : > { %v2243_v16 = vmul.f32 %v5198_v63, %v2211_v53  ;;  %v4212_v53 = vld [vmem:[%s6564_s23 + $0x1] ss:$0 sm:$0xff] }
 0xbaf   : > { %v2245_v17 = vpack.c.bf16 %v2243_v16, %v2242_v0  ;;  %v4219_v0 = vld [vmem:[%s6566_s8 + $0x1] ss:$0 sm:$0xff] }
 0xbb1   : > { %4662 = vmatprep.mubr.bf16.mxu1 %v2245_v17 }
 0xbb2   : > { %4663 = vmatmul.mubr.bf16.vlgmr.msra.gmra.mrb[28].mxu1 %v2246_v8 }
 0xbb3   : > { %4710 = vmatprep.mubr.msk.f32.mxu1 %vm5338_vm0, %v5339_v6 }
 0xc85   : > { %v4664_v21 = vpop.f32.mrb[28].mxu1 }
 0xc86   : > { %v2352_v22 = vpop.f32.mrb[29].mxu1  ;;  %v2361_v7 = vadd.f32 %v4664_v21, %v4201_v20 }
 0xc87   : > { %v2353_v14 = vadd.f32 %v4201_v20, %v2352_v22  ;;  %v4665_v25 = vpop.f32.mrb[30].mxu1 }
 0xc88   : > { %v2355_v26 = vpop.f32.mrb[31].mxu1  ;;  %v6001_v13 = vadd.f32 %v2361_v7, %v5934_v34 }
 0xc89   : > { %v5998_v27 = vadd.f32 %v2353_v14, %v5931_v54  ;;  %v2356_v19 = vadd.f32 %v4201_v20, %v2355_v26 }
 0xc8a   : > { %v2379_v32 = vsel %vm788_vm2, %v6001_v13, 0.0 }
 0xc8b   : > { %v6004_v30 = vadd.f32 %v2356_v19, %v5936_v41  ;;  %v2373_v18 = vsel %vm788_vm2, %v5998_v27, 0.0 }
 0xc8c   : > { %2374 = vadd.xlane.f32.xlu1 %v2373_v18 }
 0xc8d   : > { %v2376_v31 = vsel %vm788_vm2, %v6004_v30, 0.0 }
 0xc8e   : > { %2377 = vadd.xlane.f32.xlu0 %v2376_v31 }
 0xc90   : > { %2380 = vadd.xlane.f32.xlu1 %v2379_v32 }
 0xd19   : > { %v2375_v54 = vpop.xlane.xlu1 %2374 }
 0xd1a   : > { %v2382_v33 = vmul.f32 0.03125, %v2375_v54 }
 0xd1b   : > { %v2378_v23 = vpop.xlane.xlu0 %2377 }
 0xd1c   : > { %v2385_v34 = vsub.f32 %v5998_v27, %v2382_v33  ;;  %v2383_v36 = vmul.f32 0.03125, %v2378_v23 }
 0xd1d   : > { %v2381_v41 = vpop.xlane.xlu1 %2380 }
 0xd1e   : > { %v2386_v29 = vsub.f32 %v6004_v30, %v2383_v36  ;;  %v2384_v38 = vmul.f32 0.03125, %v2381_v41  ;;  %v2388_v39 = vmul.f32 %v2385_v34, %v2385_v34 }
 0xd20   : > { %v2387_v43 = vsub.f32 %v6001_v13, %v2384_v38  ;;  %v2391_v28 = vsel %vm788_vm2, %v2388_v39, 0.0  ;;  %v2389_v44 = vmul.f32 %v2386_v29, %v2386_v29 }
 0xd21   : > { %2392 = vadd.xlane.f32.xlu0 %v2391_v28 }
 0xd22   : > { %v2394_v46 = vsel %vm788_vm2, %v2389_v44, 0.0  ;;  %v2390_v24 = vmul.f32 %v2387_v43, %v2387_v43 }
 0xd23   : > { %2395 = vadd.xlane.f32.xlu1 %v2394_v46 }
 0xd24   : > { %v2397_v47 = vsel %vm788_vm2, %v2390_v24, 0.0 }
 0xd25   : > { %2398 = vadd.xlane.f32.xlu0 %v2397_v47 }
 0xdae   : > { %v2393_v49 = vpop.xlane.xlu0 %2392 }
 0xdaf   : > { %v2400_v51 = vmul.f32 0.03125, %v2393_v49 }
 0xdb0   : > { %v2396_v42 = vpop.xlane.xlu1 %2395 }
 0xdb1   : > { %v2403_v52 = vadd.f32 1e-05, %v2400_v51  ;;  %v2401_v59 = vmul.f32 0.03125, %v2396_v42 }
 0xdb2   : > { %v2399_v60 = vpop.xlane.xlu0 %2398 }
 0xdb3   : > { %5199 = vrsqrt.f32 %v2403_v52  ;;  %v2404_v40 = vadd.f32 1e-05, %v2401_v59  ;;  %v2402_v62 = vmul.f32 0.03125, %v2399_v60 }
 0xdb5   : > { %5201 = vrsqrt.f32 %v2404_v40  ;;  %v2405_v9 = vadd.f32 1e-05, %v2402_v62 }
 0xdb7   : > { %5203 = vrsqrt.f32 %v2405_v9 }
 0xdbd   : > { %v5200_v45 = vpop.eup %5199 }
 0xdbe   : > { %v2409_v4 = vmul.f32 %v5200_v45, %v2385_v34 }
 0xdbf   : > { %v5202_v1 = vpop.eup %5201 }
 0xdc0   : > { %v2410_v50 = vmul.f32 %v5202_v1, %v2386_v29  ;;  %v2418_v2 = vmul.f32 %v4212_v53, %v2409_v4 }
 0xdc1   : > { %v5204_v57 = vpop.eup %5203 }
 0xdc2   : > { %v2411_v10 = vmul.f32 %v5204_v57, %v2387_v43  ;;  %v2419_v55 = vmul.f32 %v4212_v53, %v2410_v50  ;;  %v2427_v61 = vadd.f32 %v4213_v56, %v2418_v2 }
 0xdc4   : > { %v2428_v11 = vadd.f32 %v4213_v56, %v2419_v55  ;;  %v2420_v58 = vmul.f32 %v4212_v53, %v2411_v10 }
 0xdc6   : > { %v2430_v12 = vpack.c.bf16 %v2428_v11, %v2427_v61  ;;  %v2429_v63 = vadd.f32 %v4213_v56, %v2420_v58 }
 0xdc8   : > { %4670 = vmatprep.mubr.msk.bf16.mxu0 %vm788_vm2, %v2430_v12  ;;  %v2431_v15 = vpack.c.bf16 %v2429_v63, %v2429_v63 }
 0xdca   : > { %4671 = vmatmul.mubr.msk.bf16.vlgmr.msra.gmra.mrb[40].mxu0 %vm788_vm2, %v2431_v15 }
 0xdcb   : > { %4680 = vmatprep.mubr.msk.f32.mxu0 %vm5338_vm0, %v5339_v6 }
 0xe9d   : > { %v4672_v16 = vpop.f32.mrb[40].mxu0 }
 0xe9e   : > { %v6038_v17 = vadd.f32 %v4672_v16, %v4219_v0  ;;  %v2497_v8 = vpop.f32.mrb[41].mxu0 }
 0xe9f   : > { %v4673_v20 = vpop.f32.mrb[42].mxu0  ;;  %v2498_v22 = vadd.f32 %v4219_v0, %v2497_v8 }
 0xea0   : > { %2518 = vrot.lane.b32.xlu0 %v6038_v17, %s6569_s0  ;;  %v2500_v21 = vpop.f32.mrb[43].mxu0 }
 0xea1   : > { %v2501_v7 = vadd.f32 %v4219_v0, %v2500_v21 }
 0xea3   : > { %v6042_v14 = vpack.i.bf16 %v2501_v7, %v2498_v22 }
 0xea5   : > { %5049 = vrot.lane.b32.xlu0 %v6042_v14, %s6570_s2  ;;  %5039 = vrot.lane.b32.xlu1 %v6042_v14, %s6569_s0  ;;  %s6577_s0 = smov 56  }
 0xea9   : > { %2751 = vrot.lane.b32.xlu0 %v2501_v7, %s6571_s1  ;;  %5044 = vrot.lane.b32.xlu1 %v6042_v14, %s6572_s3 }
 0xead   : > { %3000 = vrot.lane.b32.xlu0 %v6038_v17, %s6570_s2  ;;  %2759 = vrot.lane.b32.xlu1 %v6038_v17, %s6572_s3  ;;  %s6578_s2 = smov 48   ;;  %s6580_s3 = smov 8  }
 0xeb1   : > { %2990 = vrot.lane.b32.xlu0 %v2498_v22, %s6573_s24  ;;  %2749 = vrot.lane.b32.xlu1 %v2498_v22, %s6571_s1 }
 0xeb5   : > { %2994 = vrot.lane.b32.xlu0 %v6038_v17, %s6573_s24  ;;  %2753 = vrot.lane.b32.xlu1 %v6038_v17, %s6571_s1  ;;  %s6579_s1 = smov 40  }
 0xeb9   : > { %3231 = vrot.lane.b32.xlu0 %v2498_v22, %s6574_s29  ;;  %5054 = vrot.lane.b32.xlu1 %v6042_v14, %s6575_s26 }
 0xebd   : > { %3235 = vrot.lane.b32.xlu0 %v6038_v17, %s6574_s29  ;;  %2992 = vrot.lane.b32.xlu1 %v2501_v7, %s6573_s24 }
 0xec1   : > { %3241 = vrot.lane.b32.xlu1 %v6038_v17, %s6575_s26  ;;  %s6581_s26 = smov 16  }
 0xec5   : > { %3233 = vrot.lane.b32.xlu1 %v2501_v7, %s6574_s29 }
 0xf12   : > { %v2519_v33 = vpop.permute.xlu0 %2518 }
 0xf17   : > { %v5040_v25 = vpop.permute.xlu1 %5039  ;;  %v5050_v36 = vpop.permute.xlu0 %5049 }
 0xf18   : > { %v5042_v26 = vunpack.i.h.bf16 %v5040_v25  ;;  %v5041_v19 = vunpack.i.l.bf16 %v5040_v25  ;;  %v5052_v29 = vunpack.i.h.bf16 %v5050_v36  ;;  %v5051_v38 = vunpack.i.l.bf16 %v5050_v36 }
 0xf1a   : > { %v4889_v18 = vpack.c.bf16 %v5042_v26, %v5041_v19  ;;  %v4903_v43 = vpack.c.bf16 %v5052_v29, %v5051_v38 }
 0xf1b   : > { %v5045_v31 = vpop.permute.xlu1 %5044  ;;  %v2752_v28 = vpop.permute.xlu0 %2751 }
 0xf1c   : > { %v5047_v32 = vunpack.i.h.bf16 %v5045_v31  ;;  %v5046_v54 = vunpack.i.l.bf16 %v5045_v31  ;;  %4891 = vmatpush3.bf16.xpose.msk.msra.mxu0 %vm5654_vm4, %v4889_v18 }
 0xf1d   : > { %4678 = vmatprep.subr.mxu0 %v5339_v6 }
 0xf1e   : > { %v4896_v23 = vpack.c.bf16 %v5047_v32, %v5046_v54 }
 0xf1f   : > { %v2760_v34 = vpop.permute.xlu1 %2759  ;;  %v3001_v46 = vpop.permute.xlu0 %3000 }
 0xf20   : > { %4898 = vmatpush3.bf16.xpose.msk.msra.mxu1 %vm5654_vm4, %v4896_v23 }
 0xf21   : > { %4708 = vmatprep.subr.mxu1 %v5339_v6 }
 0xf23   : > { %v2750_v41 = vpop.permute.xlu1 %2749  ;;  %v2991_v48 = vpop.permute.xlu0 %2990 }
 0xf24   : > { %4679 = vmatpush3.xpose.msk.msra.mxu0 %vm998_vm3, %v2519_v33 }
 0xf25   : > { %4892 = vmatprep.subr.bf16.mxu0 %v5337_v3 }
 0xf27   : > { %4681 = vmatmul.mubr.msk.f32.vlgmr.msra.gmra.mrb[34].mxu0 %vm998_vm3, %v2498_v22  ;;  %v2754_v39 = vpop.permute.xlu1 %2753  ;;  %v2995_v51 = vpop.permute.xlu0 %2994 }
 0xf28   : > { %4709 = vmatpush3.xpose.msk.msra.mxu1 %vm998_vm3, %v2760_v34  ;;  %4683 = vmatprep.mubr.msk.f32.mxu0 %vm5338_vm0, %v5339_v6 }
 0xf29   : > { %4902 = vmatprep.subr.bf16.mxu1 %v5337_v3 }
 0xf2b   : > { %4684 = vmatmul.mubr.msk.f32.gmra.mrb[44].mxu0 %vm998_vm3, %v2501_v7  ;;  %4711 = vmatmul.mubr.msk.f32.vlgmr.msra.gmra.mrb[32].mxu1 %vm998_vm3, %v2750_v41  ;;  %v5055_v44 = vpop.permute.xlu1 %5054  ;;  %v3232_v5 = vpop.permute.xlu0 %3231 }
 0xf2c   : > { %4905 = vmatpush3.bf16.xpose.msk.msra.mxu1 %vm5654_vm4, %v4903_v43  ;;  %4686 = vmatprep.mubr.msk.f32.mxu0 %vm5338_vm0, %v5339_v6  ;;  %v5057_v24 = vunpack.i.h.bf16 %v5055_v44  ;;  %v5056_v47 = vunpack.i.l.bf16 %v5055_v44 }
 0xf2d   : > { %4713 = vmatprep.mubr.msk.f32.mxu1 %vm5338_vm0, %v5339_v6  ;;  %4738 = vmatprep.subr.mxu1 %v5339_v6 }
 0xf2e   : > { %v4910_v35 = vpack.c.bf16 %v5057_v24, %v5056_v47 }
 0xf2f   : > { %4687 = vmatmul.mubr.msk.f32.gmra.mrb[46].mxu0 %vm998_vm3, %v6038_v17  ;;  %4714 = vmatmul.mubr.msk.f32.gmra.mrb[34].mxu1 %vm998_vm3, %v2752_v28  ;;  %v2993_v49 = vpop.permute.xlu1 %2992  ;;  %v3236_v59 = vpop.permute.xlu0 %3235 }
 0xf30   : > { %4716 = vmatprep.mubr.msk.f32.mxu1 %vm5338_vm0, %v5339_v6  ;;  %4695 = vmatprep.mubr.msk.f32.mxu0 %vm5338_vm0, %v5339_v6 }
 0xf33   : > { %4717 = vmatmul.mubr.msk.f32.gmra.mrb[36].mxu1 %vm998_vm3, %v2754_v39  ;;  %v3242_v42 = vpop.permute.xlu1 %3241 }
 0xf34   : > { %4739 = vmatpush3.xpose.msk.msra.mxu1 %vm998_vm3, %v3001_v46  ;;  %4740 = vmatprep.mubr.msk.f32.mxu1 %vm5338_vm0, %v5339_v6 }
 0xf35   : > { %4909 = vmatprep.subr.bf16.mxu1 %v5337_v3 }
 0xf37   : > { %4741 = vmatmul.mubr.msk.f32.vlgmr.msra.gmra.mrb[38].mxu1 %vm998_vm3, %v2991_v48  ;;  %v3234_v52 = vpop.permute.xlu1 %3233 }
 0xf38   : > { %4912 = vmatpush3.bf16.xpose.msk.msra.mxu1 %vm5654_vm4, %v4910_v35  ;;  %4743 = vmatprep.mubr.msk.f32.mxu1 %vm5338_vm0, %v5339_v6 }
 0xf39   : > { %4768 = vmatprep.subr.mxu1 %v5339_v6 }
 0xf3b   : > { %4744 = vmatmul.mubr.msk.f32.gmra.mrb[40].mxu1 %vm998_vm3, %v2993_v49 }
 0xf3c   : > { %4746 = vmatprep.mubr.msk.f32.mxu1 %vm5338_vm0, %v5339_v6 }
 0xf3f   : > { %4747 = vmatmul.mubr.msk.f32.gmra.mrb[42].mxu1 %vm998_vm3, %v2995_v51 }
 0xf40   : > { %4769 = vmatpush3.xpose.msk.msra.mxu1 %vm998_vm3, %v3242_v42  ;;  %4770 = vmatprep.mubr.msk.f32.mxu1 %vm5338_vm0, %v5339_v6 }
 0xf43   : > { %4771 = vmatmul.mubr.msk.f32.vlgmr.msra.gmra.mrb[44].mxu1 %vm998_vm3, %v3232_v5 }
 0xf44   : > { %4773 = vmatprep.mubr.msk.f32.mxu1 %vm5338_vm0, %v5339_v6 }
 0xf47   : > { %4774 = vmatmul.mubr.msk.f32.gmra.mrb[46].mxu1 %vm998_vm3, %v3234_v52 }
 0xf48   : > { %4776 = vmatprep.mubr.msk.f32.mxu1 %vm5338_vm0, %v5339_v6 }
 0xf4b   : > { %4777 = vmatmul.mubr.msk.f32.gmra.mrb[48].mxu1 %vm998_vm3, %v3236_v59 }
 0xffa   : > { %v2598_v60 = vpop.f32.mrb[34].mxu0 }
 0xffb   : > { %v2612_v40 = vmul.f32 0.35355338, %v2598_v60  ;;  %v4682_v62 = vpop.f32.mrb[35].mxu0 }
 0xffd   : > { %v6125_v9 = vadd.f32 %v2612_v40, %v5712_v37 }
 0xffe   : > { %v2603_v45 = vpop.f32.mrb[44].mxu0  ;;  %v2839_v53 = vpop.f32.mrb[32].mxu1 }
 0xfff   : > { %v2613_v4 = vmul.f32 0.35355338, %v2603_v45  ;;  %v2853_v1 = vmul.f32 0.35355338, %v2839_v53  ;;  %v4685_v50 = vpop.f32.mrb[45].mxu0  ;;  %v4712_v2 = vpop.f32.mrb[33].mxu1 }
0x1000   : > { %v2618_v57 = vsel %vm1097_vm6, %v6125_v9, -inf }
0x1001   : > { %v6130_v56 = vadd.f32 %v2853_v1, %v5712_v37  ;;  %2619 = vmax.xlane.f32.xlu1 %v2618_v57  ;;  %v6133_v10 = vadd.f32 %v2613_v4, %v5712_v37 }
0x1002   : > { %v2608_v55 = vpop.f32.mrb[46].mxu0  ;;  %v2844_v61 = vpop.f32.mrb[34].mxu1 }
0x1003   : > { %v2854_v11 = vmul.f32 0.35355338, %v2844_v61  ;;  %v4688_v58 = vpop.f32.mrb[47].mxu0  ;;  %v4715_v12 = vpop.f32.mrb[35].mxu1  ;;  %v2614_v63 = vmul.f32 0.35355338, %v2608_v55 }
0x1004   : > { %v2859_v15 = vsel %vm1097_vm6, %v6130_v56, -inf  ;;  %v2621_v0 = vsel %vm1097_vm6, %v6133_v10, -inf }
0x1005   : > { %2860 = vmax.xlane.f32.xlu1 %v2859_v15  ;;  %2622 = vmax.xlane.f32.xlu0 %v2621_v0  ;;  %v6140_v16 = vadd.f32 %v2854_v11, %v5712_v37  ;;  %v6145_v7 = vadd.f32 %v2614_v63, %v5712_v37 }
0x1006   : > { %v2849_v8 = vpop.f32.mrb[36].mxu1 }
0x1007   : > { %v2855_v20 = vmul.f32 0.35355338, %v2849_v8  ;;  %v4718_v21 = vpop.f32.mrb[37].mxu1  ;;  %v2862_v22 = vsel %vm1097_vm6, %v6140_v16, -inf  ;;  %v2624_v32 = vsel %vm1097_vm6, %v6145_v7, -inf }
0x1009   : > { %v6148_v25 = vadd.f32 %v2855_v20, %v5712_v37  ;;  %2863 = vmax.xlane.f32.xlu0 %v2862_v22 }
0x100a   : > { %v3080_v26 = vpop.f32.mrb[38].mxu1 }
0x100b   : > { %v3094_v19 = vmul.f32 0.35355338, %v3080_v26  ;;  %v4742_v18 = vpop.f32.mrb[39].mxu1  ;;  %v2865_v31 = vsel %vm1097_vm6, %v6148_v25, -inf }
0x100c   : > { %2866 = vmax.xlane.f32.xlu1 %v2865_v31 }
0x100d   : > { %2625 = vmax.xlane.f32.xlu0 %v2624_v32  ;;  %v6155_v54 = vadd.f32 %v3094_v19, %v5712_v37 }
0x100e   : > { %v3085_v33 = vpop.f32.mrb[40].mxu1 }
0x100f   : > { %v3095_v23 = vmul.f32 0.35355338, %v3085_v33  ;;  %v4745_v34 = vpop.f32.mrb[41].mxu1  ;;  %v3100_v36 = vsel %vm1097_vm6, %v6155_v54, -inf }
0x1011   : > { %v6160_v41 = vadd.f32 %v3095_v23, %v5712_v37  ;;  %3101 = vmax.xlane.f32.xlu0 %v3100_v36 }
0x1012   : > { %v3090_v29 = vpop.f32.mrb[42].mxu1 }
0x1013   : > { %v3096_v38 = vmul.f32 0.35355338, %v3090_v29  ;;  %v4748_v39 = vpop.f32.mrb[43].mxu1  ;;  %v3103_v43 = vsel %vm1097_vm6, %v6160_v41, -inf }
0x1014   : > { %3104 = vmax.xlane.f32.xlu1 %v3103_v43 }
0x1015   : > { %v6165_v28 = vadd.f32 %v3096_v38, %v5712_v37 }
0x1016   : > { %v3321_v44 = vpop.f32.mrb[44].mxu1 }
0x1017   : > { %v3335_v46 = vmul.f32 0.35355338, %v3321_v44  ;;  %v4772_v24 = vpop.f32.mrb[45].mxu1  ;;  %v3106_v47 = vsel %vm1097_vm6, %v6165_v28, -inf }
0x1018   : > { %3107 = vmax.xlane.f32.xlu0 %v3106_v47 }
0x1019   : > { %v6170_v48 = vadd.f32 %v3335_v46, %v5712_v37 }
0x101a   : > { %v3326_v35 = vpop.f32.mrb[46].mxu1 }
0x101b   : > { %v3336_v49 = vmul.f32 0.35355338, %v3326_v35  ;;  %v4775_v51 = vpop.f32.mrb[47].mxu1  ;;  %v3341_v42 = vsel %vm1097_vm6, %v6170_v48, -inf }
0x101c   : > { %3342 = vmax.xlane.f32.xlu1 %v3341_v42 }
0x101d   : > { %v6175_v5 = vadd.f32 %v3336_v49, %v5712_v37 }
0x101e   : > { %v3331_v52 = vpop.f32.mrb[48].mxu1 }
0x101f   : > { %v3337_v59 = vmul.f32 0.35355338, %v3331_v52  ;;  %v4778_v60 = vpop.f32.mrb[49].mxu1  ;;  %v3344_v40 = vsel %vm1097_vm6, %v6175_v5, -inf }
0x1020   : > { %3345 = vmax.xlane.f32.xlu0 %v3344_v40 }
0x1021   : > { %v6180_v62 = vadd.f32 %v3337_v59, %v5712_v37 }
0x1023   : > { %v3347_v45 = vsel %vm1097_vm6, %v6180_v62, -inf }
0x1024   : > { %3348 = vmax.xlane.f32.xlu1 %v3347_v45 }
0x1035   : > { %5059 = vrot.lane.b32.xlu1 %v6042_v14, %s6576_s25 }
0x1036   : > { %2655 = vrot.lane.b32.xlu0 %v6038_v17, %s6576_s25 }
0x103a   : > { %5064 = vrot.lane.b32.xlu0 %v6042_v14, %s6577_s0 }
0x108e   : > { %v2620_v53 = vpop.xlane.xlu1 %2619 }
0x108f   : > { %v2627_v4 = vsub.f32 %v6125_v9, %v2620_v53 }
0x1091   : > { %v2630_v1 = vmul.f32 1.442695, %v2627_v4 }
0x1092   : > { %v2861_v50 = vpop.xlane.xlu1 %2860  ;;  %v2623_v37 = vpop.xlane.xlu0 %2622 }
0x1093   : > { %5205 = vpow2.f32 %v2630_v1  ;;  %v2868_v2 = vsub.f32 %v6130_v56, %v2861_v50  ;;  %v2628_v57 = vsub.f32 %v6133_v10, %v2623_v37 }
0x1095   : > { %v2871_v55 = vmul.f32 1.442695, %v2868_v2  ;;  %v2632_v61 = vmul.f32 1.442695, %v2628_v57 }
0x1096   : > { %v2864_v11 = vpop.xlane.xlu0 %2863 }
0x1097   : > { %5207 = vpow2.f32 %v2871_v55  ;;  %v2869_v58 = vsub.f32 %v6140_v16, %v2864_v11 }
0x1098   : > { %5209 = vpow2.f32 %v2632_v61 }
0x1099   : > { %v2873_v12 = vmul.f32 1.442695, %v2869_v58  ;;  %v2867_v63 = vpop.xlane.xlu1 %2866 }
0x109a   : > { %v2870_v15 = vsub.f32 %v6148_v25, %v2867_v63  ;;  %v2626_v9 = vpop.xlane.xlu0 %2625 }
0x109b   : > { %5211 = vpow2.f32 %v2873_v12  ;;  %v2629_v0 = vsub.f32 %v6145_v7, %v2626_v9 }
0x109c   : > { %v2875_v56 = vmul.f32 1.442695, %v2870_v15 }
0x109d   : > { %v6196_v8 = vpop.eup %5205  ;;  %v2634_v20 = vmul.f32 1.442695, %v2629_v0 }
0x109e   : > { %v3102_v10 = vpop.xlane.xlu0 %3101  ;;  %v2636_v21 = vsel %vm1097_vm6, %v6196_v8, 0.0 }
0x109f   : > { %5213 = vpow2.f32 %v2634_v20  ;;  %v3109_v16 = vsub.f32 %v6155_v54, %v3102_v10  ;;  %2637 = vadd.xlane.f32.xlu0 %v2636_v21 }
0x10a0   : > { %5215 = vpow2.f32 %v2875_v56 }
0x10a1   : > { %v6201_v22 = vpop.eup %5207  ;;  %v3112_v25 = vmul.f32 1.442695, %v3109_v16  ;;  %v3105_v26 = vpop.xlane.xlu1 %3104 }
0x10a2   : > { %v3110_v19 = vsub.f32 %v6160_v41, %v3105_v26  ;;  %v2877_v7 = vsel %vm1097_vm6, %v6201_v22, 0.0  ;;  %v6206_v18 = vpop.eup %5209 }
0x10a3   : > { %2878 = vadd.xlane.f32.xlu1 %v2877_v7  ;;  %5217 = vpow2.f32 %v3112_v25  ;;  %v2639_v23 = vsel %vm1097_vm6, %v6206_v18, 0.0 }
0x10a4   : > { %v3114_v31 = vmul.f32 1.442695, %v3110_v19 }
0x10a5   : > { %v6208_v32 = vpop.eup %5211  ;;  %v3108_v33 = vpop.xlane.xlu0 %3107 }
0x10a6   : > { %5219 = vpow2.f32 %v3114_v31  ;;  %v3111_v54 = vsub.f32 %v6165_v28, %v3108_v33  ;;  %v2880_v34 = vsel %vm1097_vm6, %v6208_v32, 0.0 }
0x10a7   : > { %2640 = vadd.xlane.f32.xlu1 %v2639_v23  ;;  %2881 = vadd.xlane.f32.xlu0 %v2880_v34 }
0x10a8   : > { %v3116_v36 = vmul.f32 1.442695, %v3111_v54 }
0x10a9   : > { %v6215_v41 = vpop.eup %5213  ;;  %v3343_v29 = vpop.xlane.xlu1 %3342 }
0x10aa   : > { %5221 = vpow2.f32 %v3116_v36  ;;  %v3350_v38 = vsub.f32 %v6170_v48, %v3343_v29  ;;  %v2642_v39 = vsel %vm1097_vm6, %v6215_v41, 0.0  ;;  %v6220_v43 = vpop.eup %5215 }
0x10ab   : > { %2643 = vadd.xlane.f32.xlu0 %v2642_v39  ;;  %v2883_v44 = vsel %vm1097_vm6, %v6220_v43, 0.0 }
0x10ac   : > { %v3353_v28 = vmul.f32 1.442695, %v3350_v38 }
0x10ad   : > { %v6224_v46 = vpop.eup %5217  ;;  %v3346_v60 = vpop.xlane.xlu0 %3345 }
0x10ae   : > { %5223 = vpow2.f32 %v3353_v28  ;;  %v3118_v35 = vsel %vm1097_vm6, %v6224_v46, 0.0  ;;  %v3351_v1 = vsub.f32 %v6175_v5, %v3346_v60 }
0x10af   : > { %2884 = vadd.xlane.f32.xlu0 %v2883_v44 }
0x10b0   : > { %v6226_v24 = vpop.eup %5219  ;;  %v3355_v37 = vmul.f32 1.442695, %v3351_v1 }
0x10b1   : > { %v3349_v47 = vpop.xlane.xlu1 %3348  ;;  %v3121_v48 = vsel %vm1097_vm6, %v6226_v24, 0.0  ;;  %v2656_v4 = vpop.permute.xlu0 %2655 }
0x10b2   : > { %3122 = vadd.xlane.f32.xlu1 %v3121_v48  ;;  %v3352_v50 = vsub.f32 %v6180_v62, %v3349_v47  ;;  %5225 = vpow2.f32 %v3355_v37 }
0x10b3   : > { %3119 = vadd.xlane.f32.xlu0 %v3118_v35 }
0x10b4   : > { %v6232_v49 = vpop.eup %5221  ;;  %v3357_v2 = vmul.f32 1.442695, %v3352_v50 }
0x10b5   : > { %v5060_v51 = vpop.permute.xlu1 %5059  ;;  %v3124_v42 = vsel %vm1097_vm6, %v6232_v49, 0.0  ;;  %v5065_v5 = vpop.permute.xlu0 %5064 }
0x10b6   : > { %v5062_v52 = vunpack.i.h.bf16 %v5060_v51  ;;  %v5061_v59 = vunpack.i.l.bf16 %v5060_v51  ;;  %5227 = vpow2.f32 %v3357_v2  ;;  %v5067_v15 = vunpack.i.h.bf16 %v5065_v5 }
0x10b7   : > { %3125 = vadd.xlane.f32.xlu0 %v3124_v42  ;;  %v5066_v9 = vunpack.i.l.bf16 %v5065_v5 }
0x10b8   : > { %v6236_v40 = vpop.eup %5223  ;;  %v4893_v45 = vpack.c.bf16 %v5062_v52, %v5061_v59 }
0x10b9   : > { %v3359_v53 = vsel %vm1097_vm6, %v6236_v40, 0.0  ;;  %v4900_v10 = vpack.c.bf16 %v5067_v15, %v5066_v9 }
0x10ba   : > { %4894 = vmatpush3.bf16.msra.mxu0 %v4893_v45  ;;  %3360 = vadd.xlane.f32.xlu1 %v3359_v53 }
0x10bb   : > { %4693 = vmatprep.subr.mxu0 %v5339_v6 }
0x10bc   : > { %v6248_v57 = vpop.eup %5225 }
0x10bd   : > { %v3362_v61 = vsel %vm1097_vm6, %v6248_v57, 0.0 }
0x10be   : > { %4694 = vmatpush3.msra.mxu0 %v2656_v4 }
0x10bf   : > { %4899 = vmatprep.subr.bf16.mxu0 %v5337_v3 }
0x10c0   : > { %v6250_v55 = vpop.eup %5227 }
0x10c1   : > { %v3365_v11 = vsel %vm1097_vm6, %v6250_v55, 0.0 }
0x10cb   : > { %2896 = vrot.lane.b32.xlu1 %v6038_v17, %s6577_s0  ;;  %s674_s0 = sand.u32 1, %s5327_s28  }
0x10cc   : > { %s675_s24 = scalar_lea.vmem [#allocation2], %s674_s0 }
0x10cd   : > { %5069 = vrot.lane.b32.xlu0 %v6042_v14, %s6578_s2  ;;  %s4078_s29 = sshll.u32 %s675_s24, 4  ;;  %s6440_s29 = int_to_ptr.vmem [resolvable:$true] %s4078_s29 }
0x10ec   : > { %3363 = vadd.xlane.f32.xlu0 %v3362_v61 }
0x10ef   : > { %3366 = vadd.xlane.f32.xlu1 %v3365_v11 }
0x1102   : > { %3137 = vrot.lane.b32.xlu0 %v6038_v17, %s6578_s2  ;;  %s6582_s2 = smov 24  }
0x1106   : > { %5074 = vrot.lane.b32.xlu0 %v6042_v14, %s6579_s1 }
0x110a   : > { %3378 = vrot.lane.b32.xlu0 %v6038_v17, %s6579_s1  ;;  %s5273_s1 = scalar_lea.vmem %s6440_s29, 16 }
0x110b   : > { %p5274_p11 = scmp.ne.s32.totalorder %s6440_s29, %s5273_s1 }
0x110d   : > { %p5275_p12 = pnand %p5274_p11, %p5509_p5 }
0x110f   : > { %p5276_p13 = pneg %p5275_p12 }
0x112c   : > { %v2638_v62 = vpop.xlane.xlu0 %2637 }
0x112d   : > { %5229 = vrcp.f32 %v2638_v62 }
0x1130   : > { %v2879_v58 = vpop.xlane.xlu1 %2878 }
0x1134   : > { %v2641_v12 = vpop.xlane.xlu1 %2640  ;;  %v2882_v63 = vpop.xlane.xlu0 %2881 }
0x1135   : > { %5231 = vrcp.f32 %v2641_v12 }
0x1137   : > { %v5230_v0 = vpop.eup %5229 }
0x1138   : > { %v2648_v56 = vmul.f32 %v5230_v0, %v6196_v8  ;;  %v2644_v20 = vpop.xlane.xlu0 %2643 }
0x1139   : > { %5233 = vrcp.f32 %v2644_v20 }
0x113a   : > { %4696 = vmatmul.mubr.msk.f32.vlgmr.msra.gmra.mrb[48].mxu0 %vm1097_vm6, %v2648_v56  ;;  %5235 = vrcp.f32 %v2879_v58 }
0x113b   : > { %4901 = vmatpush3.bf16.msra.mxu0 %v4900_v10  ;;  %4698 = vmatprep.mubr.msk.f32.mxu0 %vm5338_vm0, %v5339_v6  ;;  %5237 = vrcp.f32 %v2882_v63 }
0x113c   : > { %v2885_v17 = vpop.xlane.xlu0 %2884  ;;  %4723 = vmatprep.subr.mxu0 %v5339_v6 }
0x113d   : > { %5239 = vrcp.f32 %v2885_v17 }
0x113f   : > { %v5232_v14 = vpop.eup %5231  ;;  %v3123_v25 = vpop.xlane.xlu1 %3122 }
0x1140   : > { %v3120_v21 = vpop.xlane.xlu0 %3119  ;;  %v2649_v16 = vmul.f32 %v5232_v14, %v6206_v18  ;;  %v5110_v14 = vld [vmem:[%s6489_s9 + $0x18] sm:$0xff]  }
0x1141   : > { %5241 = vrcp.f32 %v3120_v21 }
0x1142   : > { %4699 = vmatmul.mubr.msk.f32.gmra.mrb[50].mxu0 %vm1097_vm6, %v2649_v16  ;;  %5243 = vrcp.f32 %v3123_v25 }
0x1143   : > { %v5234_v8 = vpop.eup %5233  ;;  %4701 = vmatprep.mubr.msk.f32.mxu0 %vm5338_vm0, %v5339_v6 }
0x1144   : > { %v3126_v26 = vpop.xlane.xlu0 %3125  ;;  %v2650_v19 = vmul.f32 %v5234_v8, %v6215_v41  ;;  %v5236_v31 = vpop.eup %5235 }
0x1145   : > { %v2889_v23 = vmul.f32 %v5236_v31, %v6201_v22  ;;  %v5238_v36 = vpop.eup %5237  ;;  %5245 = vrcp.f32 %v3126_v26 }
0x1146   : > { %4702 = vmatmul.mubr.msk.f32.gmra.mrb[52].mxu0 %vm1097_vm6, %v2650_v19  ;;  %v2890_v41 = vmul.f32 %v5238_v36, %v6208_v32 }
0x1147   : > { %v3361_v7 = vpop.xlane.xlu1 %3360  ;;  %4725 = vmatprep.mubr.msk.f32.mxu0 %vm5338_vm0, %v5339_v6  ;;  %v5240_v38 = vpop.eup %5239 }
0x1148   : > { %v5070_v18 = vpop.permute.xlu0 %5069  ;;  %v2891_v22 = vmul.f32 %v5240_v38, %v6220_v43  ;;  %5247 = vrcp.f32 %v3361_v7 }
0x1149   : > { %v5072_v33 = vunpack.i.h.bf16 %v5070_v18  ;;  %v5071_v54 = vunpack.i.l.bf16 %v5070_v18 }
0x114b   : > { %v2897_v34 = vpop.permute.xlu1 %2896  ;;  %v4907_v29 = vpack.c.bf16 %v5072_v33, %v5071_v54  ;;  %v5242_v32 = vpop.eup %5241 }
0x114c   : > { %4724 = vmatpush3.msra.mxu0 %v2897_v34  ;;  %v3130_v28 = vmul.f32 %v5242_v32, %v6224_v46  ;;  %v5244_v47 = vpop.eup %5243 }
0x114d   : > { %4726 = vmatmul.mubr.msk.f32.vlgmr.msra.gmra.mrb[54].mxu0 %vm1097_vm6, %v2889_v23  ;;  %4906 = vmatprep.subr.bf16.mxu0 %v5337_v3  ;;  %v3131_v35 = vmul.f32 %v5244_v47, %v6226_v24 }
0x114e   : > { %4908 = vmatpush3.bf16.msra.mxu0 %v4907_v29  ;;  %4728 = vmatprep.mubr.msk.f32.mxu0 %vm5338_vm0, %v5339_v6 }
0x114f   : > { %4753 = vmatprep.subr.mxu0 %v5339_v6  ;;  %v5246_v51 = vpop.eup %5245 }
0x1150   : > { %v3132_v59 = vmul.f32 %v5246_v51, %v6232_v49 }
0x1151   : > { %4729 = vmatmul.mubr.msk.f32.gmra.mrb[56].mxu0 %vm1097_vm6, %v2890_v41 }
0x1152   : > { %4731 = vmatprep.mubr.msk.f32.mxu0 %vm5338_vm0, %v5339_v6  ;;  %v5248_v60 = vpop.eup %5247 }
0x1153   : > { %v3371_v24 = vmul.f32 %v5248_v60, %v6236_v40 }
0x1155   : > { %4732 = vmatmul.mubr.msk.f32.gmra.mrb[58].mxu0 %vm1097_vm6, %v2891_v22 }
0x1156   : > { %4755 = vmatprep.mubr.msk.f32.mxu0 %vm5338_vm0, %v5339_v6 }
0x1179   : > { %v3364_v39 = vpop.xlane.xlu0 %3363 }
0x117a   : > { %5249 = vrcp.f32 %v3364_v39 }
0x117c   : > { %v3367_v43 = vpop.xlane.xlu1 %3366 }
0x117d   : > { %v3138_v44 = vpop.permute.xlu0 %3137  ;;  %5251 = vrcp.f32 %v3367_v43 }
0x117e   : > { %4754 = vmatpush3.msra.mxu0 %v3138_v44 }
0x117f   : > { %4756 = vmatmul.mubr.msk.f32.vlgmr.msra.gmra.mrb[60].mxu0 %vm1097_vm6, %v3130_v28  ;;  %4913 = vmatprep.subr.bf16.mxu0 %v5337_v3 }
0x1180   : > { %4758 = vmatprep.mubr.msk.f32.mxu0 %vm5338_vm0, %v5339_v6 }
0x1181   : > { %v5075_v48 = vpop.permute.xlu0 %5074 }
0x1182   : > { %v5077_v42 = vunpack.i.h.bf16 %v5075_v48  ;;  %v5076_v52 = vunpack.i.l.bf16 %v5075_v48 }
0x1183   : > { %4759 = vmatmul.mubr.msk.f32.gmra.mrb[62].mxu0 %vm1097_vm6, %v3131_v35 }
0x1184   : > { %v4914_v46 = vpack.c.bf16 %v5077_v42, %v5076_v52  ;;  %4761 = vmatprep.mubr.msk.f32.mxu0 %vm5338_vm0, %v5339_v6  ;;  %v5250_v53 = vpop.eup %5249 }
0x1185   : > { %v3379_v45 = vpop.permute.xlu0 %3378  ;;  %v3372_v49 = vmul.f32 %v5250_v53, %v6248_v57 }
0x1186   : > { %4915 = vmatpush3.bf16.msra.mxu0 %v4914_v46 }
0x1187   : > { %4762 = vmatmul.mubr.msk.f32.gmra.mrb[64].mxu0 %vm1097_vm6, %v3132_v59  ;;  %4783 = vmatprep.subr.mxu0 %v5339_v6  ;;  %v5252_v4 = vpop.eup %5251 }
0x1188   : > { %4785 = vmatprep.mubr.msk.f32.mxu0 %vm5338_vm0, %v5339_v6  ;;  %v3373_v1 = vmul.f32 %v5252_v4, %v6250_v55  ;;  %v5109_v55 = vld [vmem:[%s6489_s9 + $0x10] sm:$0xff]  }
0x1189   : > { %4794 = vmatprep.subr.bf16.mxu1 %v5109_v55 }
0x118a   : > { %4784 = vmatpush3.msra.mxu0 %v3379_v45  ;;  %4795 = vmatpush3.bf16.msra.mxu1 %v5109_v55 }
0x118b   : > { %4786 = vmatmul.mubr.msk.f32.vlgmr.msra.gmra.mrb[66].mxu0 %vm1097_vm6, %v3371_v24  ;;  %4796 = vmatprep.subr.bf16.mxu1 %v5110_v14  ;;  %v4269_v24 = vld [vmem:[%s6490_s10 + $0x1] ss:$0 sm:$0xff] }
0x118c   : > { %4788 = vmatprep.mubr.msk.f32.mxu0 %vm5338_vm0, %v5339_v6 }
0x118e   : > { %4797 = vmatpush3.bf16.msra.mxu1 %v5110_v14  ;;  %v5112_v14 = vld [vmem:[%s6493_s13 + $0x18] sm:$0xff]  }
0x118f   : > { %4789 = vmatmul.mubr.msk.f32.gmra.mrb[68].mxu0 %vm1097_vm6, %v3372_v49 }
0x1190   : > { %4791 = vmatprep.mubr.msk.f32.mxu0 %vm5338_vm0, %v5339_v6 }
0x1193   : > { %4792 = vmatmul.mubr.msk.f32.gmra.mrb[70].mxu0 %vm1097_vm6, %v3373_v1 }
0x120d   : > { %v2735_v40 = vpop.f32.mrb[48].mxu0 }
0x120e   : > { %v4697_v50 = vpop.f32.mrb[49].mxu0 }
0x1215   : > { %v2740_v37 = vpop.f32.mrb[50].mxu0 }
0x1216   : > { %v4700_v2 = vpop.f32.mrb[51].mxu0 }
0x1219   : > { %v2745_v61 = vpop.f32.mrb[52].mxu0 }
0x121a   : > { %v4703_v11 = vpop.f32.mrb[53].mxu0 }
0x1220   : > { %v2976_v5 = vpop.f32.mrb[54].mxu0 }
0x1221   : > { %v4727_v62 = vpop.f32.mrb[55].mxu0 }
0x1224   : > { %v2981_v58 = vpop.f32.mrb[56].mxu0 }
0x1225   : > { %v5078_v57 = vpack.i.bf16 %v2981_v58, %v2976_v5  ;;  %v4730_v12 = vpop.f32.mrb[57].mxu0 }
0x1227   : > { %5079 = vrot.lane.b32.xlu0 %v5078_v57, %s6580_s3 }
0x1228   : > { %v2986_v63 = vpop.f32.mrb[58].mxu0 }
0x1229   : > { %v4733_v15 = vpop.f32.mrb[59].mxu0 }
0x122b   : > { %3479 = vrot.lane.b32.xlu0 %v2986_v63, %s6580_s3  ;;  %s4315_s3 = sshll.u32 %s5492_s4, 4  ;;  %s5355_s4 = smov [#allocation2]  }
0x122c   : > { %s6438_s5 = scalar_lea.hbm %s6502_s22, %s4315_s3  ;;  %s5277_s7 = sshll.u32 %s5355_s4, 4  ;;  %s5278_s7 = int_to_ptr.vmem [resolvable:$false] %s5277_s7 }
0x122d   : > { %s5279_s8 = scalar_lea.vmem %s5278_s7, 32  ;;  %p5280_p0 = scmp.lt.s32.totalorder %s6440_s29, %s5278_s7 }
0x122e   : > { %p5281_p1 = scmp.lt.s32.totalorder %s5279_s8, %s5273_s1 }
0x1230   : > { %p5282_p2 = por %p5281_p1, %p5280_p0 }
0x1232   : > { %p5283_p3 = pnand %p5282_p2, %p5276_p13 }
0x1252   : > { %v3217_v9 = vpop.f32.mrb[60].mxu0 }
0x1253   : > { %v4757_v0 = vpop.f32.mrb[61].mxu0 }
0x1256   : > { %v3222_v56 = vpop.f32.mrb[62].mxu0 }
0x1257   : > { %v5083_v20 = vpack.i.bf16 %v3222_v56, %v3217_v9  ;;  %v4760_v10 = vpop.f32.mrb[63].mxu0 }
0x1259   : > { %5084 = vrot.lane.b32.xlu1 %v5083_v20, %s6581_s26 }
0x125a   : > { %v3227_v17 = vpop.f32.mrb[64].mxu0 }
0x125b   : > { %3491 = vrot.lane.b32.xlu0 %v3227_v17, %s6581_s26  ;;  %v4763_v21 = vpop.f32.mrb[65].mxu0  ;;  %v5111_v17 = vld [vmem:[%s6493_s13 + $0x10] sm:$0xff]  }
0x125c   : > { %4802 = vmatprep.subr.bf16.mxu0 %v5111_v17 }
0x125d   : > { %4803 = vmatpush3.bf16.msra.mxu0 %v5111_v17 }
0x125e   : > { %v3458_v16 = vpop.f32.mrb[66].mxu0  ;;  %4804 = vmatprep.subr.bf16.mxu0 %v5112_v14 }
0x125f   : > { %v4787_v8 = vpop.f32.mrb[67].mxu0 }
0x1261   : > { %4805 = vmatpush3.bf16.msra.mxu0 %v5112_v14 }
0x1262   : > { %v3463_v25 = vpop.f32.mrb[68].mxu0  ;;  %4916 = vmatprep.subr.bf16.mxu0 %v5337_v3 }
0x1263   : > { %v5088_v26 = vpack.i.bf16 %v3463_v25, %v3458_v16  ;;  %v4790_v19 = vpop.f32.mrb[69].mxu0 }
0x1265   : > { %5089 = vrot.lane.b32.xlu0 %v5088_v26, %s6582_s2 }
0x1266   : > { %v3468_v7 = vpop.f32.mrb[70].mxu0 }
0x1267   : > { %v4793_v31 = vpop.f32.mrb[71].mxu0 }
0x1269   : > { %3503 = vrot.lane.b32.xlu0 %v3468_v7, %s6582_s2  ;;  %s4066_s2 = scalar_lea.sflag [#allocation3], %s674_s0 }
0x1299   : > { %v5080_v18 = vpop.permute.xlu0 %5079 }
0x129a   : > { %v5082_v34 = vunpack.i.h.bf16 %v5080_v18  ;;  %v5081_v36 = vunpack.i.l.bf16 %v5080_v18 }
0x129c   : > { %v3509_v22 = vsel %vm998_vm3, %v2740_v37, %v5082_v34  ;;  %v3508_v39 = vsel %vm998_vm3, %v2735_v40, %v5081_v36 }
0x129d   : > { %v3480_v33 = vpop.permute.xlu0 %3479 }
0x129e   : > { %v3510_v43 = vsel %vm998_vm3, %v2745_v61, %v3480_v33 }
0x12cb   : > { %v5085_v54 = vpop.permute.xlu1 %5084 }
0x12cc   : > { %v5087_v29 = vunpack.i.h.bf16 %v5085_v54  ;;  %v5086_v41 = vunpack.i.l.bf16 %v5085_v54 }
0x12cd   : > { %v3492_v23 = vpop.permute.xlu0 %3491 }
0x12ce   : > { %v3512_v44 = vsel %vm1991_vm7, %v3509_v22, %v5087_v29  ;;  %v3511_v47 = vsel %vm1991_vm7, %v3508_v39, %v5086_v41  ;;  %v3513_v51 = vsel %vm1991_vm7, %v3510_v43, %v3492_v23  ;;  %v4272_v23 = vld [vmem:[%s6491_s11 + $0x1] ss:$0 sm:$0xff] }
0x12cf   : > { %v4273_v22 = vld [vmem:[%s6492_s12 + $0x1] ss:$0 sm:$0xff] }
0x12d7   : > { %v5090_v38 = vpop.permute.xlu0 %5089 }
0x12d8   : > { %v5092_v32 = vunpack.i.h.bf16 %v5090_v38  ;;  %v5091_v28 = vunpack.i.l.bf16 %v5090_v38 }
0x12da   : > { %v3515_v48 = vsel %vm1097_vm6, %v3512_v44, %v5092_v32  ;;  %v3514_v35 = vsel %vm1097_vm6, %v3511_v47, %v5091_v28 }
0x12db   : > { %v3517_v42 = vpack.c.bf16 %v3515_v48, %v3514_v35  ;;  %v3504_v52 = vpop.permute.xlu0 %3503  ;;  %v5113_v35 = vld [vmem:[%s6495_s15 + $0x40] sm:$0xff]  }
0x12dc   : > { %v3516_v46 = vsel %vm1097_vm6, %v3513_v51, %v3504_v52  ;;  %4810 = vmatprep.subr.bf16.mxu1 %v5113_v35  ;;  %v5114_v51 = vld [vmem:[%s6495_s15 + $0x48] sm:$0xff]   ;;  %v5116_v52 = vld [vmem:[%s6495_s15 + $0x58] sm:$0xff]  }
0x12dd   : > { %v3518_v59 = vpack.c.bf16 %v3516_v46, %v3516_v46  ;;  %4798 = vmatprep.mubr.msk.bf16.mxu1 %vm788_vm2, %v3517_v42  ;;  %v5115_v42 = vld [vmem:[%s6495_s15 + $0x50] sm:$0xff]   ;;  %v5117_v46 = vld [vmem:[%s6495_s15 + $0x60] sm:$0xff]  }
0x12df   : > { %4799 = vmatmul.mubr.msk.bf16.vlgmr.msra.gmra.mrb[52].mxu1 %vm788_vm2, %v3518_v59  ;;  %v5118_v59 = vld [vmem:[%s6495_s15 + $0x68] sm:$0xff]  }
0x12e0   : > { %4811 = vmatpush3.bf16.msra.mxu1 %v5113_v35  ;;  %v3893_v35 = vld [vmem:[%s6498_s18] sm:$0x1] }
0x12e1   : > { %4812 = vmatprep.subr.bf16.mxu1 %v5114_v51 }
0x12e4   : > { %4813 = vmatpush3.bf16.msra.mxu1 %v5114_v51 }
0x12e5   : > { %4814 = vmatprep.subr.bf16.mxu1 %v5115_v42 }
0x12e8   : > { %4815 = vmatpush3.bf16.msra.mxu1 %v5115_v42 }
0x12e9   : > { %4816 = vmatprep.subr.bf16.mxu1 %v5116_v52 }
0x12ec   : > { %4817 = vmatpush3.bf16.msra.mxu1 %v5116_v52 }
0x12ed   : > { %4818 = vmatprep.subr.bf16.mxu1 %v5117_v46 }
0x12f0   : > { %4819 = vmatpush3.bf16.msra.mxu1 %v5117_v46 }
0x12f1   : > { %4820 = vmatprep.subr.bf16.mxu1 %v5118_v59 }
0x12f4   : > { %4821 = vmatpush3.bf16.msra.mxu1 %v5118_v59 }
0x13b2   : > { %v4800_v60 = vpop.f32.mrb[52].mxu1 }
0x13b3   : > { %v3576_v45 = vpop.f32.mrb[53].mxu1  ;;  %v3592_v53 = vadd.f32 %v4800_v60, %v6001_v13  ;;  %v5119_v60 = vld [vmem:[%s6495_s15 + $0x70] sm:$0xff]  }
0x13b4   : > { %v3590_v49 = vadd.f32 %v3576_v45, %v5998_v27  ;;  %v4801_v4 = vpop.f32.mrb[54].mxu1  ;;  %4822 = vmatprep.subr.bf16.mxu1 %v5119_v60  ;;  %v4279_v45 = vld [vmem:[%s6494_s14 + $0x1] ss:$0 sm:$0xff] }
0x13b5   : > { %v3579_v1 = vpop.f32.mrb[55].mxu1  ;;  %v3603_v37 = vadd.f32 %v4269_v24, %v3592_v53  ;;  %4823 = vmatpush3.bf16.msra.mxu1 %v5119_v60  ;;  %v3989_v60 = vld [vmem:[%s6501_s21] sm:$0x1] }
0x13b6   : > { %v6341_v40 = vadd.f32 %v4269_v24, %v3590_v49  ;;  %v3591_v50 = vadd.f32 %v3579_v1, %v6004_v30 }
0x13b7   : > { %v3614_v5 = vsel %vm788_vm2, %v3603_v37, 0.0 }
0x13b8   : > { %v3602_v2 = vadd.f32 %v4269_v24, %v3591_v50  ;;  %v3608_v61 = vsel %vm788_vm2, %v6341_v40, 0.0  ;;  %v5120_v24 = vld [vmem:[%s6495_s15 + $0x78] sm:$0xff]  }
0x13b9   : > { %3609 = vadd.xlane.f32.xlu0 %v3608_v61  ;;  %4824 = vmatprep.subr.bf16.mxu1 %v5120_v24 }
0x13ba   : > { %v3611_v11 = vsel %vm788_vm2, %v3602_v2, 0.0  ;;  %4825 = vmatpush3.bf16.msra.mxu1 %v5120_v24 }
0x13bb   : > { %3612 = vadd.xlane.f32.xlu1 %v3611_v11 }
0x13bd   : > { %3615 = vadd.xlane.f32.xlu0 %v3614_v5 }
0x1446   : > { %v3610_v13 = vpop.xlane.xlu0 %3609 }
0x1447   : > { %v3617_v27 = vmul.f32 0.03125, %v3610_v13 }
0x1448   : > { %v3613_v62 = vpop.xlane.xlu1 %3612 }
0x1449   : > { %v3620_v58 = vsub.f32 %v6341_v40, %v3617_v27  ;;  %v3618_v57 = vmul.f32 0.03125, %v3613_v62 }
0x144a   : > { %v3616_v12 = vpop.xlane.xlu0 %3615 }
0x144b   : > { %v3621_v30 = vsub.f32 %v3602_v2, %v3618_v57  ;;  %v3619_v63 = vmul.f32 0.03125, %v3616_v12  ;;  %v3623_v15 = vmul.f32 %v3620_v58, %v3620_v58 }
0x144d   : > { %v3622_v55 = vsub.f32 %v3603_v37, %v3619_v63  ;;  %v3626_v9 = vsel %vm788_vm2, %v3623_v15, 0.0  ;;  %v3624_v0 = vmul.f32 %v3621_v30, %v3621_v30 }
0x144e   : > { %3627 = vadd.xlane.f32.xlu0 %v3626_v9 }
0x144f   : > { %v3625_v56 = vmul.f32 %v3622_v55, %v3622_v55  ;;  %v3629_v10 = vsel %vm788_vm2, %v3624_v0, 0.0 }
0x1451   : > { %v3632_v20 = vsel %vm788_vm2, %v3625_v56, 0.0 }
0x1452   : > { %3633 = vadd.xlane.f32.xlu1 %v3632_v20  ;;  %3630 = vadd.xlane.f32.xlu0 %v3629_v10 }
0x14db   : > { %v3628_v21 = vpop.xlane.xlu0 %3627 }
0x14dc   : > { %v3635_v16 = vmul.f32 0.03125, %v3628_v21  ;;  %v4304_v21 = vld [vmem:[%s6496_s16 + $0x1] ss:$0 sm:$0xff] }
0x14de   : > { %v3638_v8 = vadd.f32 1e-05, %v3635_v16 }
0x14df   : > { %v3631_v25 = vpop.xlane.xlu0 %3630  ;;  %v3634_v26 = vpop.xlane.xlu1 %3633 }
0x14e0   : > { %5253 = vrsqrt.f32 %v3638_v8  ;;  %v3636_v19 = vmul.f32 0.03125, %v3631_v25  ;;  %v3637_v7 = vmul.f32 0.03125, %v3634_v26 }
0x14e2   : > { %v3639_v31 = vadd.f32 1e-05, %v3636_v19  ;;  %v3640_v18 = vadd.f32 1e-05, %v3637_v7 }
0x14e4   : > { %5255 = vrsqrt.f32 %v3639_v31 }
0x14e5   : > { %5257 = vrsqrt.f32 %v3640_v18 }
0x14ea   : > { %v5254_v33 = vpop.eup %5253 }
0x14eb   : > { %v3644_v54 = vmul.f32 %v5254_v33, %v3620_v58 }
0x14ed   : > { %v3653_v41 = vmul.f32 %v4272_v23, %v3644_v54 }
0x14ee   : > { %v5256_v34 = vpop.eup %5255 }
0x14ef   : > { %v5258_v36 = vpop.eup %5257  ;;  %v3645_v29 = vmul.f32 %v5256_v34, %v3621_v30  ;;  %v3662_v28 = vadd.f32 %v4273_v22, %v3653_v41 }
0x14f0   : > { %v3646_v38 = vmul.f32 %v5258_v36, %v3622_v55  ;;  %v3910_v36 = vld [vmem:[%s6499_s19] sm:$0xff] }
0x14f1   : > { %v3654_v39 = vmul.f32 %v4272_v23, %v3645_v29  ;;  %v3911_v29 = vld [vmem:[%s6499_s19 + $0x8] sm:$0xff] }
0x14f2   : > { %v3655_v32 = vmul.f32 %v4272_v23, %v3646_v38  ;;  %v4917_v41 = vpack.c.bf16 %v3911_v29, %v3910_v36  ;;  %v3913_v38 = vld [vmem:[%s6499_s19 + $0x18] sm:$0xff] }
0x14f3   : > { %v3663_v44 = vadd.f32 %v4273_v22, %v3654_v39 }
0x14f4   : > { %v3664_v47 = vadd.f32 %v4273_v22, %v3655_v32 }
0x14f5   : > { %v3665_v43 = vpack.c.bf16 %v3663_v44, %v3662_v28 }
0x14f6   : > { %v3666_v48 = vpack.c.bf16 %v3664_v47, %v3664_v47  ;;  %v3892_v47 = vld [vmem:[%s6497_s17] sm:$0x1] }
0x14f7   : > { %4806 = vmatprep.mubr.msk.bf16.mxu0 %vm788_vm2, %v3665_v43 }
0x14f8   : > { %4807 = vmatmul.mubr.msk.bf16.vlgmr.msra.gmra.mrb[72].mxu0 %vm788_vm2, %v3666_v48  ;;  %v3987_v48 = vld [vmem:[%s6500_s20] sm:$0xff] }
0x14f9   : > { %4838 = vmatprep.mubr.msk.f32.mxu0 %vm5338_vm0, %v5339_v6  ;;  %4918 = vmatpush3.bf16.msra.mxu0 %v4917_v41 }
0x14fa   : > { %4919 = vmatprep.subr.bf16.mxu0 %v5337_v3 }
0x15cb   : > { %v4808_v53 = vpop.f32.mrb[72].mxu0 }
0x15cc   : > { %v3741_v49 = vadd.f32 %v4808_v53, %v4279_v45  ;;  %v3732_v4 = vpop.f32.mrb[73].mxu0 }
0x15cd   : > { %v3733_v1 = vadd.f32 %v4279_v45, %v3732_v4  ;;  %v4809_v50 = vpop.f32.mrb[74].mxu0 }
0x15ce   : > { %v4286_v37 = vmul.f32 -1.702, %v3741_v49  ;;  %v3735_v2 = vpop.f32.mrb[75].mxu0 }
0x15cf   : > { %v4284_v61 = vmul.f32 -1.702, %v3733_v1  ;;  %v3736_v11 = vadd.f32 %v4279_v45, %v3735_v2 }
0x15d0   : > { %v3756_v5 = vmul.f32 1.442695, %v4286_v37 }
0x15d1   : > { %v3752_v13 = vmul.f32 1.442695, %v4284_v61  ;;  %v4285_v27 = vmul.f32 -1.702, %v3736_v11 }
0x15d2   : > { %5259 = vpow2.f32 %v3756_v5 }
0x15d3   : > { %5261 = vpow2.f32 %v3752_v13  ;;  %v3754_v62 = vmul.f32 1.442695, %v4285_v27 }
0x15d5   : > { %5263 = vpow2.f32 %v3754_v62 }
0x15dc   : > { %v5260_v58 = vpop.eup %5259 }
0x15dd   : > { %v5262_v57 = vpop.eup %5261  ;;  %v3760_v12 = vadd.f32 1.0, %v5260_v58 }
0x15de   : > { %v3758_v30 = vadd.f32 1.0, %v5262_v57 }
0x15df   : > { %v5264_v63 = vpop.eup %5263  ;;  %5265 = vrcp.f32 %v3760_v12 }
0x15e0   : > { %5267 = vrcp.f32 %v3758_v30  ;;  %v3759_v15 = vadd.f32 1.0, %v5264_v63 }
0x15e2   : > { %5269 = vrcp.f32 %v3759_v15 }
0x15e9   : > { %v5266_v55 = vpop.eup %5265 }
0x15ea   : > { %v5268_v9 = vpop.eup %5267  ;;  %v3769_v56 = vmul.f32 %v5266_v55, %v3741_v49 }
0x15eb   : > { %v3767_v20 = vmul.f32 %v5268_v9, %v3733_v1 }
0x15ec   : > { %v5270_v0 = vpop.eup %5269  ;;  %v3771_v14 = vpack.c.bf16 %v3769_v56, %v3769_v56 }
0x15ed   : > { %v3768_v10 = vmul.f32 %v5270_v0, %v3736_v11 }
0x15ef   : > { %v3770_v17 = vpack.c.bf16 %v3768_v10, %v3767_v20 }
0x15f1   : > { %4826 = vmatprep.mubr.bf16.mxu1 %v3770_v17 }
0x15f2   : > { %4827 = vmatmul.mubr.bf16.vlgmr.msra.gmra.mrb[56].mxu1 %v3771_v14 }
0x16c5   : > { %v4828_v16 = vpop.f32.mrb[56].mxu1 }
0x16c6   : > { %v3879_v8 = vpop.f32.mrb[57].mxu1 }
0x16c7   : > { %v3880_v25 = vadd.f32 %v4304_v21, %v3879_v8  ;;  %v4829_v26 = vpop.f32.mrb[58].mxu1 }
0x16c8   : > { %v3882_v19 = vpop.f32.mrb[59].mxu1 }
0x16c9   : > { %v3891_v7 = vadd.f32 %v3880_v25, %v6341_v40  ;;  %v3912_v40 = vld [vmem:[%s6499_s19 + $0x10] sm:$0xff] }
0x16ca   : > { %v4920_v22 = vpack.c.bf16 %v3913_v38, %v3912_v40 }
0x16cb   : > { %v3895_v31 = vsel %vm3894_vm8, %v3891_v7, 0.0 }
0x16cc   : > { %3896 = vadd.xlane.f32.xlu0 %v3895_v31  ;;  %4921 = vmatpush3.bf16.msra.mxu0 %v4920_v22 }
0x16cd   : > { %4922 = vmatprep.subr.bf16.mxu0 %v5337_v3  ;;  %v3988_v3 = vld [vmem:[%s6500_s20 + $0x8] sm:$0xff] }
0x16ce   : > { %v4923_v42 = vpack.c.bf16 %v3988_v3, %v3987_v48 }
0x1759   : > { %v3897_v18 = vpop.xlane.xlu0 %3896 }
0x175a   : > { %v3898_v33 = vmul.f32 0.03125, %v3897_v18 }
0x175c   : > { %v3899_v54 = vsub.f32 %v3891_v7, %v3898_v33 }
0x175e   : > { %v3900_v23 = vmul.f32 %v3899_v54, %v3899_v54 }
0x1760   : > { %v3901_v34 = vsel %vm3894_vm8, %v3900_v23, 0.0 }
0x1761   : > { %3902 = vadd.xlane.f32.xlu1 %v3901_v34 }
0x17ee   : > { %v3903_v39 = vpop.xlane.xlu1 %3902 }
0x17ef   : > { %v3904_v32 = vmul.f32 0.03125, %v3903_v39 }
0x17f1   : > { %v3905_v28 = vadd.f32 1e-05, %v3904_v32 }
0x17f3   : > { %5271 = vrsqrt.f32 %v3905_v28 }
0x17fd   : > { %v5272_v44 = vpop.eup %5271 }
0x17fe   : > { %v3907_v43 = vmul.f32 %v5272_v44, %v3899_v54 }
0x1800   : > { %v3908_v51 = vmul.f32 %v3907_v43, %v3892_v47 }
0x1802   : > { %v3909_v52 = vadd.f32 %v3908_v51, %v3893_v35 }
0x1804   : > { %4839 = vmatmul.mubr.msk.f32.vlgmr.msra.gmra.mrb[76].mxu0 %vm788_vm2, %v3909_v52 }
0x1805   : > { %4924 = vmatpush3.bf16.msra.mxu0 %v4923_v42  ;;  %4845 = vmatprep.mubr.msk.f32.mxu0 %vm5338_vm0, %v5339_v6 }
0x18d7   : > { %v3983_v46 = vpop.f32.mrb[76].mxu0 }
0x18d8   : > { %v4840_v59 = vpop.f32.mrb[77].mxu0  ;;  %4846 = vmatmul.mubr.msk.f32.vlgmr.msra.gmra.mrb[78].mxu0 %vm1991_vm7, %v3983_v46 }
0x19ab   : > { %v4059_v24 = vpop.f32.mrb[78].mxu0 }
0x19ac   : > { %v4060_v45 = vadd.f32 %v4059_v24, %v3989_v60  ;;  %v4847_v53 = vpop.f32.mrb[79].mxu0 }
0x19ae   : > { %4064 = vst.msk [vmem:[%s675_s24] sm:$0x1] %vm4063_vm9, %v4060_v45 }
0x19af   : > { %5286 = shalt.err (!%p5283_p3)
}
0x19b0   : > { %s5287_s0 = scalar_lea.hbm %s6438_s5, 16  ;;  %s5291_s26 = scalar_lea.hbm %s6502_s22, 32 }
0x19b1   : > { %p5288_p4 = scmp.ne.s32.totalorder %s6438_s5, %s5287_s0  ;;  %p5292_p9 = scmp.lt.u32.totalorder %s6438_s5, %s6502_s22 }
0x19b2   : > { %p5293_p10 = scmp.lt.u32.totalorder %s5291_s26, %s5287_s0  ;;  %p5295_p12 = scmp.lt.u32.totalorder %s5287_s0, %s6438_s5 }
0x19b3   : > { %p5289_p7 = pnand %p5288_p4, %p5509_p5 }
0x19b4   : > { %p5294_p11 = por %p5293_p10, %p5292_p9 }
0x19b5   : > { %p5290_p8 = pneg %p5289_p7 }
0x19b6   : > { %p5296_p13 = por %p5295_p12, %p5294_p11 }
0x19b8   : > { %p5297_p0 = pnand %p5296_p13, %p5290_p8 }
0x19ba   : > { %5300 = shalt.err (!%p5297_p0)
}
0x19bb   : > { %4926 = dma.vmem_to_hbm [thread:$0]  (%p5509_p5), %s6440_s29, 16, %s6438_s5, %s4066_s2  }
0x19bc PF: > { %s6583_s8 = sld [smem:[#allocation5_spill]]  ;;  %p4932_p1 = scmp.ge.s32.totalorder %s5335_s30, 2 }
0x19be   : > { %p4929_p2 = pnand %p4932_p1, %p5513_p6 }
0x19c2   : > { %s4090_s4 = sand.u32 1, %s6583_s8  }
0x19c3   : > { %s4091_s3 = scalar_lea.sflag [#allocation3], %s4090_s4 }
0x19c4   : > { %5318 = dma.done.wait (!%p4929_p2), %s4091_s3, 16  }
0x19c5   : > { %5320 = vsyncadd (!%p4929_p2), %s4091_s3, 4294967280  ;;  %s6585_s30 = sld [smem:[#allocation7_spill]]  ;;  %s6586_s0 = sld [smem:[#allocation6_spill]] }
0x19c6   : > { %s6587_s29 = sld [smem:[#allocation8_spill]]  ;;  %s6588_s3 = smov %s5327_s28 }
0x19cb   : > { %p32_p3 = scmp.ge.s32.totalorder %s6585_s30, 4   ;;  %s6589_s28 = smov %s6586_s0 }
0x19cd   :  { %34 = sbr.rel (!%p32_p3) target bundleno = 13 (0xd), region = 155 }
0x19d4   :  { %4095 = vsyncpa [#allocation3], 1 }
0x19d5   :  { %4097 = vsyncpa [#allocation3 + $0x1], 1 }

</bundles_post_ra>
